<compile_context>
chip_gen: v7x
topology: tpu7x:2x2x1
jax: 0.10.0
libtpu: 0.0.40
codegen_flags: <defaults>
</compile_context>

<pallas_src>
import functools

import jax
import jax.numpy as jnp
from jax.experimental import pallas as pl
from jax.experimental.pallas import tpu as pltpu


def _round_up(x, m):
    return ((x + m - 1) // m) * m


# ----------------------------------------------------------------------------
# Pallas kernel
#   gx0_ref : (TT, Bp, 4H) streamed layer-0 pre-projected gates (bias included)
#   refs    : w_hh0_T,
#             [w_ih_l_T, b_l, w_hh_l_T for l = 1..L-1],
#             wf_t, bf, (wc_t, bc)?,
#             out_ref,
#             h_scratch (L,Bp,H), c_scratch (L,Bp,H),
#             seq_scratch (TT,Bp,H), gx_scratch (TT,Bp,4H)
# ----------------------------------------------------------------------------
def _taxa_kernel(num_layers, has_fc, seq_len, time_chunk, hidden, need_mask,
                 gx0_ref, *refs):
    H = hidden
    TT = time_chunk

    # ---- parse refs --------------------------------------------------------
    idx = 0
    w_hh = [None] * num_layers
    w_ih = [None] * num_layers
    bias = [None] * num_layers
    w_hh[0] = refs[idx]; idx += 1
    for l in range(1, num_layers):
        w_ih[l] = refs[idx]
        bias[l] = refs[idx + 1]
        w_hh[l] = refs[idx + 2]
        idx += 3
    wf_ref, bf_ref = refs[idx], refs[idx + 1]
    idx += 2
    if has_fc:
        wc_ref, bc_ref = refs[idx], refs[idx + 1]
        idx += 2
    out_ref = refs[idx]
    h_ref = refs[idx + 1]     # (L, Bp, H)  VMEM, carried across chunks
    c_ref = refs[idx + 2]     # (L, Bp, H)
    seq_ref = refs[idx + 3]   # (TT, Bp, H) current layer-input/output sequence
    gx_ref = refs[idx + 4]    # (TT, Bp, 4H) batched input-projection result

    Bp = h_ref.shape[1]
    chunk = pl.program_id(0)
    t0 = chunk * TT

    @pl.when(chunk == 0)
    def _():
        h_ref[...] = jnp.zeros_like(h_ref)
        c_ref[...] = jnp.zeros_like(c_ref)

    # ---- one layer over the whole time chunk -------------------------------
    def run_layer(l, gates_ref, w_hh_t, write_seq):
        def step(tt, carry):
            h_prev, c_prev = carry
            # serial critical path: one small (Bp,H)x(H,4H) MXU dot per step
            gates = gates_ref[tt] + jnp.dot(
                h_prev, w_hh_t, preferred_element_type=jnp.float32)

            # full-width activations on the (Bp, 4H) tile, then slice
            sig = jax.nn.sigmoid(gates)
            th = jnp.tanh(gates)
            i_g = sig[:, 0 * H:1 * H]
            f_g = sig[:, 1 * H:2 * H]
            g_g = th[:, 2 * H:3 * H]
            o_g = sig[:, 3 * H:4 * H]

            c_new = f_g * c_prev + i_g * g_g
            h_new = o_g * jnp.tanh(c_new)

            if need_mask:  # static flag: only traced when S % TT != 0
                valid = (t0 + tt) < seq_len
                h_new = jnp.where(valid, h_new, h_prev)
                c_new = jnp.where(valid, c_new, c_prev)

            if write_seq:
                seq_ref[tt] = h_new
            return (h_new, c_new)

        h_fin, c_fin = jax.lax.fori_loop(
            0, TT, step, (h_ref[l], c_ref[l]),
            unroll=True if TT <= 32 else 8)
        h_ref[l] = h_fin
        c_ref[l] = c_fin

    # layer 0: gates streamed in (pre-projected in the wrapper)
    run_layer(0, gx0_ref, w_hh[0][...], write_seq=(num_layers > 1))

    # layers 1..L-1: batch the input projection over the whole chunk
    for l in range(1, num_layers):
        seq_flat = seq_ref[...].reshape(TT * Bp, H)
        gx = jnp.dot(seq_flat, w_ih[l][...],
                     preferred_element_type=jnp.float32) + bias[l][...]
        gx_ref[...] = gx.reshape(gx_ref.shape)
        run_layer(l, gx_ref, w_hh[l][...], write_seq=(l < num_layers - 1))

    # ---- epilogue: last-step feature head (+ optional fc) ------------------
    @pl.when(chunk == pl.num_programs(0) - 1)
    def _():
        h_last = h_ref[num_layers - 1]
        fea = (jnp.dot(h_last, wf_ref[...],
                       preferred_element_type=jnp.float32) + bf_ref[...])
        if has_fc:
            out_ref[...] = (jnp.dot(fea, wc_ref[...],
                                    preferred_element_type=jnp.float32)
                            + bc_ref[...])
        else:
            out_ref[...] = fea


# ----------------------------------------------------------------------------
# Wrapper: embedding gather + layer-0 projection (XLA glue), weight packing,
#          padding, pallas_call
# ----------------------------------------------------------------------------
def taxa_encoder_forward(tokens, params, num_labels=None, max_time_chunk=128):
    emb_table = params["embedding"]                  # (dict_size, E)
    x = jnp.take(emb_table, tokens, axis=0)          # (B, S, E)
    x = jnp.transpose(x, (1, 0, 2))                  # (S, B, E) time-major

    S, B, E = x.shape
    assert S > 0, "empty sequence"
    lstm = params["lstm"]
    num_layers = len(lstm)
    H = lstm[0]["w_hh"].shape[1]                     # hidden = 2 * E
    H4 = 4 * H
    F = params["w_f"].shape[0]
    has_fc = num_labels is not None

    # --- padding for TPU layout --------------------------------------------
    Bp = _round_up(max(B, 8), 8)                     # f32 sublane multiple
    F_pad = _round_up(F, 128)                        # lane-dense intermediate
    out_dim = num_labels if has_fc else F
    out_pad = _round_up(num_labels, 128) if has_fc else F_pad

    # --- layer-0 input projection fused with the gather (lane-dense stream) -
    lp0 = lstm[0]
    b0 = (lp0["b_ih"] + lp0["b_hh"])[None, None, :]
    gx0 = jnp.einsum("sbe,ge->sbg", x, lp0["w_ih"]) + b0     # (S, B, 4H)

    # --- time chunking: whole sequence per grid step when it fits -----------
    TT = min(S, max_time_chunk)
    Sp = _round_up(S, TT)
    need_mask = (Sp != S)
    gx0_p = jnp.pad(gx0, ((0, Sp - S), (0, Bp - B), (0, 0)))  # (Sp, Bp, 4H)
    grid = (Sp // TT,)

    # --- pack weights (split W_ih / W_hh, transpose, fuse biases, pad) ------
    flat_weights = []
    in_specs = [pl.BlockSpec((TT, Bp, H4), lambda t: (t, 0, 0))]

    def add_const(arr):
        # constant-index weight/bias blocks (index_map ignores the grid step)
        flat_weights.append(arr)
        in_specs.append(pl.BlockSpec(arr.shape, lambda t: (0, 0)))

    add_const(lstm[0]["w_hh"].T)                               # (H, 4H)
    for l in range(1, num_layers):
        lp = lstm[l]
        add_const(lp["w_ih"].T)                                # (H, 4H)
        add_const((lp["b_ih"] + lp["b_hh"]).reshape(1, H4))    # (1, 4H)
        add_const(lp["w_hh"].T)                                # (H, 4H)

    wf_t = jnp.pad(params["w_f"].T, ((0, 0), (0, F_pad - F)))  # (H, F_pad)
    bf = jnp.pad(params["b_f"], (0, F_pad - F)).reshape(1, F_pad)
    add_const(wf_t)
    add_const(bf)
    if has_fc:
        L = num_labels
        wc_t = jnp.pad(params["w_c"].T,
                       ((0, F_pad - F), (0, out_pad - L)))     # (F_pad, out_pad)
        bc = jnp.pad(params["b_c"], (0, out_pad - L)).reshape(1, out_pad)
        add_const(wc_t)
        add_const(bc)

    kernel = functools.partial(_taxa_kernel, num_layers, has_fc, S, TT, H,
                               need_mask)

    out_p = pl.pallas_call(
        kernel,
        out_shape=jax.ShapeDtypeStruct((Bp, out_pad), jnp.float32),
        grid_spec=pltpu.PrefetchScalarGridSpec(
            num_scalar_prefetch=0,
            grid=grid,
            in_specs=in_specs,
            out_specs=pl.BlockSpec((Bp, out_pad), lambda t: (0, 0)),
            scratch_shapes=[
                pltpu.VMEM((num_layers, Bp, H), jnp.float32),  # h per layer
                pltpu.VMEM((num_layers, Bp, H), jnp.float32),  # c per layer
                pltpu.VMEM((TT, Bp, H), jnp.float32),          # layer seq i/o
                pltpu.VMEM((TT, Bp, H4), jnp.float32),         # batched gates
            ],
        ),
        compiler_params=pltpu.CompilerParams(
            dimension_semantics=("arbitrary",),   # sequential time recurrence
            vmem_limit_bytes=32 * 1024 * 1024,    # explicit budget (v7x-safe)
        ),
    )(gx0_p, *flat_weights)

    return out_p[:B, :out_dim]


# ----------------------------------------------------------------------------
# Deterministic parameter construction (PyTorch-like raw layout)
# ----------------------------------------------------------------------------
def make_params(key, dict_size, embedding_dim, num_layers, feature_dim,
                num_labels):
    H = 2 * embedding_dim
    keys = jax.random.split(key, 4 * num_layers + 8)
    k_iter = iter(keys)

    def unif(k, shape, scale):
        return jax.random.uniform(k, shape, jnp.float32, -scale, scale)

    emb = unif(next(k_iter), (dict_size, embedding_dim), 0.5)
    emb = emb.at[0].set(0.0)   # padding_idx=0 -> zero row

    s = 1.0 / float(H) ** 0.5
    lstm = []
    for l in range(num_layers):
        in_dim = embedding_dim if l == 0 else H
        lstm.append({
            "w_ih": unif(next(k_iter), (4 * H, in_dim), s),
            "w_hh": unif(next(k_iter), (4 * H, H), s),
            "b_ih": unif(next(k_iter), (4 * H,), s),
            "b_hh": unif(next(k_iter), (4 * H,), s),
        })

    sf = 1.0 / float(H) ** 0.5
    params = {
        "embedding": emb,
        "lstm": lstm,
        "w_f": unif(next(k_iter), (feature_dim, H), sf),   # (F, H)
        "b_f": unif(next(k_iter), (feature_dim,), sf),
    }
    if num_labels is not None:
        sc = 1.0 / float(feature_dim) ** 0.5
        params["w_c"] = unif(next(k_iter), (num_labels, feature_dim), sc)
        params["b_c"] = unif(next(k_iter), (num_labels,), sc)
    return params


# ----------------------------------------------------------------------------
# Pure-JAX reference (mirrors PyTorch eval-mode forward)
# ----------------------------------------------------------------------------
def reference_forward(tokens, params, num_labels=None):
    x = jnp.take(params["embedding"], tokens, axis=0)   # (B, S, E)
    x = jnp.transpose(x, (1, 0, 2))                     # (S, B, E)
    S, B, _ = x.shape
    H = params["lstm"][0]["w_hh"].shape[1]

    seq = x
    for lp in params["lstm"]:
        h = jnp.zeros((B, H), jnp.float32)
        c = jnp.zeros((B, H), jnp.float32)
        w_x = lp["w_ih"].T
        w_h = lp["w_hh"].T
        b = (lp["b_ih"] + lp["b_hh"])[None, :]
        outs = []
        for t in range(S):
            gates = seq[t] @ w_x + h @ w_h + b
            i_g = jax.nn.sigmoid(gates[:, 0 * H:1 * H])
            f_g = jax.nn.sigmoid(gates[:, 1 * H:2 * H])
            g_g = jnp.tanh(gates[:, 2 * H:3 * H])
            o_g = jax.nn.sigmoid(gates[:, 3 * H:4 * H])
            c = f_g * c + i_g * g_g
            h = o_g * jnp.tanh(c)
            outs.append(h)
        seq = jnp.stack(outs)
    fea = seq[-1] @ params["w_f"].T + params["b_f"]
    if num_labels is not None:
        return fea @ params["w_c"].T + params["b_c"]
    return fea


if __name__ == "__main__":
    # Small, module-consistent shapes
    dict_size = 32
    embedding_dim = 16       # -> LSTM hidden = 32, 4*H = 128 (lane aligned)
    num_layers = 4
    feature_dim = 64
    num_labels = 10
    batch = 2
    seq_len = 8

    key = jax.random.PRNGKey(0)
    pkey, tkey = jax.random.split(key)
    params = make_params(pkey, dict_size, embedding_dim, num_layers,
                         feature_dim, num_labels)

    tokens = jax.random.randint(tkey, (batch, seq_len), 0, dict_size,
                                dtype=jnp.int32)

    out = taxa_encoder_forward(tokens, params, num_labels=num_labels)
    out = jax.block_until_ready(out)

    ref = reference_forward(tokens, params, num_labels=num_labels)
    assert out.shape == (batch, num_labels), out.shape
    max_err = float(jnp.max(jnp.abs(out - ref)))
    assert jnp.allclose(out, ref, atol=1e-4, rtol=1e-4), max_err

    print("KERNEL_OK")
</pallas_src>

<mosaic_0001>
module attributes {stable_mosaic.version = 11 : i64} {
  func.func @_taxa_kernel(%arg0: i32, %arg1: memref<8x8x128xf32, #tpu.memory_space<vmem>>, %arg2: memref<32x128xf32, #tpu.memory_space<vmem>>, %arg3: memref<32x128xf32, #tpu.memory_space<vmem>>, %arg4: memref<1x128xf32, #tpu.memory_space<vmem>>, %arg5: memref<32x128xf32, #tpu.memory_space<vmem>>, %arg6: memref<32x128xf32, #tpu.memory_space<vmem>>, %arg7: memref<1x128xf32, #tpu.memory_space<vmem>>, %arg8: memref<32x128xf32, #tpu.memory_space<vmem>>, %arg9: memref<32x128xf32, #tpu.memory_space<vmem>>, %arg10: memref<1x128xf32, #tpu.memory_space<vmem>>, %arg11: memref<32x128xf32, #tpu.memory_space<vmem>>, %arg12: memref<32x128xf32, #tpu.memory_space<vmem>>, %arg13: memref<1x128xf32, #tpu.memory_space<vmem>>, %arg14: memref<128x128xf32, #tpu.memory_space<vmem>>, %arg15: memref<1x128xf32, #tpu.memory_space<vmem>>, %arg16: memref<8x128xf32, #tpu.memory_space<vmem>>, %arg17: memref<4x8x32xf32, #tpu.memory_space<vmem>>, %arg18: memref<4x8x32xf32, #tpu.memory_space<vmem>>, %arg19: memref<8x8x32xf32, #tpu.memory_space<vmem>>, %arg20: memref<8x8x128xf32, #tpu.memory_space<vmem>>) attributes {dimension_semantics = [#tpu.dimension_semantics<arbitrary>], iteration_bounds = array<i64: 1>, scalar_prefetch = 0 : i64, scratch_operands = 4 : i64, tpu.core_type = #tpu.core_type<tc>, window_params = [{transform_indices = @transform_0, window_bounds = array<i64: 8, 8, 128>}, {pipeline_mode = #tpu.pipeline_mode<synchronous>, transform_indices = @transform_1, window_bounds = array<i64: 32, 128>}, {pipeline_mode = #tpu.pipeline_mode<synchronous>, transform_indices = @transform_2, window_bounds = array<i64: 32, 128>}, {pipeline_mode = #tpu.pipeline_mode<synchronous>, transform_indices = @transform_3, window_bounds = array<i64: 1, 128>}, {pipeline_mode = #tpu.pipeline_mode<synchronous>, transform_indices = @transform_4, window_bounds = array<i64: 32, 128>}, {pipeline_mode = #tpu.pipeline_mode<synchronous>, transform_indices = @transform_5, window_bounds = array<i64: 32, 128>}, {pipeline_mode = #tpu.pipeline_mode<synchronous>, transform_indices = @transform_6, window_bounds = array<i64: 1, 128>}, {pipeline_mode = #tpu.pipeline_mode<synchronous>, transform_indices = @transform_7, window_bounds = array<i64: 32, 128>}, {pipeline_mode = #tpu.pipeline_mode<synchronous>, transform_indices = @transform_8, window_bounds = array<i64: 32, 128>}, {pipeline_mode = #tpu.pipeline_mode<synchronous>, transform_indices = @transform_9, window_bounds = array<i64: 1, 128>}, {pipeline_mode = #tpu.pipeline_mode<synchronous>, transform_indices = @transform_10, window_bounds = array<i64: 32, 128>}, {pipeline_mode = #tpu.pipeline_mode<synchronous>, transform_indices = @transform_11, window_bounds = array<i64: 32, 128>}, {pipeline_mode = #tpu.pipeline_mode<synchronous>, transform_indices = @transform_12, window_bounds = array<i64: 1, 128>}, {pipeline_mode = #tpu.pipeline_mode<synchronous>, transform_indices = @transform_13, window_bounds = array<i64: 128, 128>}, {pipeline_mode = #tpu.pipeline_mode<synchronous>, transform_indices = @transform_14, window_bounds = array<i64: 1, 128>}, {pipeline_mode = #tpu.pipeline_mode<synchronous>, transform_indices = @transform_15, window_bounds = array<i64: 8, 128>}]} {
    %c0_i32 = arith.constant 0 : i32
    %0 = arith.cmpi eq, %arg0, %c0_i32 : i32
    %1 = arith.extui %0 : i1 to i32
    %c0_i32_0 = arith.constant 0 : i32
    %2 = arith.cmpi ne, %1, %c0_i32_0 : i32
    scf.if %2 {
      %cst_291 = arith.constant 0.000000e+00 : f32
      %813 = vector.broadcast %cst_291 : f32 to vector<4x8x32xf32>
      %c0_292 = arith.constant 0 : index
      %c0_293 = arith.constant 0 : index
      %c0_294 = arith.constant 0 : index
      %814 = vector.load %arg17[%c0_292, %c0_293, %c0_294] : memref<4x8x32xf32, #tpu.memory_space<vmem>>, vector<4x8x32xf32>
      tpu.vector_store %arg17[%c0_292, %c0_293, %c0_294], %813 {strides = array<i32>} : memref<4x8x32xf32, #tpu.memory_space<vmem>>, vector<4x8x32xf32>,
      %cst_295 = arith.constant 0.000000e+00 : f32
      %815 = vector.broadcast %cst_295 : f32 to vector<4x8x32xf32>
      %c0_296 = arith.constant 0 : index
      %c0_297 = arith.constant 0 : index
      %c0_298 = arith.constant 0 : index
      %816 = vector.load %arg18[%c0_296, %c0_297, %c0_298] : memref<4x8x32xf32, #tpu.memory_space<vmem>>, vector<4x8x32xf32>
      tpu.vector_store %arg18[%c0_296, %c0_297, %c0_298], %815 {strides = array<i32>} : memref<4x8x32xf32, #tpu.memory_space<vmem>>, vector<4x8x32xf32>,
    } else {
    }
    %c0 = arith.constant 0 : index
    %c0_1 = arith.constant 0 : index
    %3 = vector.load %arg2[%c0, %c0_1] : memref<32x128xf32, #tpu.memory_space<vmem>>, vector<32x128xf32>
    %c0_2 = arith.constant 0 : index
    %c0_3 = arith.constant 0 : index
    %c0_4 = arith.constant 0 : index
    %4 = vector.load %arg17[%c0_2, %c0_3, %c0_4] : memref<4x8x32xf32, #tpu.memory_space<vmem>>, vector<1x8x32xf32>
    %5 = vector.shape_cast %4 : vector<1x8x32xf32> to vector<8x32xf32>
    %c0_5 = arith.constant 0 : index
    %c0_6 = arith.constant 0 : index
    %c0_7 = arith.constant 0 : index
    %6 = vector.load %arg18[%c0_5, %c0_6, %c0_7] : memref<4x8x32xf32, #tpu.memory_space<vmem>>, vector<1x8x32xf32>
    %7 = vector.shape_cast %6 : vector<1x8x32xf32> to vector<8x32xf32>
    %c0_i32_8 = arith.constant 0 : i32
    %8 = arith.index_cast %c0_i32_8 : i32 to index
    %c0_9 = arith.constant 0 : index
    %c0_10 = arith.constant 0 : index
    %9 = vector.load %arg1[%8, %c0_9, %c0_10] : memref<8x8x128xf32, #tpu.memory_space<vmem>>, vector<1x8x128xf32>
    %10 = vector.shape_cast %9 : vector<1x8x128xf32> to vector<8x128xf32>
    %cst = arith.constant dense<0.000000e+00> : vector<8x128xf32>
    %11 = tpu.matmul %5, %3, %cst {dimension_numbers = #tpu.dot_dimension_numbers<[1], [0], [0], [1], [0, 0, 1, 1], [], []>} : vector<8x32xf32>, vector<32x128xf32>, vector<8x128xf32> -> vector<8x128xf32>
    %12 = arith.addf %10, %11 : vector<8x128xf32>
    %13 = arith.negf %12 : vector<8x128xf32>
    %14 = math.exp %13 : vector<8x128xf32>
    %cst_11 = arith.constant 1.000000e+00 : f32
    %15 = vector.broadcast %cst_11 : f32 to vector<8x128xf32>
    %16 = arith.addf %15, %14 : vector<8x128xf32>
    %17 = arith.divf %15, %16 : vector<8x128xf32>
    %18 = math.tanh %12 : vector<8x128xf32>
    %19 = vector.extract_strided_slice %17 {offsets = [0, 0], sizes = [8, 32], strides = [1, 1]} : vector<8x128xf32> to vector<8x32xf32>
    %20 = vector.extract_strided_slice %17 {offsets = [0, 32], sizes = [8, 32], strides = [1, 1]} : vector<8x128xf32> to vector<8x32xf32>
    %21 = vector.extract_strided_slice %18 {offsets = [0, 64], sizes = [8, 32], strides = [1, 1]} : vector<8x128xf32> to vector<8x32xf32>
    %22 = vector.extract_strided_slice %17 {offsets = [0, 96], sizes = [8, 32], strides = [1, 1]} : vector<8x128xf32> to vector<8x32xf32>
    %23 = arith.mulf %20, %7 : vector<8x32xf32>
    %24 = arith.mulf %19, %21 : vector<8x32xf32>
    %25 = arith.addf %23, %24 : vector<8x32xf32>
    %26 = math.tanh %25 : vector<8x32xf32>
    %27 = arith.mulf %22, %26 : vector<8x32xf32>
    %28 = arith.index_cast %c0_i32_8 : i32 to index
    %c0_12 = arith.constant 0 : index
    %c0_13 = arith.constant 0 : index
    %29 = vector.load %arg19[%28, %c0_12, %c0_13] : memref<8x8x32xf32, #tpu.memory_space<vmem>>, vector<1x8x32xf32>
    %30 = vector.shape_cast %29 : vector<1x8x32xf32> to vector<8x32xf32>
    %31 = vector.shape_cast %27 : vector<8x32xf32> to vector<1x8x32xf32>
    tpu.vector_store %arg19[%28, %c0_12, %c0_13], %31 {strides = array<i32>} : memref<8x8x32xf32, #tpu.memory_space<vmem>>, vector<1x8x32xf32>,
    %c1_i32 = arith.constant 1 : i32
    %32 = arith.index_cast %c1_i32 : i32 to index
    %c0_14 = arith.constant 0 : index
    %c0_15 = arith.constant 0 : index
    %33 = vector.load %arg1[%32, %c0_14, %c0_15] : memref<8x8x128xf32, #tpu.memory_space<vmem>>, vector<1x8x128xf32>
    %34 = vector.shape_cast %33 : vector<1x8x128xf32> to vector<8x128xf32>
    %cst_16 = arith.constant dense<0.000000e+00> : vector<8x128xf32>
    %35 = tpu.matmul %27, %3, %cst_16 {dimension_numbers = #tpu.dot_dimension_numbers<[1], [0], [0], [1], [0, 0, 1, 1], [], []>} : vector<8x32xf32>, vector<32x128xf32>, vector<8x128xf32> -> vector<8x128xf32>
    %36 = arith.addf %34, %35 : vector<8x128xf32>
    %37 = arith.negf %36 : vector<8x128xf32>
    %38 = math.exp %37 : vector<8x128xf32>
    %cst_17 = arith.constant 1.000000e+00 : f32
    %39 = vector.broadcast %cst_17 : f32 to vector<8x128xf32>
    %40 = arith.addf %39, %38 : vector<8x128xf32>
    %41 = arith.divf %39, %40 : vector<8x128xf32>
    %42 = math.tanh %36 : vector<8x128xf32>
    %43 = vector.extract_strided_slice %41 {offsets = [0, 0], sizes = [8, 32], strides = [1, 1]} : vector<8x128xf32> to vector<8x32xf32>
    %44 = vector.extract_strided_slice %41 {offsets = [0, 32], sizes = [8, 32], strides = [1, 1]} : vector<8x128xf32> to vector<8x32xf32>
    %45 = vector.extract_strided_slice %42 {offsets = [0, 64], sizes = [8, 32], strides = [1, 1]} : vector<8x128xf32> to vector<8x32xf32>
    %46 = vector.extract_strided_slice %41 {offsets = [0, 96], sizes = [8, 32], strides = [1, 1]} : vector<8x128xf32> to vector<8x32xf32>
    %47 = arith.mulf %44, %25 : vector<8x32xf32>
    %48 = arith.mulf %43, %45 : vector<8x32xf32>
    %49 = arith.addf %47, %48 : vector<8x32xf32>
    %50 = math.tanh %49 : vector<8x32xf32>
    %51 = arith.mulf %46, %50 : vector<8x32xf32>
    %52 = arith.index_cast %c1_i32 : i32 to index
    %c0_18 = arith.constant 0 : index
    %c0_19 = arith.constant 0 : index
    %53 = vector.load %arg19[%52, %c0_18, %c0_19] : memref<8x8x32xf32, #tpu.memory_space<vmem>>, vector<1x8x32xf32>
    %54 = vector.shape_cast %53 : vector<1x8x32xf32> to vector<8x32xf32>
    %55 = vector.shape_cast %51 : vector<8x32xf32> to vector<1x8x32xf32>
    tpu.vector_store %arg19[%52, %c0_18, %c0_19], %55 {strides = array<i32>} : memref<8x8x32xf32, #tpu.memory_space<vmem>>, vector<1x8x32xf32>,
    %c2_i32 = arith.constant 2 : i32
    %56 = arith.index_cast %c2_i32 : i32 to index
    %c0_20 = arith.constant 0 : index
    %c0_21 = arith.constant 0 : index
    %57 = vector.load %arg1[%56, %c0_20, %c0_21] : memref<8x8x128xf32, #tpu.memory_space<vmem>>, vector<1x8x128xf32>
    %58 = vector.shape_cast %57 : vector<1x8x128xf32> to vector<8x128xf32>
    %cst_22 = arith.constant dense<0.000000e+00> : vector<8x128xf32>
    %59 = tpu.matmul %51, %3, %cst_22 {dimension_numbers = #tpu.dot_dimension_numbers<[1], [0], [0], [1], [0, 0, 1, 1], [], []>} : vector<8x32xf32>, vector<32x128xf32>, vector<8x128xf32> -> vector<8x128xf32>
    %60 = arith.addf %58, %59 : vector<8x128xf32>
    %61 = arith.negf %60 : vector<8x128xf32>
    %62 = math.exp %61 : vector<8x128xf32>
    %cst_23 = arith.constant 1.000000e+00 : f32
    %63 = vector.broadcast %cst_23 : f32 to vector<8x128xf32>
    %64 = arith.addf %63, %62 : vector<8x128xf32>
    %65 = arith.divf %63, %64 : vector<8x128xf32>
    %66 = math.tanh %60 : vector<8x128xf32>
    %67 = vector.extract_strided_slice %65 {offsets = [0, 0], sizes = [8, 32], strides = [1, 1]} : vector<8x128xf32> to vector<8x32xf32>
    %68 = vector.extract_strided_slice %65 {offsets = [0, 32], sizes = [8, 32], strides = [1, 1]} : vector<8x128xf32> to vector<8x32xf32>
    %69 = vector.extract_strided_slice %66 {offsets = [0, 64], sizes = [8, 32], strides = [1, 1]} : vector<8x128xf32> to vector<8x32xf32>
    %70 = vector.extract_strided_slice %65 {offsets = [0, 96], sizes = [8, 32], strides = [1, 1]} : vector<8x128xf32> to vector<8x32xf32>
    %71 = arith.mulf %68, %49 : vector<8x32xf32>
    %72 = arith.mulf %67, %69 : vector<8x32xf32>
    %73 = arith.addf %71, %72 : vector<8x32xf32>
    %74 = math.tanh %73 : vector<8x32xf32>
    %75 = arith.mulf %70, %74 : vector<8x32xf32>
    %76 = arith.index_cast %c2_i32 : i32 to index
    %c0_24 = arith.constant 0 : index
    %c0_25 = arith.constant 0 : index
    %77 = vector.load %arg19[%76, %c0_24, %c0_25] : memref<8x8x32xf32, #tpu.memory_space<vmem>>, vector<1x8x32xf32>
    %78 = vector.shape_cast %77 : vector<1x8x32xf32> to vector<8x32xf32>
    %79 = vector.shape_cast %75 : vector<8x32xf32> to vector<1x8x32xf32>
    tpu.vector_store %arg19[%76, %c0_24, %c0_25], %79 {strides = array<i32>} : memref<8x8x32xf32, #tpu.memory_space<vmem>>, vector<1x8x32xf32>,
    %c3_i32 = arith.constant 3 : i32
    %80 = arith.index_cast %c3_i32 : i32 to index
    %c0_26 = arith.constant 0 : index
    %c0_27 = arith.constant 0 : index
    %81 = vector.load %arg1[%80, %c0_26, %c0_27] : memref<8x8x128xf32, #tpu.memory_space<vmem>>, vector<1x8x128xf32>
    %82 = vector.shape_cast %81 : vector<1x8x128xf32> to vector<8x128xf32>
    %cst_28 = arith.constant dense<0.000000e+00> : vector<8x128xf32>
    %83 = tpu.matmul %75, %3, %cst_28 {dimension_numbers = #tpu.dot_dimension_numbers<[1], [0], [0], [1], [0, 0, 1, 1], [], []>} : vector<8x32xf32>, vector<32x128xf32>, vector<8x128xf32> -> vector<8x128xf32>
    %84 = arith.addf %82, %83 : vector<8x128xf32>
    %85 = arith.negf %84 : vector<8x128xf32>
    %86 = math.exp %85 : vector<8x128xf32>
    %cst_29 = arith.constant 1.000000e+00 : f32
    %87 = vector.broadcast %cst_29 : f32 to vector<8x128xf32>
    %88 = arith.addf %87, %86 : vector<8x128xf32>
    %89 = arith.divf %87, %88 : vector<8x128xf32>
    %90 = math.tanh %84 : vector<8x128xf32>
    %91 = vector.extract_strided_slice %89 {offsets = [0, 0], sizes = [8, 32], strides = [1, 1]} : vector<8x128xf32> to vector<8x32xf32>
    %92 = vector.extract_strided_slice %89 {offsets = [0, 32], sizes = [8, 32], strides = [1, 1]} : vector<8x128xf32> to vector<8x32xf32>
    %93 = vector.extract_strided_slice %90 {offsets = [0, 64], sizes = [8, 32], strides = [1, 1]} : vector<8x128xf32> to vector<8x32xf32>
    %94 = vector.extract_strided_slice %89 {offsets = [0, 96], sizes = [8, 32], strides = [1, 1]} : vector<8x128xf32> to vector<8x32xf32>
    %95 = arith.mulf %92, %73 : vector<8x32xf32>
    %96 = arith.mulf %91, %93 : vector<8x32xf32>
    %97 = arith.addf %95, %96 : vector<8x32xf32>
    %98 = math.tanh %97 : vector<8x32xf32>
    %99 = arith.mulf %94, %98 : vector<8x32xf32>
    %100 = arith.index_cast %c3_i32 : i32 to index
    %c0_30 = arith.constant 0 : index
    %c0_31 = arith.constant 0 : index
    %101 = vector.load %arg19[%100, %c0_30, %c0_31] : memref<8x8x32xf32, #tpu.memory_space<vmem>>, vector<1x8x32xf32>
    %102 = vector.shape_cast %101 : vector<1x8x32xf32> to vector<8x32xf32>
    %103 = vector.shape_cast %99 : vector<8x32xf32> to vector<1x8x32xf32>
    tpu.vector_store %arg19[%100, %c0_30, %c0_31], %103 {strides = array<i32>} : memref<8x8x32xf32, #tpu.memory_space<vmem>>, vector<1x8x32xf32>,
    %c4_i32 = arith.constant 4 : i32
    %104 = arith.index_cast %c4_i32 : i32 to index
    %c0_32 = arith.constant 0 : index
    %c0_33 = arith.constant 0 : index
    %105 = vector.load %arg1[%104, %c0_32, %c0_33] : memref<8x8x128xf32, #tpu.memory_space<vmem>>, vector<1x8x128xf32>
    %106 = vector.shape_cast %105 : vector<1x8x128xf32> to vector<8x128xf32>
    %cst_34 = arith.constant dense<0.000000e+00> : vector<8x128xf32>
    %107 = tpu.matmul %99, %3, %cst_34 {dimension_numbers = #tpu.dot_dimension_numbers<[1], [0], [0], [1], [0, 0, 1, 1], [], []>} : vector<8x32xf32>, vector<32x128xf32>, vector<8x128xf32> -> vector<8x128xf32>
    %108 = arith.addf %106, %107 : vector<8x128xf32>
    %109 = arith.negf %108 : vector<8x128xf32>
    %110 = math.exp %109 : vector<8x128xf32>
    %cst_35 = arith.constant 1.000000e+00 : f32
    %111 = vector.broadcast %cst_35 : f32 to vector<8x128xf32>
    %112 = arith.addf %111, %110 : vector<8x128xf32>
    %113 = arith.divf %111, %112 : vector<8x128xf32>
    %114 = math.tanh %108 : vector<8x128xf32>
    %115 = vector.extract_strided_slice %113 {offsets = [0, 0], sizes = [8, 32], strides = [1, 1]} : vector<8x128xf32> to vector<8x32xf32>
    %116 = vector.extract_strided_slice %113 {offsets = [0, 32], sizes = [8, 32], strides = [1, 1]} : vector<8x128xf32> to vector<8x32xf32>
    %117 = vector.extract_strided_slice %114 {offsets = [0, 64], sizes = [8, 32], strides = [1, 1]} : vector<8x128xf32> to vector<8x32xf32>
    %118 = vector.extract_strided_slice %113 {offsets = [0, 96], sizes = [8, 32], strides = [1, 1]} : vector<8x128xf32> to vector<8x32xf32>
    %119 = arith.mulf %116, %97 : vector<8x32xf32>
    %120 = arith.mulf %115, %117 : vector<8x32xf32>
    %121 = arith.addf %119, %120 : vector<8x32xf32>
    %122 = math.tanh %121 : vector<8x32xf32>
    %123 = arith.mulf %118, %122 : vector<8x32xf32>
    %124 = arith.index_cast %c4_i32 : i32 to index
    %c0_36 = arith.constant 0 : index
    %c0_37 = arith.constant 0 : index
    %125 = vector.load %arg19[%124, %c0_36, %c0_37] : memref<8x8x32xf32, #tpu.memory_space<vmem>>, vector<1x8x32xf32>
    %126 = vector.shape_cast %125 : vector<1x8x32xf32> to vector<8x32xf32>
    %127 = vector.shape_cast %123 : vector<8x32xf32> to vector<1x8x32xf32>
    tpu.vector_store %arg19[%124, %c0_36, %c0_37], %127 {strides = array<i32>} : memref<8x8x32xf32, #tpu.memory_space<vmem>>, vector<1x8x32xf32>,
    %c5_i32 = arith.constant 5 : i32
    %128 = arith.index_cast %c5_i32 : i32 to index
    %c0_38 = arith.constant 0 : index
    %c0_39 = arith.constant 0 : index
    %129 = vector.load %arg1[%128, %c0_38, %c0_39] : memref<8x8x128xf32, #tpu.memory_space<vmem>>, vector<1x8x128xf32>
    %130 = vector.shape_cast %129 : vector<1x8x128xf32> to vector<8x128xf32>
    %cst_40 = arith.constant dense<0.000000e+00> : vector<8x128xf32>
    %131 = tpu.matmul %123, %3, %cst_40 {dimension_numbers = #tpu.dot_dimension_numbers<[1], [0], [0], [1], [0, 0, 1, 1], [], []>} : vector<8x32xf32>, vector<32x128xf32>, vector<8x128xf32> -> vector<8x128xf32>
    %132 = arith.addf %130, %131 : vector<8x128xf32>
    %133 = arith.negf %132 : vector<8x128xf32>
    %134 = math.exp %133 : vector<8x128xf32>
    %cst_41 = arith.constant 1.000000e+00 : f32
    %135 = vector.broadcast %cst_41 : f32 to vector<8x128xf32>
    %136 = arith.addf %135, %134 : vector<8x128xf32>
    %137 = arith.divf %135, %136 : vector<8x128xf32>
    %138 = math.tanh %132 : vector<8x128xf32>
    %139 = vector.extract_strided_slice %137 {offsets = [0, 0], sizes = [8, 32], strides = [1, 1]} : vector<8x128xf32> to vector<8x32xf32>
    %140 = vector.extract_strided_slice %137 {offsets = [0, 32], sizes = [8, 32], strides = [1, 1]} : vector<8x128xf32> to vector<8x32xf32>
    %141 = vector.extract_strided_slice %138 {offsets = [0, 64], sizes = [8, 32], strides = [1, 1]} : vector<8x128xf32> to vector<8x32xf32>
    %142 = vector.extract_strided_slice %137 {offsets = [0, 96], sizes = [8, 32], strides = [1, 1]} : vector<8x128xf32> to vector<8x32xf32>
    %143 = arith.mulf %140, %121 : vector<8x32xf32>
    %144 = arith.mulf %139, %141 : vector<8x32xf32>
    %145 = arith.addf %143, %144 : vector<8x32xf32>
    %146 = math.tanh %145 : vector<8x32xf32>
    %147 = arith.mulf %142, %146 : vector<8x32xf32>
    %148 = arith.index_cast %c5_i32 : i32 to index
    %c0_42 = arith.constant 0 : index
    %c0_43 = arith.constant 0 : index
    %149 = vector.load %arg19[%148, %c0_42, %c0_43] : memref<8x8x32xf32, #tpu.memory_space<vmem>>, vector<1x8x32xf32>
    %150 = vector.shape_cast %149 : vector<1x8x32xf32> to vector<8x32xf32>
    %151 = vector.shape_cast %147 : vector<8x32xf32> to vector<1x8x32xf32>
    tpu.vector_store %arg19[%148, %c0_42, %c0_43], %151 {strides = array<i32>} : memref<8x8x32xf32, #tpu.memory_space<vmem>>, vector<1x8x32xf32>,
    %c6_i32 = arith.constant 6 : i32
    %152 = arith.index_cast %c6_i32 : i32 to index
    %c0_44 = arith.constant 0 : index
    %c0_45 = arith.constant 0 : index
    %153 = vector.load %arg1[%152, %c0_44, %c0_45] : memref<8x8x128xf32, #tpu.memory_space<vmem>>, vector<1x8x128xf32>
    %154 = vector.shape_cast %153 : vector<1x8x128xf32> to vector<8x128xf32>
    %cst_46 = arith.constant dense<0.000000e+00> : vector<8x128xf32>
    %155 = tpu.matmul %147, %3, %cst_46 {dimension_numbers = #tpu.dot_dimension_numbers<[1], [0], [0], [1], [0, 0, 1, 1], [], []>} : vector<8x32xf32>, vector<32x128xf32>, vector<8x128xf32> -> vector<8x128xf32>
    %156 = arith.addf %154, %155 : vector<8x128xf32>
    %157 = arith.negf %156 : vector<8x128xf32>
    %158 = math.exp %157 : vector<8x128xf32>
    %cst_47 = arith.constant 1.000000e+00 : f32
    %159 = vector.broadcast %cst_47 : f32 to vector<8x128xf32>
    %160 = arith.addf %159, %158 : vector<8x128xf32>
    %161 = arith.divf %159, %160 : vector<8x128xf32>
    %162 = math.tanh %156 : vector<8x128xf32>
    %163 = vector.extract_strided_slice %161 {offsets = [0, 0], sizes = [8, 32], strides = [1, 1]} : vector<8x128xf32> to vector<8x32xf32>
    %164 = vector.extract_strided_slice %161 {offsets = [0, 32], sizes = [8, 32], strides = [1, 1]} : vector<8x128xf32> to vector<8x32xf32>
    %165 = vector.extract_strided_slice %162 {offsets = [0, 64], sizes = [8, 32], strides = [1, 1]} : vector<8x128xf32> to vector<8x32xf32>
    %166 = vector.extract_strided_slice %161 {offsets = [0, 96], sizes = [8, 32], strides = [1, 1]} : vector<8x128xf32> to vector<8x32xf32>
    %167 = arith.mulf %164, %145 : vector<8x32xf32>
    %168 = arith.mulf %163, %165 : vector<8x32xf32>
    %169 = arith.addf %167, %168 : vector<8x32xf32>
    %170 = math.tanh %169 : vector<8x32xf32>
    %171 = arith.mulf %166, %170 : vector<8x32xf32>
    %172 = arith.index_cast %c6_i32 : i32 to index
    %c0_48 = arith.constant 0 : index
    %c0_49 = arith.constant 0 : index
    %173 = vector.load %arg19[%172, %c0_48, %c0_49] : memref<8x8x32xf32, #tpu.memory_space<vmem>>, vector<1x8x32xf32>
    %174 = vector.shape_cast %173 : vector<1x8x32xf32> to vector<8x32xf32>
    %175 = vector.shape_cast %171 : vector<8x32xf32> to vector<1x8x32xf32>
    tpu.vector_store %arg19[%172, %c0_48, %c0_49], %175 {strides = array<i32>} : memref<8x8x32xf32, #tpu.memory_space<vmem>>, vector<1x8x32xf32>,
    %c7_i32 = arith.constant 7 : i32
    %176 = arith.index_cast %c7_i32 : i32 to index
    %c0_50 = arith.constant 0 : index
    %c0_51 = arith.constant 0 : index
    %177 = vector.load %arg1[%176, %c0_50, %c0_51] : memref<8x8x128xf32, #tpu.memory_space<vmem>>, vector<1x8x128xf32>
    %178 = vector.shape_cast %177 : vector<1x8x128xf32> to vector<8x128xf32>
    %cst_52 = arith.constant dense<0.000000e+00> : vector<8x128xf32>
    %179 = tpu.matmul %171, %3, %cst_52 {dimension_numbers = #tpu.dot_dimension_numbers<[1], [0], [0], [1], [0, 0, 1, 1], [], []>} : vector<8x32xf32>, vector<32x128xf32>, vector<8x128xf32> -> vector<8x128xf32>
    %180 = arith.addf %178, %179 : vector<8x128xf32>
    %181 = arith.negf %180 : vector<8x128xf32>
    %182 = math.exp %181 : vector<8x128xf32>
    %cst_53 = arith.constant 1.000000e+00 : f32
    %183 = vector.broadcast %cst_53 : f32 to vector<8x128xf32>
    %184 = arith.addf %183, %182 : vector<8x128xf32>
    %185 = arith.divf %183, %184 : vector<8x128xf32>
    %186 = math.tanh %180 : vector<8x128xf32>
    %187 = vector.extract_strided_slice %185 {offsets = [0, 0], sizes = [8, 32], strides = [1, 1]} : vector<8x128xf32> to vector<8x32xf32>
    %188 = vector.extract_strided_slice %185 {offsets = [0, 32], sizes = [8, 32], strides = [1, 1]} : vector<8x128xf32> to vector<8x32xf32>
    %189 = vector.extract_strided_slice %186 {offsets = [0, 64], sizes = [8, 32], strides = [1, 1]} : vector<8x128xf32> to vector<8x32xf32>
    %190 = vector.extract_strided_slice %185 {offsets = [0, 96], sizes = [8, 32], strides = [1, 1]} : vector<8x128xf32> to vector<8x32xf32>
    %191 = arith.mulf %188, %169 : vector<8x32xf32>
    %192 = arith.mulf %187, %189 : vector<8x32xf32>
    %193 = arith.addf %191, %192 : vector<8x32xf32>
    %194 = math.tanh %193 : vector<8x32xf32>
    %195 = arith.mulf %190, %194 : vector<8x32xf32>
    %196 = arith.index_cast %c7_i32 : i32 to index
    %c0_54 = arith.constant 0 : index
    %c0_55 = arith.constant 0 : index
    %197 = vector.load %arg19[%196, %c0_54, %c0_55] : memref<8x8x32xf32, #tpu.memory_space<vmem>>, vector<1x8x32xf32>
    %198 = vector.shape_cast %197 : vector<1x8x32xf32> to vector<8x32xf32>
    %199 = vector.shape_cast %195 : vector<8x32xf32> to vector<1x8x32xf32>
    tpu.vector_store %arg19[%196, %c0_54, %c0_55], %199 {strides = array<i32>} : memref<8x8x32xf32, #tpu.memory_space<vmem>>, vector<1x8x32xf32>,
    %c8_i32 = arith.constant 8 : i32
    %c0_56 = arith.constant 0 : index
    %c0_57 = arith.constant 0 : index
    %c0_58 = arith.constant 0 : index
    %200 = vector.load %arg17[%c0_56, %c0_57, %c0_58] : memref<4x8x32xf32, #tpu.memory_space<vmem>>, vector<1x8x32xf32>
    %201 = vector.shape_cast %200 : vector<1x8x32xf32> to vector<8x32xf32>
    %202 = vector.shape_cast %195 : vector<8x32xf32> to vector<1x8x32xf32>
    tpu.vector_store %arg17[%c0_56, %c0_57, %c0_58], %202 {strides = array<i32>} : memref<4x8x32xf32, #tpu.memory_space<vmem>>, vector<1x8x32xf32>,
    %c0_59 = arith.constant 0 : index
    %c0_60 = arith.constant 0 : index
    %c0_61 = arith.constant 0 : index
    %203 = vector.load %arg18[%c0_59, %c0_60, %c0_61] : memref<4x8x32xf32, #tpu.memory_space<vmem>>, vector<1x8x32xf32>
    %204 = vector.shape_cast %203 : vector<1x8x32xf32> to vector<8x32xf32>
    %205 = vector.shape_cast %193 : vector<8x32xf32> to vector<1x8x32xf32>
    tpu.vector_store %arg18[%c0_59, %c0_60, %c0_61], %205 {strides = array<i32>} : memref<4x8x32xf32, #tpu.memory_space<vmem>>, vector<1x8x32xf32>,
    %c0_62 = arith.constant 0 : index
    %c0_63 = arith.constant 0 : index
    %c0_64 = arith.constant 0 : index
    %206 = vector.load %arg19[%c0_62, %c0_63, %c0_64] : memref<8x8x32xf32, #tpu.memory_space<vmem>>, vector<8x8x32xf32>
    %207 = vector.shape_cast %206 : vector<8x8x32xf32> to vector<64x32xf32>
    %c0_65 = arith.constant 0 : index
    %c0_66 = arith.constant 0 : index
    %208 = vector.load %arg3[%c0_65, %c0_66] : memref<32x128xf32, #tpu.memory_space<vmem>>, vector<32x128xf32>
    %cst_67 = arith.constant dense<0.000000e+00> : vector<64x128xf32>
    %209 = tpu.matmul %207, %208, %cst_67 {dimension_numbers = #tpu.dot_dimension_numbers<[1], [0], [0], [1], [0, 0, 1, 1], [], []>} : vector<64x32xf32>, vector<32x128xf32>, vector<64x128xf32> -> vector<64x128xf32>
    %c0_68 = arith.constant 0 : index
    %c0_69 = arith.constant 0 : index
    %210 = vector.load %arg4[%c0_68, %c0_69] : memref<1x128xf32, #tpu.memory_space<vmem>>, vector<1x128xf32>
    %211 = vector.broadcast %210 : vector<1x128xf32> to vector<64x128xf32>
    %212 = arith.addf %209, %211 : vector<64x128xf32>
    %213 = vector.shape_cast %212 : vector<64x128xf32> to vector<8x8x128xf32>
    %c0_70 = arith.constant 0 : index
    %c0_71 = arith.constant 0 : index
    %c0_72 = arith.constant 0 : index
    %214 = vector.load %arg20[%c0_70, %c0_71, %c0_72] : memref<8x8x128xf32, #tpu.memory_space<vmem>>, vector<8x8x128xf32>
    tpu.vector_store %arg20[%c0_70, %c0_71, %c0_72], %213 {strides = array<i32>} : memref<8x8x128xf32, #tpu.memory_space<vmem>>, vector<8x8x128xf32>,
    %c0_73 = arith.constant 0 : index
    %c0_74 = arith.constant 0 : index
    %215 = vector.load %arg5[%c0_73, %c0_74] : memref<32x128xf32, #tpu.memory_space<vmem>>, vector<32x128xf32>
    %c1 = arith.constant 1 : index
    %c0_75 = arith.constant 0 : index
    %c0_76 = arith.constant 0 : index
    %216 = vector.load %arg17[%c1, %c0_75, %c0_76] : memref<4x8x32xf32, #tpu.memory_space<vmem>>, vector<1x8x32xf32>
    %217 = vector.shape_cast %216 : vector<1x8x32xf32> to vector<8x32xf32>
    %c1_77 = arith.constant 1 : index
    %c0_78 = arith.constant 0 : index
    %c0_79 = arith.constant 0 : index
    %218 = vector.load %arg18[%c1_77, %c0_78, %c0_79] : memref<4x8x32xf32, #tpu.memory_space<vmem>>, vector<1x8x32xf32>
    %219 = vector.shape_cast %218 : vector<1x8x32xf32> to vector<8x32xf32>
    %c0_i32_80 = arith.constant 0 : i32
    %220 = arith.index_cast %c0_i32_80 : i32 to index
    %c0_81 = arith.constant 0 : index
    %c0_82 = arith.constant 0 : index
    %221 = vector.load %arg20[%220, %c0_81, %c0_82] : memref<8x8x128xf32, #tpu.memory_space<vmem>>, vector<1x8x128xf32>
    %222 = vector.shape_cast %221 : vector<1x8x128xf32> to vector<8x128xf32>
    %cst_83 = arith.constant dense<0.000000e+00> : vector<8x128xf32>
    %223 = tpu.matmul %217, %215, %cst_83 {dimension_numbers = #tpu.dot_dimension_numbers<[1], [0], [0], [1], [0, 0, 1, 1], [], []>} : vector<8x32xf32>, vector<32x128xf32>, vector<8x128xf32> -> vector<8x128xf32>
    %224 = arith.addf %222, %223 : vector<8x128xf32>
    %225 = arith.negf %224 : vector<8x128xf32>
    %226 = math.exp %225 : vector<8x128xf32>
    %cst_84 = arith.constant 1.000000e+00 : f32
    %227 = vector.broadcast %cst_84 : f32 to vector<8x128xf32>
    %228 = arith.addf %227, %226 : vector<8x128xf32>
    %229 = arith.divf %227, %228 : vector<8x128xf32>
    %230 = math.tanh %224 : vector<8x128xf32>
    %231 = vector.extract_strided_slice %229 {offsets = [0, 0], sizes = [8, 32], strides = [1, 1]} : vector<8x128xf32> to vector<8x32xf32>
    %232 = vector.extract_strided_slice %229 {offsets = [0, 32], sizes = [8, 32], strides = [1, 1]} : vector<8x128xf32> to vector<8x32xf32>
    %233 = vector.extract_strided_slice %230 {offsets = [0, 64], sizes = [8, 32], strides = [1, 1]} : vector<8x128xf32> to vector<8x32xf32>
    %234 = vector.extract_strided_slice %229 {offsets = [0, 96], sizes = [8, 32], strides = [1, 1]} : vector<8x128xf32> to vector<8x32xf32>
    %235 = arith.mulf %232, %219 : vector<8x32xf32>
    %236 = arith.mulf %231, %233 : vector<8x32xf32>
    %237 = arith.addf %235, %236 : vector<8x32xf32>
    %238 = math.tanh %237 : vector<8x32xf32>
    %239 = arith.mulf %234, %238 : vector<8x32xf32>
    %240 = arith.index_cast %c0_i32_80 : i32 to index
    %c0_85 = arith.constant 0 : index
    %c0_86 = arith.constant 0 : index
    %241 = vector.load %arg19[%240, %c0_85, %c0_86] : memref<8x8x32xf32, #tpu.memory_space<vmem>>, vector<1x8x32xf32>
    %242 = vector.shape_cast %241 : vector<1x8x32xf32> to vector<8x32xf32>
    %243 = vector.shape_cast %239 : vector<8x32xf32> to vector<1x8x32xf32>
    tpu.vector_store %arg19[%240, %c0_85, %c0_86], %243 {strides = array<i32>} : memref<8x8x32xf32, #tpu.memory_space<vmem>>, vector<1x8x32xf32>,
    %c1_i32_87 = arith.constant 1 : i32
    %244 = arith.index_cast %c1_i32_87 : i32 to index
    %c0_88 = arith.constant 0 : index
    %c0_89 = arith.constant 0 : index
    %245 = vector.load %arg20[%244, %c0_88, %c0_89] : memref<8x8x128xf32, #tpu.memory_space<vmem>>, vector<1x8x128xf32>
    %246 = vector.shape_cast %245 : vector<1x8x128xf32> to vector<8x128xf32>
    %cst_90 = arith.constant dense<0.000000e+00> : vector<8x128xf32>
    %247 = tpu.matmul %239, %215, %cst_90 {dimension_numbers = #tpu.dot_dimension_numbers<[1], [0], [0], [1], [0, 0, 1, 1], [], []>} : vector<8x32xf32>, vector<32x128xf32>, vector<8x128xf32> -> vector<8x128xf32>
    %248 = arith.addf %246, %247 : vector<8x128xf32>
    %249 = arith.negf %248 : vector<8x128xf32>
    %250 = math.exp %249 : vector<8x128xf32>
    %cst_91 = arith.constant 1.000000e+00 : f32
    %251 = vector.broadcast %cst_91 : f32 to vector<8x128xf32>
    %252 = arith.addf %251, %250 : vector<8x128xf32>
    %253 = arith.divf %251, %252 : vector<8x128xf32>
    %254 = math.tanh %248 : vector<8x128xf32>
    %255 = vector.extract_strided_slice %253 {offsets = [0, 0], sizes = [8, 32], strides = [1, 1]} : vector<8x128xf32> to vector<8x32xf32>
    %256 = vector.extract_strided_slice %253 {offsets = [0, 32], sizes = [8, 32], strides = [1, 1]} : vector<8x128xf32> to vector<8x32xf32>
    %257 = vector.extract_strided_slice %254 {offsets = [0, 64], sizes = [8, 32], strides = [1, 1]} : vector<8x128xf32> to vector<8x32xf32>
    %258 = vector.extract_strided_slice %253 {offsets = [0, 96], sizes = [8, 32], strides = [1, 1]} : vector<8x128xf32> to vector<8x32xf32>
    %259 = arith.mulf %256, %237 : vector<8x32xf32>
    %260 = arith.mulf %255, %257 : vector<8x32xf32>
    %261 = arith.addf %259, %260 : vector<8x32xf32>
    %262 = math.tanh %261 : vector<8x32xf32>
    %263 = arith.mulf %258, %262 : vector<8x32xf32>
    %264 = arith.index_cast %c1_i32_87 : i32 to index
    %c0_92 = arith.constant 0 : index
    %c0_93 = arith.constant 0 : index
    %265 = vector.load %arg19[%264, %c0_92, %c0_93] : memref<8x8x32xf32, #tpu.memory_space<vmem>>, vector<1x8x32xf32>
    %266 = vector.shape_cast %265 : vector<1x8x32xf32> to vector<8x32xf32>
    %267 = vector.shape_cast %263 : vector<8x32xf32> to vector<1x8x32xf32>
    tpu.vector_store %arg19[%264, %c0_92, %c0_93], %267 {strides = array<i32>} : memref<8x8x32xf32, #tpu.memory_space<vmem>>, vector<1x8x32xf32>,
    %c2_i32_94 = arith.constant 2 : i32
    %268 = arith.index_cast %c2_i32_94 : i32 to index
    %c0_95 = arith.constant 0 : index
    %c0_96 = arith.constant 0 : index
    %269 = vector.load %arg20[%268, %c0_95, %c0_96] : memref<8x8x128xf32, #tpu.memory_space<vmem>>, vector<1x8x128xf32>
    %270 = vector.shape_cast %269 : vector<1x8x128xf32> to vector<8x128xf32>
    %cst_97 = arith.constant dense<0.000000e+00> : vector<8x128xf32>
    %271 = tpu.matmul %263, %215, %cst_97 {dimension_numbers = #tpu.dot_dimension_numbers<[1], [0], [0], [1], [0, 0, 1, 1], [], []>} : vector<8x32xf32>, vector<32x128xf32>, vector<8x128xf32> -> vector<8x128xf32>
    %272 = arith.addf %270, %271 : vector<8x128xf32>
    %273 = arith.negf %272 : vector<8x128xf32>
    %274 = math.exp %273 : vector<8x128xf32>
    %cst_98 = arith.constant 1.000000e+00 : f32
    %275 = vector.broadcast %cst_98 : f32 to vector<8x128xf32>
    %276 = arith.addf %275, %274 : vector<8x128xf32>
    %277 = arith.divf %275, %276 : vector<8x128xf32>
    %278 = math.tanh %272 : vector<8x128xf32>
    %279 = vector.extract_strided_slice %277 {offsets = [0, 0], sizes = [8, 32], strides = [1, 1]} : vector<8x128xf32> to vector<8x32xf32>
    %280 = vector.extract_strided_slice %277 {offsets = [0, 32], sizes = [8, 32], strides = [1, 1]} : vector<8x128xf32> to vector<8x32xf32>
    %281 = vector.extract_strided_slice %278 {offsets = [0, 64], sizes = [8, 32], strides = [1, 1]} : vector<8x128xf32> to vector<8x32xf32>
    %282 = vector.extract_strided_slice %277 {offsets = [0, 96], sizes = [8, 32], strides = [1, 1]} : vector<8x128xf32> to vector<8x32xf32>
    %283 = arith.mulf %280, %261 : vector<8x32xf32>
    %284 = arith.mulf %279, %281 : vector<8x32xf32>
    %285 = arith.addf %283, %284 : vector<8x32xf32>
    %286 = math.tanh %285 : vector<8x32xf32>
    %287 = arith.mulf %282, %286 : vector<8x32xf32>
    %288 = arith.index_cast %c2_i32_94 : i32 to index
    %c0_99 = arith.constant 0 : index
    %c0_100 = arith.constant 0 : index
    %289 = vector.load %arg19[%288, %c0_99, %c0_100] : memref<8x8x32xf32, #tpu.memory_space<vmem>>, vector<1x8x32xf32>
    %290 = vector.shape_cast %289 : vector<1x8x32xf32> to vector<8x32xf32>
    %291 = vector.shape_cast %287 : vector<8x32xf32> to vector<1x8x32xf32>
    tpu.vector_store %arg19[%288, %c0_99, %c0_100], %291 {strides = array<i32>} : memref<8x8x32xf32, #tpu.memory_space<vmem>>, vector<1x8x32xf32>,
    %c3_i32_101 = arith.constant 3 : i32
    %292 = arith.index_cast %c3_i32_101 : i32 to index
    %c0_102 = arith.constant 0 : index
    %c0_103 = arith.constant 0 : index
    %293 = vector.load %arg20[%292, %c0_102, %c0_103] : memref<8x8x128xf32, #tpu.memory_space<vmem>>, vector<1x8x128xf32>
    %294 = vector.shape_cast %293 : vector<1x8x128xf32> to vector<8x128xf32>
    %cst_104 = arith.constant dense<0.000000e+00> : vector<8x128xf32>
    %295 = tpu.matmul %287, %215, %cst_104 {dimension_numbers = #tpu.dot_dimension_numbers<[1], [0], [0], [1], [0, 0, 1, 1], [], []>} : vector<8x32xf32>, vector<32x128xf32>, vector<8x128xf32> -> vector<8x128xf32>
    %296 = arith.addf %294, %295 : vector<8x128xf32>
    %297 = arith.negf %296 : vector<8x128xf32>
    %298 = math.exp %297 : vector<8x128xf32>
    %cst_105 = arith.constant 1.000000e+00 : f32
    %299 = vector.broadcast %cst_105 : f32 to vector<8x128xf32>
    %300 = arith.addf %299, %298 : vector<8x128xf32>
    %301 = arith.divf %299, %300 : vector<8x128xf32>
    %302 = math.tanh %296 : vector<8x128xf32>
    %303 = vector.extract_strided_slice %301 {offsets = [0, 0], sizes = [8, 32], strides = [1, 1]} : vector<8x128xf32> to vector<8x32xf32>
    %304 = vector.extract_strided_slice %301 {offsets = [0, 32], sizes = [8, 32], strides = [1, 1]} : vector<8x128xf32> to vector<8x32xf32>
    %305 = vector.extract_strided_slice %302 {offsets = [0, 64], sizes = [8, 32], strides = [1, 1]} : vector<8x128xf32> to vector<8x32xf32>
    %306 = vector.extract_strided_slice %301 {offsets = [0, 96], sizes = [8, 32], strides = [1, 1]} : vector<8x128xf32> to vector<8x32xf32>
    %307 = arith.mulf %304, %285 : vector<8x32xf32>
    %308 = arith.mulf %303, %305 : vector<8x32xf32>
    %309 = arith.addf %307, %308 : vector<8x32xf32>
    %310 = math.tanh %309 : vector<8x32xf32>
    %311 = arith.mulf %306, %310 : vector<8x32xf32>
    %312 = arith.index_cast %c3_i32_101 : i32 to index
    %c0_106 = arith.constant 0 : index
    %c0_107 = arith.constant 0 : index
    %313 = vector.load %arg19[%312, %c0_106, %c0_107] : memref<8x8x32xf32, #tpu.memory_space<vmem>>, vector<1x8x32xf32>
    %314 = vector.shape_cast %313 : vector<1x8x32xf32> to vector<8x32xf32>
    %315 = vector.shape_cast %311 : vector<8x32xf32> to vector<1x8x32xf32>
    tpu.vector_store %arg19[%312, %c0_106, %c0_107], %315 {strides = array<i32>} : memref<8x8x32xf32, #tpu.memory_space<vmem>>, vector<1x8x32xf32>,
    %c4_i32_108 = arith.constant 4 : i32
    %316 = arith.index_cast %c4_i32_108 : i32 to index
    %c0_109 = arith.constant 0 : index
    %c0_110 = arith.constant 0 : index
    %317 = vector.load %arg20[%316, %c0_109, %c0_110] : memref<8x8x128xf32, #tpu.memory_space<vmem>>, vector<1x8x128xf32>
    %318 = vector.shape_cast %317 : vector<1x8x128xf32> to vector<8x128xf32>
    %cst_111 = arith.constant dense<0.000000e+00> : vector<8x128xf32>
    %319 = tpu.matmul %311, %215, %cst_111 {dimension_numbers = #tpu.dot_dimension_numbers<[1], [0], [0], [1], [0, 0, 1, 1], [], []>} : vector<8x32xf32>, vector<32x128xf32>, vector<8x128xf32> -> vector<8x128xf32>
    %320 = arith.addf %318, %319 : vector<8x128xf32>
    %321 = arith.negf %320 : vector<8x128xf32>
    %322 = math.exp %321 : vector<8x128xf32>
    %cst_112 = arith.constant 1.000000e+00 : f32
    %323 = vector.broadcast %cst_112 : f32 to vector<8x128xf32>
    %324 = arith.addf %323, %322 : vector<8x128xf32>
    %325 = arith.divf %323, %324 : vector<8x128xf32>
    %326 = math.tanh %320 : vector<8x128xf32>
    %327 = vector.extract_strided_slice %325 {offsets = [0, 0], sizes = [8, 32], strides = [1, 1]} : vector<8x128xf32> to vector<8x32xf32>
    %328 = vector.extract_strided_slice %325 {offsets = [0, 32], sizes = [8, 32], strides = [1, 1]} : vector<8x128xf32> to vector<8x32xf32>
    %329 = vector.extract_strided_slice %326 {offsets = [0, 64], sizes = [8, 32], strides = [1, 1]} : vector<8x128xf32> to vector<8x32xf32>
    %330 = vector.extract_strided_slice %325 {offsets = [0, 96], sizes = [8, 32], strides = [1, 1]} : vector<8x128xf32> to vector<8x32xf32>
    %331 = arith.mulf %328, %309 : vector<8x32xf32>
    %332 = arith.mulf %327, %329 : vector<8x32xf32>
    %333 = arith.addf %331, %332 : vector<8x32xf32>
    %334 = math.tanh %333 : vector<8x32xf32>
    %335 = arith.mulf %330, %334 : vector<8x32xf32>
    %336 = arith.index_cast %c4_i32_108 : i32 to index
    %c0_113 = arith.constant 0 : index
    %c0_114 = arith.constant 0 : index
    %337 = vector.load %arg19[%336, %c0_113, %c0_114] : memref<8x8x32xf32, #tpu.memory_space<vmem>>, vector<1x8x32xf32>
    %338 = vector.shape_cast %337 : vector<1x8x32xf32> to vector<8x32xf32>
    %339 = vector.shape_cast %335 : vector<8x32xf32> to vector<1x8x32xf32>
    tpu.vector_store %arg19[%336, %c0_113, %c0_114], %339 {strides = array<i32>} : memref<8x8x32xf32, #tpu.memory_space<vmem>>, vector<1x8x32xf32>,
    %c5_i32_115 = arith.constant 5 : i32
    %340 = arith.index_cast %c5_i32_115 : i32 to index
    %c0_116 = arith.constant 0 : index
    %c0_117 = arith.constant 0 : index
    %341 = vector.load %arg20[%340, %c0_116, %c0_117] : memref<8x8x128xf32, #tpu.memory_space<vmem>>, vector<1x8x128xf32>
    %342 = vector.shape_cast %341 : vector<1x8x128xf32> to vector<8x128xf32>
    %cst_118 = arith.constant dense<0.000000e+00> : vector<8x128xf32>
    %343 = tpu.matmul %335, %215, %cst_118 {dimension_numbers = #tpu.dot_dimension_numbers<[1], [0], [0], [1], [0, 0, 1, 1], [], []>} : vector<8x32xf32>, vector<32x128xf32>, vector<8x128xf32> -> vector<8x128xf32>
    %344 = arith.addf %342, %343 : vector<8x128xf32>
    %345 = arith.negf %344 : vector<8x128xf32>
    %346 = math.exp %345 : vector<8x128xf32>
    %cst_119 = arith.constant 1.000000e+00 : f32
    %347 = vector.broadcast %cst_119 : f32 to vector<8x128xf32>
    %348 = arith.addf %347, %346 : vector<8x128xf32>
    %349 = arith.divf %347, %348 : vector<8x128xf32>
    %350 = math.tanh %344 : vector<8x128xf32>
    %351 = vector.extract_strided_slice %349 {offsets = [0, 0], sizes = [8, 32], strides = [1, 1]} : vector<8x128xf32> to vector<8x32xf32>
    %352 = vector.extract_strided_slice %349 {offsets = [0, 32], sizes = [8, 32], strides = [1, 1]} : vector<8x128xf32> to vector<8x32xf32>
    %353 = vector.extract_strided_slice %350 {offsets = [0, 64], sizes = [8, 32], strides = [1, 1]} : vector<8x128xf32> to vector<8x32xf32>
    %354 = vector.extract_strided_slice %349 {offsets = [0, 96], sizes = [8, 32], strides = [1, 1]} : vector<8x128xf32> to vector<8x32xf32>
    %355 = arith.mulf %352, %333 : vector<8x32xf32>
    %356 = arith.mulf %351, %353 : vector<8x32xf32>
    %357 = arith.addf %355, %356 : vector<8x32xf32>
    %358 = math.tanh %357 : vector<8x32xf32>
    %359 = arith.mulf %354, %358 : vector<8x32xf32>
    %360 = arith.index_cast %c5_i32_115 : i32 to index
    %c0_120 = arith.constant 0 : index
    %c0_121 = arith.constant 0 : index
    %361 = vector.load %arg19[%360, %c0_120, %c0_121] : memref<8x8x32xf32, #tpu.memory_space<vmem>>, vector<1x8x32xf32>
    %362 = vector.shape_cast %361 : vector<1x8x32xf32> to vector<8x32xf32>
    %363 = vector.shape_cast %359 : vector<8x32xf32> to vector<1x8x32xf32>
    tpu.vector_store %arg19[%360, %c0_120, %c0_121], %363 {strides = array<i32>} : memref<8x8x32xf32, #tpu.memory_space<vmem>>, vector<1x8x32xf32>,
    %c6_i32_122 = arith.constant 6 : i32
    %364 = arith.index_cast %c6_i32_122 : i32 to index
    %c0_123 = arith.constant 0 : index
    %c0_124 = arith.constant 0 : index
    %365 = vector.load %arg20[%364, %c0_123, %c0_124] : memref<8x8x128xf32, #tpu.memory_space<vmem>>, vector<1x8x128xf32>
    %366 = vector.shape_cast %365 : vector<1x8x128xf32> to vector<8x128xf32>
    %cst_125 = arith.constant dense<0.000000e+00> : vector<8x128xf32>
    %367 = tpu.matmul %359, %215, %cst_125 {dimension_numbers = #tpu.dot_dimension_numbers<[1], [0], [0], [1], [0, 0, 1, 1], [], []>} : vector<8x32xf32>, vector<32x128xf32>, vector<8x128xf32> -> vector<8x128xf32>
    %368 = arith.addf %366, %367 : vector<8x128xf32>
    %369 = arith.negf %368 : vector<8x128xf32>
    %370 = math.exp %369 : vector<8x128xf32>
    %cst_126 = arith.constant 1.000000e+00 : f32
    %371 = vector.broadcast %cst_126 : f32 to vector<8x128xf32>
    %372 = arith.addf %371, %370 : vector<8x128xf32>
    %373 = arith.divf %371, %372 : vector<8x128xf32>
    %374 = math.tanh %368 : vector<8x128xf32>
    %375 = vector.extract_strided_slice %373 {offsets = [0, 0], sizes = [8, 32], strides = [1, 1]} : vector<8x128xf32> to vector<8x32xf32>
    %376 = vector.extract_strided_slice %373 {offsets = [0, 32], sizes = [8, 32], strides = [1, 1]} : vector<8x128xf32> to vector<8x32xf32>
    %377 = vector.extract_strided_slice %374 {offsets = [0, 64], sizes = [8, 32], strides = [1, 1]} : vector<8x128xf32> to vector<8x32xf32>
    %378 = vector.extract_strided_slice %373 {offsets = [0, 96], sizes = [8, 32], strides = [1, 1]} : vector<8x128xf32> to vector<8x32xf32>
    %379 = arith.mulf %376, %357 : vector<8x32xf32>
    %380 = arith.mulf %375, %377 : vector<8x32xf32>
    %381 = arith.addf %379, %380 : vector<8x32xf32>
    %382 = math.tanh %381 : vector<8x32xf32>
    %383 = arith.mulf %378, %382 : vector<8x32xf32>
    %384 = arith.index_cast %c6_i32_122 : i32 to index
    %c0_127 = arith.constant 0 : index
    %c0_128 = arith.constant 0 : index
    %385 = vector.load %arg19[%384, %c0_127, %c0_128] : memref<8x8x32xf32, #tpu.memory_space<vmem>>, vector<1x8x32xf32>
    %386 = vector.shape_cast %385 : vector<1x8x32xf32> to vector<8x32xf32>
    %387 = vector.shape_cast %383 : vector<8x32xf32> to vector<1x8x32xf32>
    tpu.vector_store %arg19[%384, %c0_127, %c0_128], %387 {strides = array<i32>} : memref<8x8x32xf32, #tpu.memory_space<vmem>>, vector<1x8x32xf32>,
    %c7_i32_129 = arith.constant 7 : i32
    %388 = arith.index_cast %c7_i32_129 : i32 to index
    %c0_130 = arith.constant 0 : index
    %c0_131 = arith.constant 0 : index
    %389 = vector.load %arg20[%388, %c0_130, %c0_131] : memref<8x8x128xf32, #tpu.memory_space<vmem>>, vector<1x8x128xf32>
    %390 = vector.shape_cast %389 : vector<1x8x128xf32> to vector<8x128xf32>
    %cst_132 = arith.constant dense<0.000000e+00> : vector<8x128xf32>
    %391 = tpu.matmul %383, %215, %cst_132 {dimension_numbers = #tpu.dot_dimension_numbers<[1], [0], [0], [1], [0, 0, 1, 1], [], []>} : vector<8x32xf32>, vector<32x128xf32>, vector<8x128xf32> -> vector<8x128xf32>
    %392 = arith.addf %390, %391 : vector<8x128xf32>
    %393 = arith.negf %392 : vector<8x128xf32>
    %394 = math.exp %393 : vector<8x128xf32>
    %cst_133 = arith.constant 1.000000e+00 : f32
    %395 = vector.broadcast %cst_133 : f32 to vector<8x128xf32>
    %396 = arith.addf %395, %394 : vector<8x128xf32>
    %397 = arith.divf %395, %396 : vector<8x128xf32>
    %398 = math.tanh %392 : vector<8x128xf32>
    %399 = vector.extract_strided_slice %397 {offsets = [0, 0], sizes = [8, 32], strides = [1, 1]} : vector<8x128xf32> to vector<8x32xf32>
    %400 = vector.extract_strided_slice %397 {offsets = [0, 32], sizes = [8, 32], strides = [1, 1]} : vector<8x128xf32> to vector<8x32xf32>
    %401 = vector.extract_strided_slice %398 {offsets = [0, 64], sizes = [8, 32], strides = [1, 1]} : vector<8x128xf32> to vector<8x32xf32>
    %402 = vector.extract_strided_slice %397 {offsets = [0, 96], sizes = [8, 32], strides = [1, 1]} : vector<8x128xf32> to vector<8x32xf32>
    %403 = arith.mulf %400, %381 : vector<8x32xf32>
    %404 = arith.mulf %399, %401 : vector<8x32xf32>
    %405 = arith.addf %403, %404 : vector<8x32xf32>
    %406 = math.tanh %405 : vector<8x32xf32>
    %407 = arith.mulf %402, %406 : vector<8x32xf32>
    %408 = arith.index_cast %c7_i32_129 : i32 to index
    %c0_134 = arith.constant 0 : index
    %c0_135 = arith.constant 0 : index
    %409 = vector.load %arg19[%408, %c0_134, %c0_135] : memref<8x8x32xf32, #tpu.memory_space<vmem>>, vector<1x8x32xf32>
    %410 = vector.shape_cast %409 : vector<1x8x32xf32> to vector<8x32xf32>
    %411 = vector.shape_cast %407 : vector<8x32xf32> to vector<1x8x32xf32>
    tpu.vector_store %arg19[%408, %c0_134, %c0_135], %411 {strides = array<i32>} : memref<8x8x32xf32, #tpu.memory_space<vmem>>, vector<1x8x32xf32>,
    %c8_i32_136 = arith.constant 8 : i32
    %c1_137 = arith.constant 1 : index
    %c0_138 = arith.constant 0 : index
    %c0_139 = arith.constant 0 : index
    %412 = vector.load %arg17[%c1_137, %c0_138, %c0_139] : memref<4x8x32xf32, #tpu.memory_space<vmem>>, vector<1x8x32xf32>
    %413 = vector.shape_cast %412 : vector<1x8x32xf32> to vector<8x32xf32>
    %414 = vector.shape_cast %407 : vector<8x32xf32> to vector<1x8x32xf32>
    tpu.vector_store %arg17[%c1_137, %c0_138, %c0_139], %414 {strides = array<i32>} : memref<4x8x32xf32, #tpu.memory_space<vmem>>, vector<1x8x32xf32>,
    %c1_140 = arith.constant 1 : index
    %c0_141 = arith.constant 0 : index
    %c0_142 = arith.constant 0 : index
    %415 = vector.load %arg18[%c1_140, %c0_141, %c0_142] : memref<4x8x32xf32, #tpu.memory_space<vmem>>, vector<1x8x32xf32>
    %416 = vector.shape_cast %415 : vector<1x8x32xf32> to vector<8x32xf32>
    %417 = vector.shape_cast %405 : vector<8x32xf32> to vector<1x8x32xf32>
    tpu.vector_store %arg18[%c1_140, %c0_141, %c0_142], %417 {strides = array<i32>} : memref<4x8x32xf32, #tpu.memory_space<vmem>>, vector<1x8x32xf32>,
    %c0_143 = arith.constant 0 : index
    %c0_144 = arith.constant 0 : index
    %c0_145 = arith.constant 0 : index
    %418 = vector.load %arg19[%c0_143, %c0_144, %c0_145] : memref<8x8x32xf32, #tpu.memory_space<vmem>>, vector<8x8x32xf32>
    %419 = vector.shape_cast %418 : vector<8x8x32xf32> to vector<64x32xf32>
    %c0_146 = arith.constant 0 : index
    %c0_147 = arith.constant 0 : index
    %420 = vector.load %arg6[%c0_146, %c0_147] : memref<32x128xf32, #tpu.memory_space<vmem>>, vector<32x128xf32>
    %cst_148 = arith.constant dense<0.000000e+00> : vector<64x128xf32>
    %421 = tpu.matmul %419, %420, %cst_148 {dimension_numbers = #tpu.dot_dimension_numbers<[1], [0], [0], [1], [0, 0, 1, 1], [], []>} : vector<64x32xf32>, vector<32x128xf32>, vector<64x128xf32> -> vector<64x128xf32>
    %c0_149 = arith.constant 0 : index
    %c0_150 = arith.constant 0 : index
    %422 = vector.load %arg7[%c0_149, %c0_150] : memref<1x128xf32, #tpu.memory_space<vmem>>, vector<1x128xf32>
    %423 = vector.broadcast %422 : vector<1x128xf32> to vector<64x128xf32>
    %424 = arith.addf %421, %423 : vector<64x128xf32>
    %425 = vector.shape_cast %424 : vector<64x128xf32> to vector<8x8x128xf32>
    %c0_151 = arith.constant 0 : index
    %c0_152 = arith.constant 0 : index
    %c0_153 = arith.constant 0 : index
    %426 = vector.load %arg20[%c0_151, %c0_152, %c0_153] : memref<8x8x128xf32, #tpu.memory_space<vmem>>, vector<8x8x128xf32>
    tpu.vector_store %arg20[%c0_151, %c0_152, %c0_153], %425 {strides = array<i32>} : memref<8x8x128xf32, #tpu.memory_space<vmem>>, vector<8x8x128xf32>,
    %c0_154 = arith.constant 0 : index
    %c0_155 = arith.constant 0 : index
    %427 = vector.load %arg8[%c0_154, %c0_155] : memref<32x128xf32, #tpu.memory_space<vmem>>, vector<32x128xf32>
    %c2 = arith.constant 2 : index
    %c0_156 = arith.constant 0 : index
    %c0_157 = arith.constant 0 : index
    %428 = vector.load %arg17[%c2, %c0_156, %c0_157] : memref<4x8x32xf32, #tpu.memory_space<vmem>>, vector<1x8x32xf32>
    %429 = vector.shape_cast %428 : vector<1x8x32xf32> to vector<8x32xf32>
    %c2_158 = arith.constant 2 : index
    %c0_159 = arith.constant 0 : index
    %c0_160 = arith.constant 0 : index
    %430 = vector.load %arg18[%c2_158, %c0_159, %c0_160] : memref<4x8x32xf32, #tpu.memory_space<vmem>>, vector<1x8x32xf32>
    %431 = vector.shape_cast %430 : vector<1x8x32xf32> to vector<8x32xf32>
    %c0_i32_161 = arith.constant 0 : i32
    %432 = arith.index_cast %c0_i32_161 : i32 to index
    %c0_162 = arith.constant 0 : index
    %c0_163 = arith.constant 0 : index
    %433 = vector.load %arg20[%432, %c0_162, %c0_163] : memref<8x8x128xf32, #tpu.memory_space<vmem>>, vector<1x8x128xf32>
    %434 = vector.shape_cast %433 : vector<1x8x128xf32> to vector<8x128xf32>
    %cst_164 = arith.constant dense<0.000000e+00> : vector<8x128xf32>
    %435 = tpu.matmul %429, %427, %cst_164 {dimension_numbers = #tpu.dot_dimension_numbers<[1], [0], [0], [1], [0, 0, 1, 1], [], []>} : vector<8x32xf32>, vector<32x128xf32>, vector<8x128xf32> -> vector<8x128xf32>
    %436 = arith.addf %434, %435 : vector<8x128xf32>
    %437 = arith.negf %436 : vector<8x128xf32>
    %438 = math.exp %437 : vector<8x128xf32>
    %cst_165 = arith.constant 1.000000e+00 : f32
    %439 = vector.broadcast %cst_165 : f32 to vector<8x128xf32>
    %440 = arith.addf %439, %438 : vector<8x128xf32>
    %441 = arith.divf %439, %440 : vector<8x128xf32>
    %442 = math.tanh %436 : vector<8x128xf32>
    %443 = vector.extract_strided_slice %441 {offsets = [0, 0], sizes = [8, 32], strides = [1, 1]} : vector<8x128xf32> to vector<8x32xf32>
    %444 = vector.extract_strided_slice %441 {offsets = [0, 32], sizes = [8, 32], strides = [1, 1]} : vector<8x128xf32> to vector<8x32xf32>
    %445 = vector.extract_strided_slice %442 {offsets = [0, 64], sizes = [8, 32], strides = [1, 1]} : vector<8x128xf32> to vector<8x32xf32>
    %446 = vector.extract_strided_slice %441 {offsets = [0, 96], sizes = [8, 32], strides = [1, 1]} : vector<8x128xf32> to vector<8x32xf32>
    %447 = arith.mulf %444, %431 : vector<8x32xf32>
    %448 = arith.mulf %443, %445 : vector<8x32xf32>
    %449 = arith.addf %447, %448 : vector<8x32xf32>
    %450 = math.tanh %449 : vector<8x32xf32>
    %451 = arith.mulf %446, %450 : vector<8x32xf32>
    %452 = arith.index_cast %c0_i32_161 : i32 to index
    %c0_166 = arith.constant 0 : index
    %c0_167 = arith.constant 0 : index
    %453 = vector.load %arg19[%452, %c0_166, %c0_167] : memref<8x8x32xf32, #tpu.memory_space<vmem>>, vector<1x8x32xf32>
    %454 = vector.shape_cast %453 : vector<1x8x32xf32> to vector<8x32xf32>
    %455 = vector.shape_cast %451 : vector<8x32xf32> to vector<1x8x32xf32>
    tpu.vector_store %arg19[%452, %c0_166, %c0_167], %455 {strides = array<i32>} : memref<8x8x32xf32, #tpu.memory_space<vmem>>, vector<1x8x32xf32>,
    %c1_i32_168 = arith.constant 1 : i32
    %456 = arith.index_cast %c1_i32_168 : i32 to index
    %c0_169 = arith.constant 0 : index
    %c0_170 = arith.constant 0 : index
    %457 = vector.load %arg20[%456, %c0_169, %c0_170] : memref<8x8x128xf32, #tpu.memory_space<vmem>>, vector<1x8x128xf32>
    %458 = vector.shape_cast %457 : vector<1x8x128xf32> to vector<8x128xf32>
    %cst_171 = arith.constant dense<0.000000e+00> : vector<8x128xf32>
    %459 = tpu.matmul %451, %427, %cst_171 {dimension_numbers = #tpu.dot_dimension_numbers<[1], [0], [0], [1], [0, 0, 1, 1], [], []>} : vector<8x32xf32>, vector<32x128xf32>, vector<8x128xf32> -> vector<8x128xf32>
    %460 = arith.addf %458, %459 : vector<8x128xf32>
    %461 = arith.negf %460 : vector<8x128xf32>
    %462 = math.exp %461 : vector<8x128xf32>
    %cst_172 = arith.constant 1.000000e+00 : f32
    %463 = vector.broadcast %cst_172 : f32 to vector<8x128xf32>
    %464 = arith.addf %463, %462 : vector<8x128xf32>
    %465 = arith.divf %463, %464 : vector<8x128xf32>
    %466 = math.tanh %460 : vector<8x128xf32>
    %467 = vector.extract_strided_slice %465 {offsets = [0, 0], sizes = [8, 32], strides = [1, 1]} : vector<8x128xf32> to vector<8x32xf32>
    %468 = vector.extract_strided_slice %465 {offsets = [0, 32], sizes = [8, 32], strides = [1, 1]} : vector<8x128xf32> to vector<8x32xf32>
    %469 = vector.extract_strided_slice %466 {offsets = [0, 64], sizes = [8, 32], strides = [1, 1]} : vector<8x128xf32> to vector<8x32xf32>
    %470 = vector.extract_strided_slice %465 {offsets = [0, 96], sizes = [8, 32], strides = [1, 1]} : vector<8x128xf32> to vector<8x32xf32>
    %471 = arith.mulf %468, %449 : vector<8x32xf32>
    %472 = arith.mulf %467, %469 : vector<8x32xf32>
    %473 = arith.addf %471, %472 : vector<8x32xf32>
    %474 = math.tanh %473 : vector<8x32xf32>
    %475 = arith.mulf %470, %474 : vector<8x32xf32>
    %476 = arith.index_cast %c1_i32_168 : i32 to index
    %c0_173 = arith.constant 0 : index
    %c0_174 = arith.constant 0 : index
    %477 = vector.load %arg19[%476, %c0_173, %c0_174] : memref<8x8x32xf32, #tpu.memory_space<vmem>>, vector<1x8x32xf32>
    %478 = vector.shape_cast %477 : vector<1x8x32xf32> to vector<8x32xf32>
    %479 = vector.shape_cast %475 : vector<8x32xf32> to vector<1x8x32xf32>
    tpu.vector_store %arg19[%476, %c0_173, %c0_174], %479 {strides = array<i32>} : memref<8x8x32xf32, #tpu.memory_space<vmem>>, vector<1x8x32xf32>,
    %c2_i32_175 = arith.constant 2 : i32
    %480 = arith.index_cast %c2_i32_175 : i32 to index
    %c0_176 = arith.constant 0 : index
    %c0_177 = arith.constant 0 : index
    %481 = vector.load %arg20[%480, %c0_176, %c0_177] : memref<8x8x128xf32, #tpu.memory_space<vmem>>, vector<1x8x128xf32>
    %482 = vector.shape_cast %481 : vector<1x8x128xf32> to vector<8x128xf32>
    %cst_178 = arith.constant dense<0.000000e+00> : vector<8x128xf32>
    %483 = tpu.matmul %475, %427, %cst_178 {dimension_numbers = #tpu.dot_dimension_numbers<[1], [0], [0], [1], [0, 0, 1, 1], [], []>} : vector<8x32xf32>, vector<32x128xf32>, vector<8x128xf32> -> vector<8x128xf32>
    %484 = arith.addf %482, %483 : vector<8x128xf32>
    %485 = arith.negf %484 : vector<8x128xf32>
    %486 = math.exp %485 : vector<8x128xf32>
    %cst_179 = arith.constant 1.000000e+00 : f32
    %487 = vector.broadcast %cst_179 : f32 to vector<8x128xf32>
    %488 = arith.addf %487, %486 : vector<8x128xf32>
    %489 = arith.divf %487, %488 : vector<8x128xf32>
    %490 = math.tanh %484 : vector<8x128xf32>
    %491 = vector.extract_strided_slice %489 {offsets = [0, 0], sizes = [8, 32], strides = [1, 1]} : vector<8x128xf32> to vector<8x32xf32>
    %492 = vector.extract_strided_slice %489 {offsets = [0, 32], sizes = [8, 32], strides = [1, 1]} : vector<8x128xf32> to vector<8x32xf32>
    %493 = vector.extract_strided_slice %490 {offsets = [0, 64], sizes = [8, 32], strides = [1, 1]} : vector<8x128xf32> to vector<8x32xf32>
    %494 = vector.extract_strided_slice %489 {offsets = [0, 96], sizes = [8, 32], strides = [1, 1]} : vector<8x128xf32> to vector<8x32xf32>
    %495 = arith.mulf %492, %473 : vector<8x32xf32>
    %496 = arith.mulf %491, %493 : vector<8x32xf32>
    %497 = arith.addf %495, %496 : vector<8x32xf32>
    %498 = math.tanh %497 : vector<8x32xf32>
    %499 = arith.mulf %494, %498 : vector<8x32xf32>
    %500 = arith.index_cast %c2_i32_175 : i32 to index
    %c0_180 = arith.constant 0 : index
    %c0_181 = arith.constant 0 : index
    %501 = vector.load %arg19[%500, %c0_180, %c0_181] : memref<8x8x32xf32, #tpu.memory_space<vmem>>, vector<1x8x32xf32>
    %502 = vector.shape_cast %501 : vector<1x8x32xf32> to vector<8x32xf32>
    %503 = vector.shape_cast %499 : vector<8x32xf32> to vector<1x8x32xf32>
    tpu.vector_store %arg19[%500, %c0_180, %c0_181], %503 {strides = array<i32>} : memref<8x8x32xf32, #tpu.memory_space<vmem>>, vector<1x8x32xf32>,
    %c3_i32_182 = arith.constant 3 : i32
    %504 = arith.index_cast %c3_i32_182 : i32 to index
    %c0_183 = arith.constant 0 : index
    %c0_184 = arith.constant 0 : index
    %505 = vector.load %arg20[%504, %c0_183, %c0_184] : memref<8x8x128xf32, #tpu.memory_space<vmem>>, vector<1x8x128xf32>
    %506 = vector.shape_cast %505 : vector<1x8x128xf32> to vector<8x128xf32>
    %cst_185 = arith.constant dense<0.000000e+00> : vector<8x128xf32>
    %507 = tpu.matmul %499, %427, %cst_185 {dimension_numbers = #tpu.dot_dimension_numbers<[1], [0], [0], [1], [0, 0, 1, 1], [], []>} : vector<8x32xf32>, vector<32x128xf32>, vector<8x128xf32> -> vector<8x128xf32>
    %508 = arith.addf %506, %507 : vector<8x128xf32>
    %509 = arith.negf %508 : vector<8x128xf32>
    %510 = math.exp %509 : vector<8x128xf32>
    %cst_186 = arith.constant 1.000000e+00 : f32
    %511 = vector.broadcast %cst_186 : f32 to vector<8x128xf32>
    %512 = arith.addf %511, %510 : vector<8x128xf32>
    %513 = arith.divf %511, %512 : vector<8x128xf32>
    %514 = math.tanh %508 : vector<8x128xf32>
    %515 = vector.extract_strided_slice %513 {offsets = [0, 0], sizes = [8, 32], strides = [1, 1]} : vector<8x128xf32> to vector<8x32xf32>
    %516 = vector.extract_strided_slice %513 {offsets = [0, 32], sizes = [8, 32], strides = [1, 1]} : vector<8x128xf32> to vector<8x32xf32>
    %517 = vector.extract_strided_slice %514 {offsets = [0, 64], sizes = [8, 32], strides = [1, 1]} : vector<8x128xf32> to vector<8x32xf32>
    %518 = vector.extract_strided_slice %513 {offsets = [0, 96], sizes = [8, 32], strides = [1, 1]} : vector<8x128xf32> to vector<8x32xf32>
    %519 = arith.mulf %516, %497 : vector<8x32xf32>
    %520 = arith.mulf %515, %517 : vector<8x32xf32>
    %521 = arith.addf %519, %520 : vector<8x32xf32>
    %522 = math.tanh %521 : vector<8x32xf32>
    %523 = arith.mulf %518, %522 : vector<8x32xf32>
    %524 = arith.index_cast %c3_i32_182 : i32 to index
    %c0_187 = arith.constant 0 : index
    %c0_188 = arith.constant 0 : index
    %525 = vector.load %arg19[%524, %c0_187, %c0_188] : memref<8x8x32xf32, #tpu.memory_space<vmem>>, vector<1x8x32xf32>
    %526 = vector.shape_cast %525 : vector<1x8x32xf32> to vector<8x32xf32>
    %527 = vector.shape_cast %523 : vector<8x32xf32> to vector<1x8x32xf32>
    tpu.vector_store %arg19[%524, %c0_187, %c0_188], %527 {strides = array<i32>} : memref<8x8x32xf32, #tpu.memory_space<vmem>>, vector<1x8x32xf32>,
    %c4_i32_189 = arith.constant 4 : i32
    %528 = arith.index_cast %c4_i32_189 : i32 to index
    %c0_190 = arith.constant 0 : index
    %c0_191 = arith.constant 0 : index
    %529 = vector.load %arg20[%528, %c0_190, %c0_191] : memref<8x8x128xf32, #tpu.memory_space<vmem>>, vector<1x8x128xf32>
    %530 = vector.shape_cast %529 : vector<1x8x128xf32> to vector<8x128xf32>
    %cst_192 = arith.constant dense<0.000000e+00> : vector<8x128xf32>
    %531 = tpu.matmul %523, %427, %cst_192 {dimension_numbers = #tpu.dot_dimension_numbers<[1], [0], [0], [1], [0, 0, 1, 1], [], []>} : vector<8x32xf32>, vector<32x128xf32>, vector<8x128xf32> -> vector<8x128xf32>
    %532 = arith.addf %530, %531 : vector<8x128xf32>
    %533 = arith.negf %532 : vector<8x128xf32>
    %534 = math.exp %533 : vector<8x128xf32>
    %cst_193 = arith.constant 1.000000e+00 : f32
    %535 = vector.broadcast %cst_193 : f32 to vector<8x128xf32>
    %536 = arith.addf %535, %534 : vector<8x128xf32>
    %537 = arith.divf %535, %536 : vector<8x128xf32>
    %538 = math.tanh %532 : vector<8x128xf32>
    %539 = vector.extract_strided_slice %537 {offsets = [0, 0], sizes = [8, 32], strides = [1, 1]} : vector<8x128xf32> to vector<8x32xf32>
    %540 = vector.extract_strided_slice %537 {offsets = [0, 32], sizes = [8, 32], strides = [1, 1]} : vector<8x128xf32> to vector<8x32xf32>
    %541 = vector.extract_strided_slice %538 {offsets = [0, 64], sizes = [8, 32], strides = [1, 1]} : vector<8x128xf32> to vector<8x32xf32>
    %542 = vector.extract_strided_slice %537 {offsets = [0, 96], sizes = [8, 32], strides = [1, 1]} : vector<8x128xf32> to vector<8x32xf32>
    %543 = arith.mulf %540, %521 : vector<8x32xf32>
    %544 = arith.mulf %539, %541 : vector<8x32xf32>
    %545 = arith.addf %543, %544 : vector<8x32xf32>
    %546 = math.tanh %545 : vector<8x32xf32>
    %547 = arith.mulf %542, %546 : vector<8x32xf32>
    %548 = arith.index_cast %c4_i32_189 : i32 to index
    %c0_194 = arith.constant 0 : index
    %c0_195 = arith.constant 0 : index
    %549 = vector.load %arg19[%548, %c0_194, %c0_195] : memref<8x8x32xf32, #tpu.memory_space<vmem>>, vector<1x8x32xf32>
    %550 = vector.shape_cast %549 : vector<1x8x32xf32> to vector<8x32xf32>
    %551 = vector.shape_cast %547 : vector<8x32xf32> to vector<1x8x32xf32>
    tpu.vector_store %arg19[%548, %c0_194, %c0_195], %551 {strides = array<i32>} : memref<8x8x32xf32, #tpu.memory_space<vmem>>, vector<1x8x32xf32>,
    %c5_i32_196 = arith.constant 5 : i32
    %552 = arith.index_cast %c5_i32_196 : i32 to index
    %c0_197 = arith.constant 0 : index
    %c0_198 = arith.constant 0 : index
    %553 = vector.load %arg20[%552, %c0_197, %c0_198] : memref<8x8x128xf32, #tpu.memory_space<vmem>>, vector<1x8x128xf32>
    %554 = vector.shape_cast %553 : vector<1x8x128xf32> to vector<8x128xf32>
    %cst_199 = arith.constant dense<0.000000e+00> : vector<8x128xf32>
    %555 = tpu.matmul %547, %427, %cst_199 {dimension_numbers = #tpu.dot_dimension_numbers<[1], [0], [0], [1], [0, 0, 1, 1], [], []>} : vector<8x32xf32>, vector<32x128xf32>, vector<8x128xf32> -> vector<8x128xf32>
    %556 = arith.addf %554, %555 : vector<8x128xf32>
    %557 = arith.negf %556 : vector<8x128xf32>
    %558 = math.exp %557 : vector<8x128xf32>
    %cst_200 = arith.constant 1.000000e+00 : f32
    %559 = vector.broadcast %cst_200 : f32 to vector<8x128xf32>
    %560 = arith.addf %559, %558 : vector<8x128xf32>
    %561 = arith.divf %559, %560 : vector<8x128xf32>
    %562 = math.tanh %556 : vector<8x128xf32>
    %563 = vector.extract_strided_slice %561 {offsets = [0, 0], sizes = [8, 32], strides = [1, 1]} : vector<8x128xf32> to vector<8x32xf32>
    %564 = vector.extract_strided_slice %561 {offsets = [0, 32], sizes = [8, 32], strides = [1, 1]} : vector<8x128xf32> to vector<8x32xf32>
    %565 = vector.extract_strided_slice %562 {offsets = [0, 64], sizes = [8, 32], strides = [1, 1]} : vector<8x128xf32> to vector<8x32xf32>
    %566 = vector.extract_strided_slice %561 {offsets = [0, 96], sizes = [8, 32], strides = [1, 1]} : vector<8x128xf32> to vector<8x32xf32>
    %567 = arith.mulf %564, %545 : vector<8x32xf32>
    %568 = arith.mulf %563, %565 : vector<8x32xf32>
    %569 = arith.addf %567, %568 : vector<8x32xf32>
    %570 = math.tanh %569 : vector<8x32xf32>
    %571 = arith.mulf %566, %570 : vector<8x32xf32>
    %572 = arith.index_cast %c5_i32_196 : i32 to index
    %c0_201 = arith.constant 0 : index
    %c0_202 = arith.constant 0 : index
    %573 = vector.load %arg19[%572, %c0_201, %c0_202] : memref<8x8x32xf32, #tpu.memory_space<vmem>>, vector<1x8x32xf32>
    %574 = vector.shape_cast %573 : vector<1x8x32xf32> to vector<8x32xf32>
    %575 = vector.shape_cast %571 : vector<8x32xf32> to vector<1x8x32xf32>
    tpu.vector_store %arg19[%572, %c0_201, %c0_202], %575 {strides = array<i32>} : memref<8x8x32xf32, #tpu.memory_space<vmem>>, vector<1x8x32xf32>,
    %c6_i32_203 = arith.constant 6 : i32
    %576 = arith.index_cast %c6_i32_203 : i32 to index
    %c0_204 = arith.constant 0 : index
    %c0_205 = arith.constant 0 : index
    %577 = vector.load %arg20[%576, %c0_204, %c0_205] : memref<8x8x128xf32, #tpu.memory_space<vmem>>, vector<1x8x128xf32>
    %578 = vector.shape_cast %577 : vector<1x8x128xf32> to vector<8x128xf32>
    %cst_206 = arith.constant dense<0.000000e+00> : vector<8x128xf32>
    %579 = tpu.matmul %571, %427, %cst_206 {dimension_numbers = #tpu.dot_dimension_numbers<[1], [0], [0], [1], [0, 0, 1, 1], [], []>} : vector<8x32xf32>, vector<32x128xf32>, vector<8x128xf32> -> vector<8x128xf32>
    %580 = arith.addf %578, %579 : vector<8x128xf32>
    %581 = arith.negf %580 : vector<8x128xf32>
    %582 = math.exp %581 : vector<8x128xf32>
    %cst_207 = arith.constant 1.000000e+00 : f32
    %583 = vector.broadcast %cst_207 : f32 to vector<8x128xf32>
    %584 = arith.addf %583, %582 : vector<8x128xf32>
    %585 = arith.divf %583, %584 : vector<8x128xf32>
    %586 = math.tanh %580 : vector<8x128xf32>
    %587 = vector.extract_strided_slice %585 {offsets = [0, 0], sizes = [8, 32], strides = [1, 1]} : vector<8x128xf32> to vector<8x32xf32>
    %588 = vector.extract_strided_slice %585 {offsets = [0, 32], sizes = [8, 32], strides = [1, 1]} : vector<8x128xf32> to vector<8x32xf32>
    %589 = vector.extract_strided_slice %586 {offsets = [0, 64], sizes = [8, 32], strides = [1, 1]} : vector<8x128xf32> to vector<8x32xf32>
    %590 = vector.extract_strided_slice %585 {offsets = [0, 96], sizes = [8, 32], strides = [1, 1]} : vector<8x128xf32> to vector<8x32xf32>
    %591 = arith.mulf %588, %569 : vector<8x32xf32>
    %592 = arith.mulf %587, %589 : vector<8x32xf32>
    %593 = arith.addf %591, %592 : vector<8x32xf32>
    %594 = math.tanh %593 : vector<8x32xf32>
    %595 = arith.mulf %590, %594 : vector<8x32xf32>
    %596 = arith.index_cast %c6_i32_203 : i32 to index
    %c0_208 = arith.constant 0 : index
    %c0_209 = arith.constant 0 : index
    %597 = vector.load %arg19[%596, %c0_208, %c0_209] : memref<8x8x32xf32, #tpu.memory_space<vmem>>, vector<1x8x32xf32>
    %598 = vector.shape_cast %597 : vector<1x8x32xf32> to vector<8x32xf32>
    %599 = vector.shape_cast %595 : vector<8x32xf32> to vector<1x8x32xf32>
    tpu.vector_store %arg19[%596, %c0_208, %c0_209], %599 {strides = array<i32>} : memref<8x8x32xf32, #tpu.memory_space<vmem>>, vector<1x8x32xf32>,
    %c7_i32_210 = arith.constant 7 : i32
    %600 = arith.index_cast %c7_i32_210 : i32 to index
    %c0_211 = arith.constant 0 : index
    %c0_212 = arith.constant 0 : index
    %601 = vector.load %arg20[%600, %c0_211, %c0_212] : memref<8x8x128xf32, #tpu.memory_space<vmem>>, vector<1x8x128xf32>
    %602 = vector.shape_cast %601 : vector<1x8x128xf32> to vector<8x128xf32>
    %cst_213 = arith.constant dense<0.000000e+00> : vector<8x128xf32>
    %603 = tpu.matmul %595, %427, %cst_213 {dimension_numbers = #tpu.dot_dimension_numbers<[1], [0], [0], [1], [0, 0, 1, 1], [], []>} : vector<8x32xf32>, vector<32x128xf32>, vector<8x128xf32> -> vector<8x128xf32>
    %604 = arith.addf %602, %603 : vector<8x128xf32>
    %605 = arith.negf %604 : vector<8x128xf32>
    %606 = math.exp %605 : vector<8x128xf32>
    %cst_214 = arith.constant 1.000000e+00 : f32
    %607 = vector.broadcast %cst_214 : f32 to vector<8x128xf32>
    %608 = arith.addf %607, %606 : vector<8x128xf32>
    %609 = arith.divf %607, %608 : vector<8x128xf32>
    %610 = math.tanh %604 : vector<8x128xf32>
    %611 = vector.extract_strided_slice %609 {offsets = [0, 0], sizes = [8, 32], strides = [1, 1]} : vector<8x128xf32> to vector<8x32xf32>
    %612 = vector.extract_strided_slice %609 {offsets = [0, 32], sizes = [8, 32], strides = [1, 1]} : vector<8x128xf32> to vector<8x32xf32>
    %613 = vector.extract_strided_slice %610 {offsets = [0, 64], sizes = [8, 32], strides = [1, 1]} : vector<8x128xf32> to vector<8x32xf32>
    %614 = vector.extract_strided_slice %609 {offsets = [0, 96], sizes = [8, 32], strides = [1, 1]} : vector<8x128xf32> to vector<8x32xf32>
    %615 = arith.mulf %612, %593 : vector<8x32xf32>
    %616 = arith.mulf %611, %613 : vector<8x32xf32>
    %617 = arith.addf %615, %616 : vector<8x32xf32>
    %618 = math.tanh %617 : vector<8x32xf32>
    %619 = arith.mulf %614, %618 : vector<8x32xf32>
    %620 = arith.index_cast %c7_i32_210 : i32 to index
    %c0_215 = arith.constant 0 : index
    %c0_216 = arith.constant 0 : index
    %621 = vector.load %arg19[%620, %c0_215, %c0_216] : memref<8x8x32xf32, #tpu.memory_space<vmem>>, vector<1x8x32xf32>
    %622 = vector.shape_cast %621 : vector<1x8x32xf32> to vector<8x32xf32>
    %623 = vector.shape_cast %619 : vector<8x32xf32> to vector<1x8x32xf32>
    tpu.vector_store %arg19[%620, %c0_215, %c0_216], %623 {strides = array<i32>} : memref<8x8x32xf32, #tpu.memory_space<vmem>>, vector<1x8x32xf32>,
    %c8_i32_217 = arith.constant 8 : i32
    %c2_218 = arith.constant 2 : index
    %c0_219 = arith.constant 0 : index
    %c0_220 = arith.constant 0 : index
    %624 = vector.load %arg17[%c2_218, %c0_219, %c0_220] : memref<4x8x32xf32, #tpu.memory_space<vmem>>, vector<1x8x32xf32>
    %625 = vector.shape_cast %624 : vector<1x8x32xf32> to vector<8x32xf32>
    %626 = vector.shape_cast %619 : vector<8x32xf32> to vector<1x8x32xf32>
    tpu.vector_store %arg17[%c2_218, %c0_219, %c0_220], %626 {strides = array<i32>} : memref<4x8x32xf32, #tpu.memory_space<vmem>>, vector<1x8x32xf32>,
    %c2_221 = arith.constant 2 : index
    %c0_222 = arith.constant 0 : index
    %c0_223 = arith.constant 0 : index
    %627 = vector.load %arg18[%c2_221, %c0_222, %c0_223] : memref<4x8x32xf32, #tpu.memory_space<vmem>>, vector<1x8x32xf32>
    %628 = vector.shape_cast %627 : vector<1x8x32xf32> to vector<8x32xf32>
    %629 = vector.shape_cast %617 : vector<8x32xf32> to vector<1x8x32xf32>
    tpu.vector_store %arg18[%c2_221, %c0_222, %c0_223], %629 {strides = array<i32>} : memref<4x8x32xf32, #tpu.memory_space<vmem>>, vector<1x8x32xf32>,
    %c0_224 = arith.constant 0 : index
    %c0_225 = arith.constant 0 : index
    %c0_226 = arith.constant 0 : index
    %630 = vector.load %arg19[%c0_224, %c0_225, %c0_226] : memref<8x8x32xf32, #tpu.memory_space<vmem>>, vector<8x8x32xf32>
    %631 = vector.shape_cast %630 : vector<8x8x32xf32> to vector<64x32xf32>
    %c0_227 = arith.constant 0 : index
    %c0_228 = arith.constant 0 : index
    %632 = vector.load %arg9[%c0_227, %c0_228] : memref<32x128xf32, #tpu.memory_space<vmem>>, vector<32x128xf32>
    %cst_229 = arith.constant dense<0.000000e+00> : vector<64x128xf32>
    %633 = tpu.matmul %631, %632, %cst_229 {dimension_numbers = #tpu.dot_dimension_numbers<[1], [0], [0], [1], [0, 0, 1, 1], [], []>} : vector<64x32xf32>, vector<32x128xf32>, vector<64x128xf32> -> vector<64x128xf32>
    %c0_230 = arith.constant 0 : index
    %c0_231 = arith.constant 0 : index
    %634 = vector.load %arg10[%c0_230, %c0_231] : memref<1x128xf32, #tpu.memory_space<vmem>>, vector<1x128xf32>
    %635 = vector.broadcast %634 : vector<1x128xf32> to vector<64x128xf32>
    %636 = arith.addf %633, %635 : vector<64x128xf32>
    %637 = vector.shape_cast %636 : vector<64x128xf32> to vector<8x8x128xf32>
    %c0_232 = arith.constant 0 : index
    %c0_233 = arith.constant 0 : index
    %c0_234 = arith.constant 0 : index
    %638 = vector.load %arg20[%c0_232, %c0_233, %c0_234] : memref<8x8x128xf32, #tpu.memory_space<vmem>>, vector<8x8x128xf32>
    tpu.vector_store %arg20[%c0_232, %c0_233, %c0_234], %637 {strides = array<i32>} : memref<8x8x128xf32, #tpu.memory_space<vmem>>, vector<8x8x128xf32>,
    %c0_235 = arith.constant 0 : index
    %c0_236 = arith.constant 0 : index
    %639 = vector.load %arg11[%c0_235, %c0_236] : memref<32x128xf32, #tpu.memory_space<vmem>>, vector<32x128xf32>
    %c3 = arith.constant 3 : index
    %c0_237 = arith.constant 0 : index
    %c0_238 = arith.constant 0 : index
    %640 = vector.load %arg17[%c3, %c0_237, %c0_238] : memref<4x8x32xf32, #tpu.memory_space<vmem>>, vector<1x8x32xf32>
    %641 = vector.shape_cast %640 : vector<1x8x32xf32> to vector<8x32xf32>
    %c3_239 = arith.constant 3 : index
    %c0_240 = arith.constant 0 : index
    %c0_241 = arith.constant 0 : index
    %642 = vector.load %arg18[%c3_239, %c0_240, %c0_241] : memref<4x8x32xf32, #tpu.memory_space<vmem>>, vector<1x8x32xf32>
    %643 = vector.shape_cast %642 : vector<1x8x32xf32> to vector<8x32xf32>
    %c0_i32_242 = arith.constant 0 : i32
    %644 = arith.index_cast %c0_i32_242 : i32 to index
    %c0_243 = arith.constant 0 : index
    %c0_244 = arith.constant 0 : index
    %645 = vector.load %arg20[%644, %c0_243, %c0_244] : memref<8x8x128xf32, #tpu.memory_space<vmem>>, vector<1x8x128xf32>
    %646 = vector.shape_cast %645 : vector<1x8x128xf32> to vector<8x128xf32>
    %cst_245 = arith.constant dense<0.000000e+00> : vector<8x128xf32>
    %647 = tpu.matmul %641, %639, %cst_245 {dimension_numbers = #tpu.dot_dimension_numbers<[1], [0], [0], [1], [0, 0, 1, 1], [], []>} : vector<8x32xf32>, vector<32x128xf32>, vector<8x128xf32> -> vector<8x128xf32>
    %648 = arith.addf %646, %647 : vector<8x128xf32>
    %649 = arith.negf %648 : vector<8x128xf32>
    %650 = math.exp %649 : vector<8x128xf32>
    %cst_246 = arith.constant 1.000000e+00 : f32
    %651 = vector.broadcast %cst_246 : f32 to vector<8x128xf32>
    %652 = arith.addf %651, %650 : vector<8x128xf32>
    %653 = arith.divf %651, %652 : vector<8x128xf32>
    %654 = math.tanh %648 : vector<8x128xf32>
    %655 = vector.extract_strided_slice %653 {offsets = [0, 0], sizes = [8, 32], strides = [1, 1]} : vector<8x128xf32> to vector<8x32xf32>
    %656 = vector.extract_strided_slice %653 {offsets = [0, 32], sizes = [8, 32], strides = [1, 1]} : vector<8x128xf32> to vector<8x32xf32>
    %657 = vector.extract_strided_slice %654 {offsets = [0, 64], sizes = [8, 32], strides = [1, 1]} : vector<8x128xf32> to vector<8x32xf32>
    %658 = vector.extract_strided_slice %653 {offsets = [0, 96], sizes = [8, 32], strides = [1, 1]} : vector<8x128xf32> to vector<8x32xf32>
    %659 = arith.mulf %656, %643 : vector<8x32xf32>
    %660 = arith.mulf %655, %657 : vector<8x32xf32>
    %661 = arith.addf %659, %660 : vector<8x32xf32>
    %662 = math.tanh %661 : vector<8x32xf32>
    %663 = arith.mulf %658, %662 : vector<8x32xf32>
    %c1_i32_247 = arith.constant 1 : i32
    %664 = arith.index_cast %c1_i32_247 : i32 to index
    %c0_248 = arith.constant 0 : index
    %c0_249 = arith.constant 0 : index
    %665 = vector.load %arg20[%664, %c0_248, %c0_249] : memref<8x8x128xf32, #tpu.memory_space<vmem>>, vector<1x8x128xf32>
    %666 = vector.shape_cast %665 : vector<1x8x128xf32> to vector<8x128xf32>
    %cst_250 = arith.constant dense<0.000000e+00> : vector<8x128xf32>
    %667 = tpu.matmul %663, %639, %cst_250 {dimension_numbers = #tpu.dot_dimension_numbers<[1], [0], [0], [1], [0, 0, 1, 1], [], []>} : vector<8x32xf32>, vector<32x128xf32>, vector<8x128xf32> -> vector<8x128xf32>
    %668 = arith.addf %666, %667 : vector<8x128xf32>
    %669 = arith.negf %668 : vector<8x128xf32>
    %670 = math.exp %669 : vector<8x128xf32>
    %cst_251 = arith.constant 1.000000e+00 : f32
    %671 = vector.broadcast %cst_251 : f32 to vector<8x128xf32>
    %672 = arith.addf %671, %670 : vector<8x128xf32>
    %673 = arith.divf %671, %672 : vector<8x128xf32>
    %674 = math.tanh %668 : vector<8x128xf32>
    %675 = vector.extract_strided_slice %673 {offsets = [0, 0], sizes = [8, 32], strides = [1, 1]} : vector<8x128xf32> to vector<8x32xf32>
    %676 = vector.extract_strided_slice %673 {offsets = [0, 32], sizes = [8, 32], strides = [1, 1]} : vector<8x128xf32> to vector<8x32xf32>
    %677 = vector.extract_strided_slice %674 {offsets = [0, 64], sizes = [8, 32], strides = [1, 1]} : vector<8x128xf32> to vector<8x32xf32>
    %678 = vector.extract_strided_slice %673 {offsets = [0, 96], sizes = [8, 32], strides = [1, 1]} : vector<8x128xf32> to vector<8x32xf32>
    %679 = arith.mulf %676, %661 : vector<8x32xf32>
    %680 = arith.mulf %675, %677 : vector<8x32xf32>
    %681 = arith.addf %679, %680 : vector<8x32xf32>
    %682 = math.tanh %681 : vector<8x32xf32>
    %683 = arith.mulf %678, %682 : vector<8x32xf32>
    %c2_i32_252 = arith.constant 2 : i32
    %684 = arith.index_cast %c2_i32_252 : i32 to index
    %c0_253 = arith.constant 0 : index
    %c0_254 = arith.constant 0 : index
    %685 = vector.load %arg20[%684, %c0_253, %c0_254] : memref<8x8x128xf32, #tpu.memory_space<vmem>>, vector<1x8x128xf32>
    %686 = vector.shape_cast %685 : vector<1x8x128xf32> to vector<8x128xf32>
    %cst_255 = arith.constant dense<0.000000e+00> : vector<8x128xf32>
    %687 = tpu.matmul %683, %639, %cst_255 {dimension_numbers = #tpu.dot_dimension_numbers<[1], [0], [0], [1], [0, 0, 1, 1], [], []>} : vector<8x32xf32>, vector<32x128xf32>, vector<8x128xf32> -> vector<8x128xf32>
    %688 = arith.addf %686, %687 : vector<8x128xf32>
    %689 = arith.negf %688 : vector<8x128xf32>
    %690 = math.exp %689 : vector<8x128xf32>
    %cst_256 = arith.constant 1.000000e+00 : f32
    %691 = vector.broadcast %cst_256 : f32 to vector<8x128xf32>
    %692 = arith.addf %691, %690 : vector<8x128xf32>
    %693 = arith.divf %691, %692 : vector<8x128xf32>
    %694 = math.tanh %688 : vector<8x128xf32>
    %695 = vector.extract_strided_slice %693 {offsets = [0, 0], sizes = [8, 32], strides = [1, 1]} : vector<8x128xf32> to vector<8x32xf32>
    %696 = vector.extract_strided_slice %693 {offsets = [0, 32], sizes = [8, 32], strides = [1, 1]} : vector<8x128xf32> to vector<8x32xf32>
    %697 = vector.extract_strided_slice %694 {offsets = [0, 64], sizes = [8, 32], strides = [1, 1]} : vector<8x128xf32> to vector<8x32xf32>
    %698 = vector.extract_strided_slice %693 {offsets = [0, 96], sizes = [8, 32], strides = [1, 1]} : vector<8x128xf32> to vector<8x32xf32>
    %699 = arith.mulf %696, %681 : vector<8x32xf32>
    %700 = arith.mulf %695, %697 : vector<8x32xf32>
    %701 = arith.addf %699, %700 : vector<8x32xf32>
    %702 = math.tanh %701 : vector<8x32xf32>
    %703 = arith.mulf %698, %702 : vector<8x32xf32>
    %c3_i32_257 = arith.constant 3 : i32
    %704 = arith.index_cast %c3_i32_257 : i32 to index
    %c0_258 = arith.constant 0 : index
    %c0_259 = arith.constant 0 : index
    %705 = vector.load %arg20[%704, %c0_258, %c0_259] : memref<8x8x128xf32, #tpu.memory_space<vmem>>, vector<1x8x128xf32>
    %706 = vector.shape_cast %705 : vector<1x8x128xf32> to vector<8x128xf32>
    %cst_260 = arith.constant dense<0.000000e+00> : vector<8x128xf32>
    %707 = tpu.matmul %703, %639, %cst_260 {dimension_numbers = #tpu.dot_dimension_numbers<[1], [0], [0], [1], [0, 0, 1, 1], [], []>} : vector<8x32xf32>, vector<32x128xf32>, vector<8x128xf32> -> vector<8x128xf32>
    %708 = arith.addf %706, %707 : vector<8x128xf32>
    %709 = arith.negf %708 : vector<8x128xf32>
    %710 = math.exp %709 : vector<8x128xf32>
    %cst_261 = arith.constant 1.000000e+00 : f32
    %711 = vector.broadcast %cst_261 : f32 to vector<8x128xf32>
    %712 = arith.addf %711, %710 : vector<8x128xf32>
    %713 = arith.divf %711, %712 : vector<8x128xf32>
    %714 = math.tanh %708 : vector<8x128xf32>
    %715 = vector.extract_strided_slice %713 {offsets = [0, 0], sizes = [8, 32], strides = [1, 1]} : vector<8x128xf32> to vector<8x32xf32>
    %716 = vector.extract_strided_slice %713 {offsets = [0, 32], sizes = [8, 32], strides = [1, 1]} : vector<8x128xf32> to vector<8x32xf32>
    %717 = vector.extract_strided_slice %714 {offsets = [0, 64], sizes = [8, 32], strides = [1, 1]} : vector<8x128xf32> to vector<8x32xf32>
    %718 = vector.extract_strided_slice %713 {offsets = [0, 96], sizes = [8, 32], strides = [1, 1]} : vector<8x128xf32> to vector<8x32xf32>
    %719 = arith.mulf %716, %701 : vector<8x32xf32>
    %720 = arith.mulf %715, %717 : vector<8x32xf32>
    %721 = arith.addf %719, %720 : vector<8x32xf32>
    %722 = math.tanh %721 : vector<8x32xf32>
    %723 = arith.mulf %718, %722 : vector<8x32xf32>
    %c4_i32_262 = arith.constant 4 : i32
    %724 = arith.index_cast %c4_i32_262 : i32 to index
    %c0_263 = arith.constant 0 : index
    %c0_264 = arith.constant 0 : index
    %725 = vector.load %arg20[%724, %c0_263, %c0_264] : memref<8x8x128xf32, #tpu.memory_space<vmem>>, vector<1x8x128xf32>
    %726 = vector.shape_cast %725 : vector<1x8x128xf32> to vector<8x128xf32>
    %cst_265 = arith.constant dense<0.000000e+00> : vector<8x128xf32>
    %727 = tpu.matmul %723, %639, %cst_265 {dimension_numbers = #tpu.dot_dimension_numbers<[1], [0], [0], [1], [0, 0, 1, 1], [], []>} : vector<8x32xf32>, vector<32x128xf32>, vector<8x128xf32> -> vector<8x128xf32>
    %728 = arith.addf %726, %727 : vector<8x128xf32>
    %729 = arith.negf %728 : vector<8x128xf32>
    %730 = math.exp %729 : vector<8x128xf32>
    %cst_266 = arith.constant 1.000000e+00 : f32
    %731 = vector.broadcast %cst_266 : f32 to vector<8x128xf32>
    %732 = arith.addf %731, %730 : vector<8x128xf32>
    %733 = arith.divf %731, %732 : vector<8x128xf32>
    %734 = math.tanh %728 : vector<8x128xf32>
    %735 = vector.extract_strided_slice %733 {offsets = [0, 0], sizes = [8, 32], strides = [1, 1]} : vector<8x128xf32> to vector<8x32xf32>
    %736 = vector.extract_strided_slice %733 {offsets = [0, 32], sizes = [8, 32], strides = [1, 1]} : vector<8x128xf32> to vector<8x32xf32>
    %737 = vector.extract_strided_slice %734 {offsets = [0, 64], sizes = [8, 32], strides = [1, 1]} : vector<8x128xf32> to vector<8x32xf32>
    %738 = vector.extract_strided_slice %733 {offsets = [0, 96], sizes = [8, 32], strides = [1, 1]} : vector<8x128xf32> to vector<8x32xf32>
    %739 = arith.mulf %736, %721 : vector<8x32xf32>
    %740 = arith.mulf %735, %737 : vector<8x32xf32>
    %741 = arith.addf %739, %740 : vector<8x32xf32>
    %742 = math.tanh %741 : vector<8x32xf32>
    %743 = arith.mulf %738, %742 : vector<8x32xf32>
    %c5_i32_267 = arith.constant 5 : i32
    %744 = arith.index_cast %c5_i32_267 : i32 to index
    %c0_268 = arith.constant 0 : index
    %c0_269 = arith.constant 0 : index
    %745 = vector.load %arg20[%744, %c0_268, %c0_269] : memref<8x8x128xf32, #tpu.memory_space<vmem>>, vector<1x8x128xf32>
    %746 = vector.shape_cast %745 : vector<1x8x128xf32> to vector<8x128xf32>
    %cst_270 = arith.constant dense<0.000000e+00> : vector<8x128xf32>
    %747 = tpu.matmul %743, %639, %cst_270 {dimension_numbers = #tpu.dot_dimension_numbers<[1], [0], [0], [1], [0, 0, 1, 1], [], []>} : vector<8x32xf32>, vector<32x128xf32>, vector<8x128xf32> -> vector<8x128xf32>
    %748 = arith.addf %746, %747 : vector<8x128xf32>
    %749 = arith.negf %748 : vector<8x128xf32>
    %750 = math.exp %749 : vector<8x128xf32>
    %cst_271 = arith.constant 1.000000e+00 : f32
    %751 = vector.broadcast %cst_271 : f32 to vector<8x128xf32>
    %752 = arith.addf %751, %750 : vector<8x128xf32>
    %753 = arith.divf %751, %752 : vector<8x128xf32>
    %754 = math.tanh %748 : vector<8x128xf32>
    %755 = vector.extract_strided_slice %753 {offsets = [0, 0], sizes = [8, 32], strides = [1, 1]} : vector<8x128xf32> to vector<8x32xf32>
    %756 = vector.extract_strided_slice %753 {offsets = [0, 32], sizes = [8, 32], strides = [1, 1]} : vector<8x128xf32> to vector<8x32xf32>
    %757 = vector.extract_strided_slice %754 {offsets = [0, 64], sizes = [8, 32], strides = [1, 1]} : vector<8x128xf32> to vector<8x32xf32>
    %758 = vector.extract_strided_slice %753 {offsets = [0, 96], sizes = [8, 32], strides = [1, 1]} : vector<8x128xf32> to vector<8x32xf32>
    %759 = arith.mulf %756, %741 : vector<8x32xf32>
    %760 = arith.mulf %755, %757 : vector<8x32xf32>
    %761 = arith.addf %759, %760 : vector<8x32xf32>
    %762 = math.tanh %761 : vector<8x32xf32>
    %763 = arith.mulf %758, %762 : vector<8x32xf32>
    %c6_i32_272 = arith.constant 6 : i32
    %764 = arith.index_cast %c6_i32_272 : i32 to index
    %c0_273 = arith.constant 0 : index
    %c0_274 = arith.constant 0 : index
    %765 = vector.load %arg20[%764, %c0_273, %c0_274] : memref<8x8x128xf32, #tpu.memory_space<vmem>>, vector<1x8x128xf32>
    %766 = vector.shape_cast %765 : vector<1x8x128xf32> to vector<8x128xf32>
    %cst_275 = arith.constant dense<0.000000e+00> : vector<8x128xf32>
    %767 = tpu.matmul %763, %639, %cst_275 {dimension_numbers = #tpu.dot_dimension_numbers<[1], [0], [0], [1], [0, 0, 1, 1], [], []>} : vector<8x32xf32>, vector<32x128xf32>, vector<8x128xf32> -> vector<8x128xf32>
    %768 = arith.addf %766, %767 : vector<8x128xf32>
    %769 = arith.negf %768 : vector<8x128xf32>
    %770 = math.exp %769 : vector<8x128xf32>
    %cst_276 = arith.constant 1.000000e+00 : f32
    %771 = vector.broadcast %cst_276 : f32 to vector<8x128xf32>
    %772 = arith.addf %771, %770 : vector<8x128xf32>
    %773 = arith.divf %771, %772 : vector<8x128xf32>
    %774 = math.tanh %768 : vector<8x128xf32>
    %775 = vector.extract_strided_slice %773 {offsets = [0, 0], sizes = [8, 32], strides = [1, 1]} : vector<8x128xf32> to vector<8x32xf32>
    %776 = vector.extract_strided_slice %773 {offsets = [0, 32], sizes = [8, 32], strides = [1, 1]} : vector<8x128xf32> to vector<8x32xf32>
    %777 = vector.extract_strided_slice %774 {offsets = [0, 64], sizes = [8, 32], strides = [1, 1]} : vector<8x128xf32> to vector<8x32xf32>
    %778 = vector.extract_strided_slice %773 {offsets = [0, 96], sizes = [8, 32], strides = [1, 1]} : vector<8x128xf32> to vector<8x32xf32>
    %779 = arith.mulf %776, %761 : vector<8x32xf32>
    %780 = arith.mulf %775, %777 : vector<8x32xf32>
    %781 = arith.addf %779, %780 : vector<8x32xf32>
    %782 = math.tanh %781 : vector<8x32xf32>
    %783 = arith.mulf %778, %782 : vector<8x32xf32>
    %c7_i32_277 = arith.constant 7 : i32
    %784 = arith.index_cast %c7_i32_277 : i32 to index
    %c0_278 = arith.constant 0 : index
    %c0_279 = arith.constant 0 : index
    %785 = vector.load %arg20[%784, %c0_278, %c0_279] : memref<8x8x128xf32, #tpu.memory_space<vmem>>, vector<1x8x128xf32>
    %786 = vector.shape_cast %785 : vector<1x8x128xf32> to vector<8x128xf32>
    %cst_280 = arith.constant dense<0.000000e+00> : vector<8x128xf32>
    %787 = tpu.matmul %783, %639, %cst_280 {dimension_numbers = #tpu.dot_dimension_numbers<[1], [0], [0], [1], [0, 0, 1, 1], [], []>} : vector<8x32xf32>, vector<32x128xf32>, vector<8x128xf32> -> vector<8x128xf32>
    %788 = arith.addf %786, %787 : vector<8x128xf32>
    %789 = arith.negf %788 : vector<8x128xf32>
    %790 = math.exp %789 : vector<8x128xf32>
    %cst_281 = arith.constant 1.000000e+00 : f32
    %791 = vector.broadcast %cst_281 : f32 to vector<8x128xf32>
    %792 = arith.addf %791, %790 : vector<8x128xf32>
    %793 = arith.divf %791, %792 : vector<8x128xf32>
    %794 = math.tanh %788 : vector<8x128xf32>
    %795 = vector.extract_strided_slice %793 {offsets = [0, 0], sizes = [8, 32], strides = [1, 1]} : vector<8x128xf32> to vector<8x32xf32>
    %796 = vector.extract_strided_slice %793 {offsets = [0, 32], sizes = [8, 32], strides = [1, 1]} : vector<8x128xf32> to vector<8x32xf32>
    %797 = vector.extract_strided_slice %794 {offsets = [0, 64], sizes = [8, 32], strides = [1, 1]} : vector<8x128xf32> to vector<8x32xf32>
    %798 = vector.extract_strided_slice %793 {offsets = [0, 96], sizes = [8, 32], strides = [1, 1]} : vector<8x128xf32> to vector<8x32xf32>
    %799 = arith.mulf %796, %781 : vector<8x32xf32>
    %800 = arith.mulf %795, %797 : vector<8x32xf32>
    %801 = arith.addf %799, %800 : vector<8x32xf32>
    %802 = math.tanh %801 : vector<8x32xf32>
    %803 = arith.mulf %798, %802 : vector<8x32xf32>
    %c8_i32_282 = arith.constant 8 : i32
    %c3_283 = arith.constant 3 : index
    %c0_284 = arith.constant 0 : index
    %c0_285 = arith.constant 0 : index
    %804 = vector.load %arg17[%c3_283, %c0_284, %c0_285] : memref<4x8x32xf32, #tpu.memory_space<vmem>>, vector<1x8x32xf32>
    %805 = vector.shape_cast %804 : vector<1x8x32xf32> to vector<8x32xf32>
    %806 = vector.shape_cast %803 : vector<8x32xf32> to vector<1x8x32xf32>
    tpu.vector_store %arg17[%c3_283, %c0_284, %c0_285], %806 {strides = array<i32>} : memref<4x8x32xf32, #tpu.memory_space<vmem>>, vector<1x8x32xf32>,
    %c3_286 = arith.constant 3 : index
    %c0_287 = arith.constant 0 : index
    %c0_288 = arith.constant 0 : index
    %807 = vector.load %arg18[%c3_286, %c0_287, %c0_288] : memref<4x8x32xf32, #tpu.memory_space<vmem>>, vector<1x8x32xf32>
    %808 = vector.shape_cast %807 : vector<1x8x32xf32> to vector<8x32xf32>
    %809 = vector.shape_cast %801 : vector<8x32xf32> to vector<1x8x32xf32>
    tpu.vector_store %arg18[%c3_286, %c0_287, %c0_288], %809 {strides = array<i32>} : memref<4x8x32xf32, #tpu.memory_space<vmem>>, vector<1x8x32xf32>,
    %c0_i32_289 = arith.constant 0 : i32
    %810 = arith.cmpi eq, %arg0, %c0_i32_289 : i32
    %811 = arith.extui %810 : i1 to i32
    %c0_i32_290 = arith.constant 0 : i32
    %812 = arith.cmpi ne, %811, %c0_i32_290 : i32
    scf.if %812 {
      %c3_291 = arith.constant 3 : index
      %c0_292 = arith.constant 0 : index
      %c0_293 = arith.constant 0 : index
      %813 = vector.load %arg17[%c3_291, %c0_292, %c0_293] : memref<4x8x32xf32, #tpu.memory_space<vmem>>, vector<1x8x32xf32>
      %814 = vector.shape_cast %813 : vector<1x8x32xf32> to vector<8x32xf32>
      %c0_294 = arith.constant 0 : index
      %c0_295 = arith.constant 0 : index
      %815 = vector.load %arg12[%c0_294, %c0_295] : memref<32x128xf32, #tpu.memory_space<vmem>>, vector<32x128xf32>
      %cst_296 = arith.constant dense<0.000000e+00> : vector<8x128xf32>
      %816 = tpu.matmul %814, %815, %cst_296 {dimension_numbers = #tpu.dot_dimension_numbers<[1], [0], [0], [1], [0, 0, 1, 1], [], []>} : vector<8x32xf32>, vector<32x128xf32>, vector<8x128xf32> -> vector<8x128xf32>
      %c0_297 = arith.constant 0 : index
      %c0_298 = arith.constant 0 : index
      %817 = vector.load %arg13[%c0_297, %c0_298] : memref<1x128xf32, #tpu.memory_space<vmem>>, vector<1x128xf32>
      %818 = vector.broadcast %817 : vector<1x128xf32> to vector<8x128xf32>
      %819 = arith.addf %816, %818 : vector<8x128xf32>
      %c0_299 = arith.constant 0 : index
      %c0_300 = arith.constant 0 : index
      %820 = vector.load %arg14[%c0_299, %c0_300] : memref<128x128xf32, #tpu.memory_space<vmem>>, vector<128x128xf32>
      %cst_301 = arith.constant dense<0.000000e+00> : vector<8x128xf32>
      %821 = tpu.matmul %819, %820, %cst_301 {dimension_numbers = #tpu.dot_dimension_numbers<[1], [0], [0], [1], [0, 0, 1, 1], [], []>} : vector<8x128xf32>, vector<128x128xf32>, vector<8x128xf32> -> vector<8x128xf32>
      %c0_302 = arith.constant 0 : index
      %c0_303 = arith.constant 0 : index
      %822 = vector.load %arg15[%c0_302, %c0_303] : memref<1x128xf32, #tpu.memory_space<vmem>>, vector<1x128xf32>
      %823 = vector.broadcast %822 : vector<1x128xf32> to vector<8x128xf32>
      %824 = arith.addf %821, %823 : vector<8x128xf32>
      %c0_304 = arith.constant 0 : index
      %c0_305 = arith.constant 0 : index
      %825 = vector.load %arg16[%c0_304, %c0_305] : memref<8x128xf32, #tpu.memory_space<vmem>>, vector<8x128xf32>
      tpu.vector_store %arg16[%c0_304, %c0_305], %824 {strides = array<i32>} : memref<8x128xf32, #tpu.memory_space<vmem>>, vector<8x128xf32>,
    } else {
    }
    return
  }
  func.func @transform_0(%arg0: i32) -> (i32, i32, i32) {
    %c0_i32 = arith.constant 0 : i32
    %c0_i32_0 = arith.constant 0 : i32
    %c0_i32_1 = arith.constant 0 : i32
    return %arg0, %c0_i32, %c0_i32_0 : i32, i32, i32
  }
  func.func @transform_1(%arg0: i32) -> (i32, i32) {
    %c0_i32 = arith.constant 0 : i32
    %c0_i32_0 = arith.constant 0 : i32
    %c0_i32_1 = arith.constant 0 : i32
    return %c0_i32, %c0_i32_0 : i32, i32
  }
  func.func @transform_2(%arg0: i32) -> (i32, i32) {
    %c0_i32 = arith.constant 0 : i32
    %c0_i32_0 = arith.constant 0 : i32
    %c0_i32_1 = arith.constant 0 : i32
    return %c0_i32, %c0_i32_0 : i32, i32
  }
  func.func @transform_3(%arg0: i32) -> (i32, i32) {
    %c0_i32 = arith.constant 0 : i32
    %c0_i32_0 = arith.constant 0 : i32
    %c0_i32_1 = arith.constant 0 : i32
    return %c0_i32, %c0_i32_0 : i32, i32
  }
  func.func @transform_4(%arg0: i32) -> (i32, i32) {
    %c0_i32 = arith.constant 0 : i32
    %c0_i32_0 = arith.constant 0 : i32
    %c0_i32_1 = arith.constant 0 : i32
    return %c0_i32, %c0_i32_0 : i32, i32
  }
  func.func @transform_5(%arg0: i32) -> (i32, i32) {
    %c0_i32 = arith.constant 0 : i32
    %c0_i32_0 = arith.constant 0 : i32
    %c0_i32_1 = arith.constant 0 : i32
    return %c0_i32, %c0_i32_0 : i32, i32
  }
  func.func @transform_6(%arg0: i32) -> (i32, i32) {
    %c0_i32 = arith.constant 0 : i32
    %c0_i32_0 = arith.constant 0 : i32
    %c0_i32_1 = arith.constant 0 : i32
    return %c0_i32, %c0_i32_0 : i32, i32
  }
  func.func @transform_7(%arg0: i32) -> (i32, i32) {
    %c0_i32 = arith.constant 0 : i32
    %c0_i32_0 = arith.constant 0 : i32
    %c0_i32_1 = arith.constant 0 : i32
    return %c0_i32, %c0_i32_0 : i32, i32
  }
  func.func @transform_8(%arg0: i32) -> (i32, i32) {
    %c0_i32 = arith.constant 0 : i32
    %c0_i32_0 = arith.constant 0 : i32
    %c0_i32_1 = arith.constant 0 : i32
    return %c0_i32, %c0_i32_0 : i32, i32
  }
  func.func @transform_9(%arg0: i32) -> (i32, i32) {
    %c0_i32 = arith.constant 0 : i32
    %c0_i32_0 = arith.constant 0 : i32
    %c0_i32_1 = arith.constant 0 : i32
    return %c0_i32, %c0_i32_0 : i32, i32
  }
  func.func @transform_10(%arg0: i32) -> (i32, i32) {
    %c0_i32 = arith.constant 0 : i32
    %c0_i32_0 = arith.constant 0 : i32
    %c0_i32_1 = arith.constant 0 : i32
    return %c0_i32, %c0_i32_0 : i32, i32
  }
  func.func @transform_11(%arg0: i32) -> (i32, i32) {
    %c0_i32 = arith.constant 0 : i32
    %c0_i32_0 = arith.constant 0 : i32
    %c0_i32_1 = arith.constant 0 : i32
    return %c0_i32, %c0_i32_0 : i32, i32
  }
  func.func @transform_12(%arg0: i32) -> (i32, i32) {
    %c0_i32 = arith.constant 0 : i32
    %c0_i32_0 = arith.constant 0 : i32
    %c0_i32_1 = arith.constant 0 : i32
    return %c0_i32, %c0_i32_0 : i32, i32
  }
  func.func @transform_13(%arg0: i32) -> (i32, i32) {
    %c0_i32 = arith.constant 0 : i32
    %c0_i32_0 = arith.constant 0 : i32
    %c0_i32_1 = arith.constant 0 : i32
    return %c0_i32, %c0_i32_0 : i32, i32
  }
  func.func @transform_14(%arg0: i32) -> (i32, i32) {
    %c0_i32 = arith.constant 0 : i32
    %c0_i32_0 = arith.constant 0 : i32
    %c0_i32_1 = arith.constant 0 : i32
    return %c0_i32, %c0_i32_0 : i32, i32
  }
  func.func @transform_15(%arg0: i32) -> (i32, i32) {
    %c0_i32 = arith.constant 0 : i32
    %c0_i32_0 = arith.constant 0 : i32
    %c0_i32_1 = arith.constant 0 : i32
    return %c0_i32, %c0_i32_0 : i32, i32
  }
}

</mosaic_0001>

<bundles_post_ra>
// kernel: tpu_custom_call.1
= control target key start
LH: loop header
LB: loop body
LE: loop exit
PB: predicated region body
PF: predicated region fallthrough
CT: control target
= control target key end

     0   :  { %20 = vsyncpa [#allocation7], 0  ;;  %s6634_s0 = inlined_call_operand.hbm [shape: f32[8,8,128], index: 0, kind: input, shape index: {}]   ;;  %s6635_s1 = inlined_call_operand.hbm [shape: f32[32,128], index: 1, kind: input, shape index: {}]   ;;  %s6636_s2 = inlined_call_operand.hbm [shape: f32[32,128], index: 2, kind: input, shape index: {}]   ;;  %s6637_s3 = inlined_call_operand.vmem [shape: f32[1,128], index: 3, kind: input, shape index: {}]   ;;  %s6638_s4 = inlined_call_operand.hbm [shape: f32[32,128], index: 4, kind: input, shape index: {}]   ;;  %s6639_s5 = inlined_call_operand.hbm [shape: f32[32,128], index: 5, kind: input, shape index: {}]   ;;  %s6640_s6 = inlined_call_operand.vmem [shape: f32[1,128], index: 6, kind: input, shape index: {}]   ;;  %s6641_s7 = inlined_call_operand.hbm [shape: f32[32,128], index: 7, kind: input, shape index: {}]   ;;  %s6642_s8 = inlined_call_operand.hbm [shape: f32[32,128], index: 8, kind: input, shape index: {}]   ;;  %s6643_s9 = inlined_call_operand.vmem [shape: f32[1,128], index: 9, kind: input, shape index: {}]   ;;  %s6644_s10 = inlined_call_operand.vmem [shape: f32[32,128], index: 10, kind: input, shape index: {}]   ;;  %s6645_s11 = inlined_call_operand.hbm [shape: f32[32,128], index: 11, kind: input, shape index: {}]   ;;  %s6646_s12 = inlined_call_operand.vmem [shape: f32[1,128], index: 12, kind: input, shape index: {}]   ;;  %s6647_s13 = inlined_call_operand.hbm [shape: f32[128,128], index: 13, kind: input, shape index: {}]   ;;  %s6648_s14 = inlined_call_operand.vmem [shape: f32[1,128], index: 14, kind: input, shape index: {}]   ;;  %s6649_s15 = inlined_call_operand.hbm [shape: f32[8,128], index: 15, kind: output, shape index: {}]  }
   0x1   :  { %21 = vsyncpa [#allocation10], 0 }
   0x2   :  { %22 = vsyncpa [#allocation13], 0 }
   0x3   :  { %23 = vsyncpa [#allocation16], 0 }
   0x4   :  { %24 = vsyncpa [#allocation19], 0 }
   0x5   :  { %25 = vsyncpa [#allocation8], 0  ;;  %s5754_s18 = smov [#allocation9]   ;;  %s5755_s20 = smov [#allocation12]  }
   0x6   :  { %s43_s19 = sshll.u32 %s5754_s18, 4  ;;  %s69_s21 = sshll.u32 %s5755_s20, 4  ;;  %s44_s19 = int_to_ptr.vmem [resolvable:$true] %s43_s19  ;;  %s5852_s21 = int_to_ptr.vmem [resolvable:$true] %s69_s21 }
   0x7   :  { %s5522_s24 = scalar_lea.hbm %s6635_s1, 512 }
   0x8   :  { %p5523_p0 = scmp.ne.s32.totalorder %s6635_s1, %s5522_s24  ;;  %p5526_p1 = scmp.lt.u32.totalorder %s5522_s24, %s6635_s1 }
   0xa   :  { %p5528_p2 = pnand %p5526_p1, %p5523_p0 }
   0xc   :  { %5531 = shalt.err (!%p5528_p2)
}
   0xd   :  { %s5532_s29 = scalar_lea.vmem %s44_s19, 512  ;;  %p5537_p4 = scmp.lt.s32.totalorder %s44_s19, %s44_s19 }
   0xe   :  { %p5533_p3 = scmp.ne.s32.totalorder %s44_s19, %s5532_s29  ;;  %p5538_p5 = scmp.lt.s32.totalorder %s5532_s29, %s5532_s29 }
  0x10   :  { %p5539_p6 = por %p5538_p5, %p5537_p4 }
  0x12   :  { %p5540_p7 = pnand %p5539_p6, %p5533_p3 }
  0x14   :  { %5543 = shalt.err (!%p5540_p7)
}
  0x15   :  { %s5756_s30 = smov 128   ;;  %s5757_s16 = smov 8  }
  0x16   :  { %49 = dma.hbm_to_vmem [thread:$0]  %s6635_s1, 512, %s44_s19, [#allocation10], %s5756_s30, %s5756_s30, %s5757_s16  }
  0x17   :  { %s5544_s23 = scalar_lea.hbm %s6638_s4, 512 }
  0x18   :  { %p5545_p8 = scmp.ne.s32.totalorder %s6638_s4, %s5544_s23  ;;  %p5548_p9 = scmp.lt.u32.totalorder %s5544_s23, %s6638_s4 }
  0x1a   :  { %p5550_p10 = pnand %p5548_p9, %p5545_p8 }
  0x1c   :  { %5553 = shalt.err (!%p5550_p10)
}
  0x1d   :  { %s5554_s28 = scalar_lea.vmem %s5852_s21, 512  ;;  %p5559_p12 = scmp.lt.s32.totalorder %s5852_s21, %s5852_s21 }
  0x1e   :  { %p5555_p11 = scmp.ne.s32.totalorder %s5852_s21, %s5554_s28  ;;  %p5560_p13 = scmp.lt.s32.totalorder %s5554_s28, %s5554_s28 }
  0x20   :  { %p5561_p0 = por %p5560_p13, %p5559_p12 }
  0x22   :  { %p5562_p1 = pnand %p5561_p0, %p5555_p11 }
  0x24   :  { %5565 = shalt.err (!%p5562_p1)
}
  0x25   :  { %75 = dma.hbm_to_vmem [thread:$0]  %s6638_s4, 512, %s5852_s21, [#allocation13], %s5756_s30, %s5756_s30, %s5757_s16  }
  0x26   :  { %s5758_s29 = smov [#allocation15]   ;;  %s5759_s18 = smov [#allocation18]  }
  0x27   :  { %s95_s17 = sshll.u32 %s5758_s29, 4  ;;  %s123_s20 = sshll.u32 %s5759_s18, 4  ;;  %s96_s17 = int_to_ptr.vmem [resolvable:$true] %s95_s17  ;;  %s5889_s20 = int_to_ptr.vmem [resolvable:$true] %s123_s20 }
  0x28   :  { %s5566_s24 = scalar_lea.hbm %s6641_s7, 512 }
  0x29   :  { %p5567_p2 = scmp.ne.s32.totalorder %s6641_s7, %s5566_s24  ;;  %p5570_p3 = scmp.lt.u32.totalorder %s5566_s24, %s6641_s7 }
  0x2b   :  { %p5572_p4 = pnand %p5570_p3, %p5567_p2 }
  0x2d   :  { %5575 = shalt.err (!%p5572_p4)
}
  0x2e   :  { %s5576_s4 = scalar_lea.vmem %s96_s17, 512  ;;  %p5581_p6 = scmp.lt.s32.totalorder %s96_s17, %s96_s17 }
  0x2f   :  { %p5577_p5 = scmp.ne.s32.totalorder %s96_s17, %s5576_s4  ;;  %p5582_p7 = scmp.lt.s32.totalorder %s5576_s4, %s5576_s4 }
  0x31   :  { %p5583_p8 = por %p5582_p7, %p5581_p6 }
  0x33   :  { %p5584_p9 = pnand %p5583_p8, %p5577_p5 }
  0x35   :  { %5587 = shalt.err (!%p5584_p9)
}
  0x36   :  { %101 = dma.hbm_to_vmem [thread:$0]  %s6641_s7, 512, %s96_s17, [#allocation16], %s5756_s30, %s5756_s30, %s5757_s16  }
  0x37   :  { %s5588_s18 = scalar_lea.hbm %s6645_s11, 512 }
  0x38   :  { %p5589_p10 = scmp.ne.s32.totalorder %s6645_s11, %s5588_s18  ;;  %p5592_p11 = scmp.lt.u32.totalorder %s5588_s18, %s6645_s11 }
  0x3a   :  { %p5594_p12 = pnand %p5592_p11, %p5589_p10 }
  0x3c   :  { %5597 = shalt.err (!%p5594_p12)
}
  0x3d   :  { %s5598_s26 = scalar_lea.vmem %s5889_s20, 512  ;;  %p5603_p0 = scmp.lt.s32.totalorder %s5889_s20, %s5889_s20 }
  0x3e   :  { %p5599_p13 = scmp.ne.s32.totalorder %s5889_s20, %s5598_s26  ;;  %p5604_p1 = scmp.lt.s32.totalorder %s5598_s26, %s5598_s26 }
  0x40   :  { %p5605_p2 = por %p5604_p1, %p5603_p0 }
  0x42   :  { %p5606_p3 = pnand %p5605_p2, %p5599_p13 }
  0x44   :  { %5609 = shalt.err (!%p5606_p3)
}
  0x45   :  { %129 = dma.hbm_to_vmem [thread:$0]  %s6645_s11, 512, %s5889_s20, [#allocation19], %s5756_s30, %s5756_s30, %s5757_s16  }
  0x46   :  { %s5760_s27 = smov [#allocation6]   ;;  %s5761_s4 = smov [#allocation11]  }
  0x47   :  { %s31_s28 = sshll.u32 %s5760_s27, 4  ;;  %s55_s21 = sshll.u32 %s5761_s4, 4  ;;  %s32_s28 = int_to_ptr.vmem [resolvable:$true] %s31_s28  ;;  %s5926_s21 = int_to_ptr.vmem [resolvable:$true] %s55_s21 }
  0x48   :  { %s5610_s29 = scalar_lea.hbm %s6634_s0, 1024 }
  0x49   :  { %p5611_p4 = scmp.ne.s32.totalorder %s6634_s0, %s5610_s29  ;;  %p5614_p5 = scmp.lt.u32.totalorder %s5610_s29, %s6634_s0 }
  0x4b   :  { %p5616_p6 = pnand %p5614_p5, %p5611_p4 }
  0x4d   :  { %5619 = shalt.err (!%p5616_p6)
}
  0x4e   :  { %s5620_s11 = scalar_lea.vmem %s32_s28, 1024  ;;  %p5625_p8 = scmp.lt.s32.totalorder %s32_s28, %s32_s28 }
  0x4f   :  { %p5621_p7 = scmp.ne.s32.totalorder %s32_s28, %s5620_s11  ;;  %p5626_p9 = scmp.lt.s32.totalorder %s5620_s11, %s5620_s11 }
  0x51   :  { %p5627_p10 = por %p5626_p9, %p5625_p8 }
  0x53   :  { %p5628_p11 = pnand %p5627_p10, %p5621_p7 }
  0x55   :  { %5631 = shalt.err (!%p5628_p11)
}
  0x56   :  { %37 = dma.hbm_to_vmem [thread:$0]  %s6634_s0, 1024, %s32_s28, [#allocation7], %s5756_s30, %s5756_s30, %s5757_s16  }
  0x57   :  { %s5632_s17 = scalar_lea.hbm %s6636_s2, 512 }
  0x58   :  { %p5633_p12 = scmp.ne.s32.totalorder %s6636_s2, %s5632_s17  ;;  %p5636_p13 = scmp.lt.u32.totalorder %s5632_s17, %s6636_s2 }
  0x5a   :  { %p5638_p0 = pnand %p5636_p13, %p5633_p12 }
  0x5c   :  { %5641 = shalt.err (!%p5638_p0)
}
  0x5d   :  { %s5642_s29 = scalar_lea.vmem %s5926_s21, 512  ;;  %p5647_p2 = scmp.lt.s32.totalorder %s5926_s21, %s5926_s21 }
  0x5e   :  { %p5643_p1 = scmp.ne.s32.totalorder %s5926_s21, %s5642_s29  ;;  %p5648_p3 = scmp.lt.s32.totalorder %s5642_s29, %s5642_s29 }
  0x60   :  { %p5649_p4 = por %p5648_p3, %p5647_p2 }
  0x62   :  { %p5650_p5 = pnand %p5649_p4, %p5643_p1 }
  0x64   :  { %5653 = shalt.err (!%p5650_p5)
}
  0x65   :  { %61 = dma.hbm_to_vmem [thread:$0]  %s6636_s2, 512, %s5926_s21, [#allocation10], %s5756_s30, %s5756_s30, %s5757_s16  }
  0x66   :  { %s5762_s18 = smov [#allocation14]   ;;  %s5763_s23 = smov [#allocation17]  }
  0x67   :  { %s81_s22 = sshll.u32 %s5762_s18, 4  ;;  %s107_s24 = sshll.u32 %s5763_s23, 4  ;;  %s82_s22 = int_to_ptr.vmem [resolvable:$true] %s81_s22  ;;  %s5963_s24 = int_to_ptr.vmem [resolvable:$true] %s107_s24 }
  0x68   :  { %s5654_s25 = scalar_lea.hbm %s6639_s5, 512 }
  0x69   :  { %p5655_p6 = scmp.ne.s32.totalorder %s6639_s5, %s5654_s25  ;;  %p5658_p7 = scmp.lt.u32.totalorder %s5654_s25, %s6639_s5 }
  0x6b   :  { %p5660_p8 = pnand %p5658_p7, %p5655_p6 }
  0x6d   :  { %5663 = shalt.err (!%p5660_p8)
}
  0x6e   :  { %s5664_s2 = scalar_lea.vmem %s82_s22, 512  ;;  %p5669_p10 = scmp.lt.s32.totalorder %s82_s22, %s82_s22 }
  0x6f   :  { %p5665_p9 = scmp.ne.s32.totalorder %s82_s22, %s5664_s2  ;;  %p5670_p11 = scmp.lt.s32.totalorder %s5664_s2, %s5664_s2 }
  0x71   :  { %p5671_p12 = por %p5670_p11, %p5669_p10 }
  0x73   :  { %p5672_p13 = pnand %p5671_p12, %p5665_p9 }
  0x75   :  { %5675 = shalt.err (!%p5672_p13)
}
  0x76   :  { %87 = dma.hbm_to_vmem [thread:$0]  %s6639_s5, 512, %s82_s22, [#allocation13], %s5756_s30, %s5756_s30, %s5757_s16  }
  0x77   :  { %s5676_s29 = scalar_lea.hbm %s6642_s8, 512 }
  0x78   :  { %p5677_p0 = scmp.ne.s32.totalorder %s6642_s8, %s5676_s29  ;;  %p5680_p1 = scmp.lt.u32.totalorder %s5676_s29, %s6642_s8 }
  0x7a   :  { %p5682_p2 = pnand %p5680_p1, %p5677_p0 }
  0x7c   :  { %5685 = shalt.err (!%p5682_p2)
}
  0x7d   :  { %s5686_s11 = scalar_lea.vmem %s5963_s24, 512  ;;  %p5691_p4 = scmp.lt.s32.totalorder %s5963_s24, %s5963_s24 }
  0x7e   :  { %p5687_p3 = scmp.ne.s32.totalorder %s5963_s24, %s5686_s11  ;;  %p5692_p5 = scmp.lt.s32.totalorder %s5686_s11, %s5686_s11 }
  0x80   :  { %p5693_p6 = por %p5692_p5, %p5691_p4 }
  0x82   :  { %p5694_p7 = pnand %p5693_p6, %p5687_p3 }
  0x84   :  { %5697 = shalt.err (!%p5694_p7)
}
  0x85   :  { %113 = dma.hbm_to_vmem [thread:$0]  %s6642_s8, 512, %s5963_s24, [#allocation16], %s5756_s30, %s5756_s30, %s5757_s16  }
  0x86   :  { %s5764_s20 = smov [#allocation20]   ;;  %s5698_s17 = scalar_lea.hbm %s6647_s13, 2048 }
  0x87   :  { %s137_s25 = sshll.u32 %s5764_s20, 4  ;;  %p5699_p8 = scmp.ne.s32.totalorder %s6647_s13, %s5698_s17  ;;  %s138_s25 = int_to_ptr.vmem [resolvable:$true] %s137_s25 }
  0x88   :  { %p5702_p9 = scmp.lt.u32.totalorder %s5698_s17, %s6647_s13 }
  0x8a   :  { %p5704_p10 = pnand %p5702_p9, %p5699_p8 }
  0x8c   :  { %5707 = shalt.err (!%p5704_p10)
}
  0x8d   :  { %s5708_s1 = scalar_lea.vmem %s138_s25, 2048  ;;  %p5713_p12 = scmp.lt.s32.totalorder %s138_s25, %s138_s25 }
  0x8e   :  { %p5709_p11 = scmp.ne.s32.totalorder %s138_s25, %s5708_s1  ;;  %p5714_p13 = scmp.lt.s32.totalorder %s5708_s1, %s5708_s1 }
  0x90   :  { %p5715_p0 = por %p5714_p13, %p5713_p12 }
  0x92   :  { %p5716_p1 = pnand %p5715_p0, %p5709_p11 }
  0x94   :  { %5719 = shalt.err (!%p5716_p1)
}
  0x95   :  { %143 = dma.hbm_to_vmem [thread:$0]  %s6647_s13, 2048, %s138_s25, [#allocation19], %s5756_s30, %s5756_s30, %s5757_s16  }
  0x96   :  { %5742 = dma.done.wait [#allocation7], 1024  }
  0x97   :  { %5743 = vsyncadd [#allocation7], 4294966272 }
  0x98   :  { %5744 = dma.done.wait [#allocation10], 1024  }
  0x99   :  { %5745 = vsyncadd [#allocation10], 4294966272 }
  0x9a   :  { %5746 = dma.done.wait [#allocation13], 1024  }
  0x9b   :  { %5747 = vsyncadd [#allocation13], 4294966272 }
  0x9c   :  { %5748 = dma.done.wait [#allocation16], 1024  }
  0x9d   :  { %5749 = vsyncadd [#allocation16], 4294966272 }
  0x9e   :  { %5750 = dma.done.wait [#allocation19], 2560  }
  0x9f   :  { %5751 = vsyncadd [#allocation19], 4294964736  ;;  %vm177_vm0 = vcmask 261120   ;;  %v5765_v0 = vmov 0.0|0.0   ;;  %vm5766_vm1 = vmmov 0   ;;  %v5767_v1 = vmov 0.0  }
  0xa0   :  { %5002 = vmatprep.subr.bf16.mxu0 %v5765_v0  ;;  %4552 = vmatprep.mubr.msk.f32.mxu0 %vm5766_vm1, %v5767_v1  ;;  %178 = vst.msk [vmem:[#allocation2] sm:$0xff] %vm177_vm0, %v5767_v1  ;;  %179 = vst.msk [vmem:[#allocation2 + $0x8] sm:$0xff] %vm177_vm0, %v5767_v1  ;;  %v186_v2 = vld [vmem:[#allocation9] sm:$0xff]  ;;  %v187_v3 = vld [vmem:[#allocation9 + $0x8] sm:$0xff]  ;;  %s5768_s13 = smov 64   ;;  %s5769_s30 = smov 32  }
  0xa1   :  { %180 = vst.msk [vmem:[#allocation2 + $0x10] sm:$0xff] %vm177_vm0, %v5767_v1  ;;  %181 = vst.msk [vmem:[#allocation2 + $0x18] sm:$0xff] %vm177_vm0, %v5767_v1  ;;  %5020 = vmatprep.subr.bf16.mxu1 %v5765_v0  ;;  %4585 = vmatprep.mubr.msk.f32.mxu1 %vm5766_vm1, %v5767_v1  ;;  %v188_v4 = vld [vmem:[#allocation9 + $0x10] sm:$0xff]  ;;  %v6037_v5 = vpack.c.bf16 %v187_v3, %v186_v2  ;;  %v189_v6 = vld [vmem:[#allocation9 + $0x18] sm:$0xff]  ;;  %s5771_s27 = smov [#allocation21]  }
  0xa2   :  { %182 = vst.msk [vmem:[#allocation3] sm:$0xff] %vm177_vm0, %v5767_v1  ;;  %183 = vst.msk [vmem:[#allocation3 + $0x8] sm:$0xff] %vm177_vm0, %v5767_v1  ;;  %v6040_v7 = vpack.c.bf16 %v189_v6, %v188_v4  ;;  %v192_v9 = vld [vmem:[#allocation6] sm:$0xff]  ;;  %v302_v29 = vld [vmem:[#allocation6 + $0x8] sm:$0xff]  ;;  %s4219_s2 = sshll.u32 %s5771_s27, 4  ;;  %s4220_s2 = int_to_ptr.vmem [resolvable:$true] %s4219_s2 }
  0xa3   :  { %184 = vst.msk [vmem:[#allocation3 + $0x10] sm:$0xff] %vm177_vm0, %v5767_v1  ;;  %185 = vst.msk [vmem:[#allocation3 + $0x18] sm:$0xff] %vm177_vm0, %v5767_v1  ;;  %5004 = vmatpush3.bf16.msra.mxu0 %v6037_v5  ;;  %5022 = vmatpush3.bf16.msra.mxu1 %v6037_v5  ;;  %v407_v47 = vld [vmem:[#allocation6 + $0x10] sm:$0xff]  ;;  %v512_v3 = vld [vmem:[#allocation6 + $0x18] sm:$0xff]  ;;  %s5720_s21 = scalar_lea.vmem %s4220_s2, 128  ;;  %p5725_p3 = scmp.lt.s32.totalorder %s4220_s2, %s4220_s2 }
  0xa4   :  { %5005 = vmatprep.subr.bf16.mxu0 %v5765_v0  ;;  %5023 = vmatprep.subr.bf16.mxu1 %v5765_v0  ;;  %p5721_p2 = scmp.ne.s32.totalorder %s4220_s2, %s5720_s21  ;;  %p5726_p4 = scmp.lt.s32.totalorder %s5720_s21, %s5720_s21 }
  0xa6   :  { %p5727_p5 = por %p5726_p4, %p5725_p3 }
  0xa7   :  { %5007 = vmatpush3.bf16.msra.mxu0 %v6040_v7  ;;  %v190_v8 = vld [vmem:[#allocation2] sm:$0xff]  ;;  %5025 = vmatpush3.bf16.msra.mxu1 %v6040_v7 }
  0xa8   :  { %5008 = vmatprep.subr.bf16.mxu0 %v5765_v0  ;;  %5032 = vmatprep.subr.bf16.mxu1 %v5765_v0  ;;  %p5728_p6 = pnand %p5727_p5, %p5721_p2 }
  0xa9   :  { %v191_v14 = vld [vmem:[#allocation3] sm:$0xff] }
  0xaa   :  { %4553 = vmatmul.mubr.msk.f32.vlgmr.msra.gmra.mrb[0].mxu0 %vm177_vm0, %v190_v8 }
  0xab   :  { %5010 = vmatpush3.bf16.msra.mxu0 %v6037_v5  ;;  %4563 = vmatprep.mubr.msk.f32.mxu0 %vm5766_vm1, %v5767_v1 }
  0xac   :  { %5011 = vmatprep.subr.bf16.mxu0 %v5765_v0 }
  0xaf   :  { %5013 = vmatpush3.bf16.msra.mxu0 %v6040_v7 }
  0xb0   :  { %5014 = vmatprep.subr.bf16.mxu0 %v5765_v0 }
 0x17d   :  { %v263_v10 = vpop.f32.mrb[0].mxu0 }
 0x17e   :  { %v267_v11 = vadd.f32 %v263_v10, %v192_v9  ;;  %v4554_v12 = vpop.f32.mrb[1].mxu0 }
 0x180   :  { %5266 = vtanh.f32 %v267_v11  ;;  %v4233_v15 = vmul.f32 -1.442695, %v267_v11 }
 0x182   :  { %5268 = vpow2.f32 %v4233_v15 }
 0x18a   :  { %v5267_v13 = vpop.eup %5266 }
 0x18b   :  { %281 = vrot.lane.b32.xlu0 %v5267_v13, %s5768_s13 }
 0x18c   :  { %v5269_v16 = vpop.eup %5268 }
 0x18d   :  { %v271_v17 = vadd.f32 1.0, %v5269_v16 }
 0x18f   :  { %276 = vrot.lane.b32.xlu0 %v191_v14, %s5769_s30  ;;  %5270 = vrcp.f32 %v271_v17 }
 0x199   :  { %v5271_v18 = vpop.eup %5270 }
 0x1fd   :  { %v282_v19 = vpop.permute.xlu0 %281 }
 0x1fe   :  { %v284_v20 = vmul.f32 %v5271_v18, %v282_v19 }
 0x200   :  { %286 = vrot.lane.b32.xlu1 %v284_v20, %s5769_s30 }
 0x201   :  { %v277_v21 = vpop.permute.xlu0 %276 }
 0x202   :  { %v279_v22 = vmul.f32 %v5271_v18, %v277_v21 }
 0x272   :  { %v287_v23 = vpop.permute.xlu1 %286 }
 0x273   :  { %v289_v24 = vadd.f32 %v287_v23, %v279_v22  ;;  %v617_v23 = vld [vmem:[#allocation6 + $0x20] sm:$0xff] }
 0x275   :  { %5272 = vtanh.f32 %v289_v24 }
 0x27f   :  { %v5273_v25 = vpop.eup %5272 }
 0x280   :  { %292 = vrot.lane.b32.xlu1 %v5273_v25, %s5768_s13 }
 0x2f2   :  { %v293_v26 = vpop.permute.xlu1 %292 }
 0x2f3   :  { %v295_v27 = vmul.f32 %v5271_v18, %v293_v26 }
 0x2f5   :  { %297 = vrot.lane.b32.xlu0 %v295_v27, %s5769_s30 }
 0x367   :  { %v298_v28 = vpop.permute.xlu0 %297 }
 0x368   :  { %300 = vst.msk [vmem:[#allocation4] sm:$0xff] %vm177_vm0, %v298_v28  ;;  %4564 = vmatmul.mubr.msk.f32.vlgmr.msra.gmra.mrb[2].mxu0 %vm177_vm0, %v298_v28 }
 0x369   :  { %5016 = vmatpush3.bf16.msra.mxu0 %v6037_v5  ;;  %4574 = vmatprep.mubr.msk.f32.mxu0 %vm5766_vm1, %v5767_v1 }
 0x36a   :  { %5017 = vmatprep.subr.bf16.mxu0 %v5765_v0 }
 0x36d   :  { %5019 = vmatpush3.bf16.msra.mxu0 %v6040_v7 }
 0x36e   :  { %5026 = vmatprep.subr.bf16.mxu0 %v5765_v0 }
 0x43b   :  { %v371_v30 = vpop.f32.mrb[2].mxu0 }
 0x43c   :  { %v375_v31 = vadd.f32 %v371_v30, %v302_v29  ;;  %v4565_v32 = vpop.f32.mrb[3].mxu0 }
 0x43e   :  { %5274 = vtanh.f32 %v375_v31  ;;  %v4235_v34 = vmul.f32 -1.442695, %v375_v31 }
 0x440   :  { %5276 = vpow2.f32 %v4235_v34 }
 0x448   :  { %v5275_v33 = vpop.eup %5274 }
 0x449   :  { %385 = vrot.lane.b32.xlu1 %v5275_v33, %s5768_s13 }
 0x44a   :  { %v5277_v35 = vpop.eup %5276 }
 0x44b   :  { %v379_v36 = vadd.f32 1.0, %v5277_v35 }
 0x44d   :  { %5278 = vrcp.f32 %v379_v36 }
 0x457   :  { %v5279_v37 = vpop.eup %5278 }
 0x458   :  { %v383_v40 = vmul.f32 %v5279_v37, %v289_v24 }
 0x4bb   :  { %v386_v38 = vpop.permute.xlu1 %385 }
 0x4bc   :  { %v388_v39 = vmul.f32 %v5279_v37, %v386_v38 }
 0x4be   :  { %390 = vrot.lane.b32.xlu0 %v388_v39, %s5769_s30 }
 0x530   :  { %v391_v41 = vpop.permute.xlu0 %390 }
 0x531   :  { %v393_v42 = vadd.f32 %v391_v41, %v383_v40  ;;  %v722_v41 = vld [vmem:[#allocation6 + $0x28] sm:$0xff] }
 0x533   :  { %5280 = vtanh.f32 %v393_v42 }
 0x53d   :  { %v5281_v43 = vpop.eup %5280 }
 0x53e   :  { %396 = vrot.lane.b32.xlu1 %v5281_v43, %s5768_s13 }
 0x5b0   :  { %v397_v44 = vpop.permute.xlu1 %396 }
 0x5b1   :  { %v399_v45 = vmul.f32 %v5279_v37, %v397_v44 }
 0x5b3   :  { %401 = vrot.lane.b32.xlu0 %v399_v45, %s5769_s30 }
 0x625   :  { %v402_v46 = vpop.permute.xlu0 %401 }
 0x626   :  { %405 = vst.msk [vmem:[#allocation4 + $0x8] sm:$0xff] %vm177_vm0, %v402_v46  ;;  %4575 = vmatmul.mubr.msk.f32.vlgmr.msra.gmra.mrb[4].mxu0 %vm177_vm0, %v402_v46 }
 0x627   :  { %5028 = vmatpush3.bf16.msra.mxu0 %v6037_v5  ;;  %4596 = vmatprep.mubr.msk.f32.mxu0 %vm5766_vm1, %v5767_v1 }
 0x628   :  { %5029 = vmatprep.subr.bf16.mxu0 %v5765_v0 }
 0x62b   :  { %5031 = vmatpush3.bf16.msra.mxu0 %v6040_v7 }
 0x62c   :  { %5038 = vmatprep.subr.bf16.mxu0 %v5765_v0 }
 0x6f9   :  { %v476_v48 = vpop.f32.mrb[4].mxu0 }
 0x6fa   :  { %v480_v49 = vadd.f32 %v476_v48, %v407_v47  ;;  %v4576_v50 = vpop.f32.mrb[5].mxu0 }
 0x6fc   :  { %5282 = vtanh.f32 %v480_v49  ;;  %v4237_v52 = vmul.f32 -1.442695, %v480_v49 }
 0x6fe   :  { %5284 = vpow2.f32 %v4237_v52 }
 0x706   :  { %v5283_v51 = vpop.eup %5282 }
 0x707   :  { %490 = vrot.lane.b32.xlu1 %v5283_v51, %s5768_s13 }
 0x708   :  { %v5285_v53 = vpop.eup %5284 }
 0x709   :  { %v484_v54 = vadd.f32 1.0, %v5285_v53  ;;  %v1050_v53 = vld [vmem:[#allocation11] sm:$0xff] }
 0x70b   :  { %5286 = vrcp.f32 %v484_v54  ;;  %v1051_v54 = vld [vmem:[#allocation11 + $0x8] sm:$0xff] }
 0x715   :  { %v5287_v55 = vpop.eup %5286 }
 0x716   :  { %v488_v58 = vmul.f32 %v5287_v55, %v393_v42 }
 0x779   :  { %v491_v56 = vpop.permute.xlu1 %490 }
 0x77a   :  { %v493_v57 = vmul.f32 %v5287_v55, %v491_v56 }
 0x77c   :  { %495 = vrot.lane.b32.xlu0 %v493_v57, %s5769_s30 }
 0x7ee   :  { %v496_v59 = vpop.permute.xlu0 %495 }
 0x7ef   :  { %v498_v60 = vadd.f32 %v496_v59, %v488_v58  ;;  %v1052_v59 = vld [vmem:[#allocation11 + $0x10] sm:$0xff] }
 0x7f1   :  { %5288 = vtanh.f32 %v498_v60 }
 0x7fb   :  { %v5289_v61 = vpop.eup %5288 }
 0x7fc   :  { %501 = vrot.lane.b32.xlu1 %v5289_v61, %s5768_s13 }
 0x86e   :  { %v502_v62 = vpop.permute.xlu1 %501 }
 0x86f   :  { %v504_v63 = vmul.f32 %v5287_v55, %v502_v62  ;;  %v5050_v55 = vpack.c.bf16 %v1051_v54, %v1050_v53 }
 0x871   :  { %506 = vrot.lane.b32.xlu0 %v504_v63, %s5769_s30  ;;  %v1042_v63 = vld [vmem:[#allocation4] sm:$0xff] }
 0x8e3   :  { %v507_v2 = vpop.permute.xlu0 %506 }
 0x8e4   :  { %510 = vst.msk [vmem:[#allocation4 + $0x10] sm:$0xff] %vm177_vm0, %v507_v2  ;;  %4586 = vmatmul.mubr.msk.f32.vlgmr.msra.gmra.mrb[0].mxu1 %vm177_vm0, %v507_v2  ;;  %v1043_v2 = vld [vmem:[#allocation4 + $0x8] sm:$0xff] }
 0x8e5   :  { %5034 = vmatpush3.bf16.msra.mxu1 %v6037_v5  ;;  %4607 = vmatprep.mubr.msk.f32.mxu1 %vm5766_vm1, %v5767_v1 }
 0x8e6   :  { %5035 = vmatprep.subr.bf16.mxu1 %v5765_v0 }
 0x8e9   :  { %5037 = vmatpush3.bf16.msra.mxu1 %v6040_v7 }
 0x8ea   :  { %5044 = vmatprep.subr.bf16.mxu1 %v5765_v0 }
 0x9b7   :  { %v581_v4 = vpop.f32.mrb[0].mxu1 }
 0x9b8   :  { %v585_v6 = vadd.f32 %v581_v4, %v512_v3  ;;  %v4587_v8 = vpop.f32.mrb[1].mxu1  ;;  %v1044_v3 = vld [vmem:[#allocation4 + $0x10] sm:$0xff] }
 0x9ba   :  { %5290 = vtanh.f32 %v585_v6  ;;  %v4239_v10 = vmul.f32 -1.442695, %v585_v6 }
 0x9bc   :  { %5292 = vpow2.f32 %v4239_v10 }
 0x9c4   :  { %v5291_v9 = vpop.eup %5290 }
 0x9c5   :  { %595 = vrot.lane.b32.xlu1 %v5291_v9, %s5768_s13  ;;  %v827_v9 = vld [vmem:[#allocation6 + $0x30] sm:$0xff] }
 0x9c6   :  { %v5293_v11 = vpop.eup %5292 }
 0x9c7   :  { %v589_v12 = vadd.f32 1.0, %v5293_v11 }
 0x9c9   :  { %5294 = vrcp.f32 %v589_v12 }
 0x9d3   :  { %v5295_v13 = vpop.eup %5294 }
 0x9d4   :  { %v593_v16 = vmul.f32 %v5295_v13, %v498_v60  ;;  %v1053_v60 = vld [vmem:[#allocation11 + $0x18] sm:$0xff] }
 0x9d5   :  { %v5054_v61 = vpack.c.bf16 %v1053_v60, %v1052_v59 }
 0xa37   :  { %v596_v14 = vpop.permute.xlu1 %595 }
 0xa38   :  { %v598_v15 = vmul.f32 %v5295_v13, %v596_v14 }
 0xa3a   :  { %600 = vrot.lane.b32.xlu0 %v598_v15, %s5769_s30 }
 0xaac   :  { %v601_v17 = vpop.permute.xlu0 %600 }
 0xaad   :  { %v603_v18 = vadd.f32 %v601_v17, %v593_v16 }
 0xaaf   :  { %5296 = vtanh.f32 %v603_v18 }
 0xab9   :  { %v5297_v19 = vpop.eup %5296 }
 0xaba   :  { %606 = vrot.lane.b32.xlu1 %v5297_v19, %s5768_s13 }
 0xb2c   :  { %v607_v20 = vpop.permute.xlu1 %606 }
 0xb2d   :  { %v609_v21 = vmul.f32 %v5295_v13, %v607_v20 }
 0xb2f   :  { %611 = vrot.lane.b32.xlu0 %v609_v21, %s5769_s30 }
 0xba1   :  { %v612_v22 = vpop.permute.xlu0 %611 }
 0xba2   :  { %615 = vst.msk [vmem:[#allocation4 + $0x18] sm:$0xff] %vm177_vm0, %v612_v22  ;;  %4597 = vmatmul.mubr.msk.f32.vlgmr.msra.gmra.mrb[6].mxu0 %vm177_vm0, %v612_v22 }
 0xba3   :  { %5040 = vmatpush3.bf16.msra.mxu0 %v6037_v5  ;;  %4618 = vmatprep.mubr.msk.f32.mxu0 %vm5766_vm1, %v5767_v1 }
 0xba4   :  { %5041 = vmatprep.subr.bf16.mxu0 %v5765_v0 }
 0xba7   :  { %5043 = vmatpush3.bf16.msra.mxu0 %v6040_v7 }
 0xba8   :  { %5051 = vmatprep.subr.bf16.mxu0 %v5050_v55 }
 0xba9   :  { %v1045_v4 = vld [vmem:[#allocation4 + $0x18] sm:$0xff] }
 0xc75   :  { %v686_v24 = vpop.f32.mrb[6].mxu0 }
 0xc76   :  { %v690_v25 = vadd.f32 %v686_v24, %v617_v23  ;;  %v4598_v26 = vpop.f32.mrb[7].mxu0 }
 0xc78   :  { %5298 = vtanh.f32 %v690_v25  ;;  %v4241_v28 = vmul.f32 -1.442695, %v690_v25 }
 0xc7a   :  { %5300 = vpow2.f32 %v4241_v28 }
 0xc82   :  { %v5299_v27 = vpop.eup %5298 }
 0xc83   :  { %700 = vrot.lane.b32.xlu1 %v5299_v27, %s5768_s13 }
 0xc84   :  { %v5301_v29 = vpop.eup %5300 }
 0xc85   :  { %v694_v30 = vadd.f32 1.0, %v5301_v29 }
 0xc87   :  { %5302 = vrcp.f32 %v694_v30  ;;  %v1198_v30 = vld [vmem:[#allocation12] sm:$0xff] }
 0xc91   :  { %v5303_v31 = vpop.eup %5302 }
 0xc92   :  { %v698_v34 = vmul.f32 %v5303_v31, %v603_v18 }
 0xcf5   :  { %v701_v32 = vpop.permute.xlu1 %700 }
 0xcf6   :  { %v703_v33 = vmul.f32 %v5303_v31, %v701_v32 }
 0xcf8   :  { %705 = vrot.lane.b32.xlu0 %v703_v33, %s5769_s30  ;;  %v1200_v33 = vld [vmem:[#allocation12 + $0x10] sm:$0xff] }
 0xd6a   :  { %v706_v35 = vpop.permute.xlu0 %705 }
 0xd6b   :  { %v708_v36 = vadd.f32 %v706_v35, %v698_v34  ;;  %v1201_v34 = vld [vmem:[#allocation12 + $0x18] sm:$0xff] }
 0xd6c   :  { %v6149_v35 = vpack.c.bf16 %v1201_v34, %v1200_v33 }
 0xd6d   :  { %5304 = vtanh.f32 %v708_v36 }
 0xd77   :  { %v5305_v37 = vpop.eup %5304 }
 0xd78   :  { %711 = vrot.lane.b32.xlu1 %v5305_v37, %s5768_s13 }
 0xdea   :  { %v712_v38 = vpop.permute.xlu1 %711 }
 0xdeb   :  { %v714_v39 = vmul.f32 %v5303_v31, %v712_v38  ;;  %v1199_v31 = vld [vmem:[#allocation12 + $0x8] sm:$0xff] }
 0xdec   :  { %v6145_v32 = vpack.c.bf16 %v1199_v31, %v1198_v30  ;;  %v1205_v38 = vld [vmem:[#allocation3 + $0x8] sm:$0xff] }
 0xded   :  { %716 = vrot.lane.b32.xlu0 %v714_v39, %s5769_s30 }
 0xe5f   :  { %v717_v40 = vpop.permute.xlu0 %716 }
 0xe60   :  { %720 = vst.msk [vmem:[#allocation4 + $0x20] sm:$0xff] %vm177_vm0, %v717_v40  ;;  %4608 = vmatmul.mubr.msk.f32.vlgmr.msra.gmra.mrb[2].mxu1 %vm177_vm0, %v717_v40  ;;  %v1203_v40 = vld [vmem:[#allocation2 + $0x8] sm:$0xff] }
 0xe61   :  { %5046 = vmatpush3.bf16.msra.mxu1 %v6037_v5  ;;  %4629 = vmatprep.mubr.msk.f32.mxu1 %vm5766_vm1, %v5767_v1 }
 0xe62   :  { %5047 = vmatprep.subr.bf16.mxu1 %v5765_v0 }
 0xe65   :  { %5049 = vmatpush3.bf16.msra.mxu1 %v6040_v7 }
 0xe66   :  { %5058 = vmatprep.subr.bf16.mxu1 %v5765_v0 }
 0xe67   :  { %v1046_v6 = vld [vmem:[#allocation4 + $0x20] sm:$0xff] }
 0xf33   :  { %v791_v42 = vpop.f32.mrb[2].mxu1 }
 0xf34   :  { %v795_v43 = vadd.f32 %v791_v42, %v722_v41  ;;  %v4609_v44 = vpop.f32.mrb[3].mxu1 }
 0xf35   :  { %v6174_v44 = vld [vmem:[%s6637_s3] ss:$0 sm:$0xff] }
 0xf36   :  { %5306 = vtanh.f32 %v795_v43  ;;  %v4243_v46 = vmul.f32 -1.442695, %v795_v43 }
 0xf38   :  { %5308 = vpow2.f32 %v4243_v46 }
 0xf40   :  { %v5307_v45 = vpop.eup %5306 }
 0xf41   :  { %805 = vrot.lane.b32.xlu1 %v5307_v45, %s5768_s13 }
 0xf42   :  { %v5309_v5 = vpop.eup %5308 }
 0xf43   :  { %v799_v47 = vadd.f32 1.0, %v5309_v5 }
 0xf45   :  { %5310 = vrcp.f32 %v799_v47 }
 0xf4f   :  { %v5311_v48 = vpop.eup %5310 }
 0xf50   :  { %v803_v7 = vmul.f32 %v5311_v48, %v708_v36 }
 0xfb3   :  { %v806_v49 = vpop.permute.xlu1 %805 }
 0xfb4   :  { %v808_v50 = vmul.f32 %v5311_v48, %v806_v49 }
 0xfb6   :  { %810 = vrot.lane.b32.xlu0 %v808_v50, %s5769_s30 }
0x1028   :  { %v811_v51 = vpop.permute.xlu0 %810 }
0x1029   :  { %v813_v52 = vadd.f32 %v811_v51, %v803_v7 }
0x102b   :  { %5312 = vtanh.f32 %v813_v52 }
0x1035   :  { %v5313_v56 = vpop.eup %5312 }
0x1036   :  { %816 = vrot.lane.b32.xlu1 %v5313_v56, %s5768_s13  ;;  %v932_v56 = vld [vmem:[#allocation6 + $0x38] sm:$0xff] }
0x10a8   :  { %v817_v57 = vpop.permute.xlu1 %816 }
0x10a9   :  { %v819_v58 = vmul.f32 %v5311_v48, %v817_v57 }
0x10ab   :  { %821 = vrot.lane.b32.xlu0 %v819_v58, %s5769_s30 }
0x111d   :  { %v822_v62 = vpop.permute.xlu0 %821 }
0x111e   :  { %825 = vst.msk [vmem:[#allocation4 + $0x28] sm:$0xff] %vm177_vm0, %v822_v62  ;;  %4619 = vmatmul.mubr.msk.f32.vlgmr.msra.gmra.mrb[8].mxu0 %vm177_vm0, %v822_v62 }
0x111f   :  { %5053 = vmatpush3.bf16.msra.mxu0 %v5050_v55  ;;  %4640 = vmatprep.mubr.msk.f32.mxu0 %vm177_vm0, %v1042_v63 }
0x1120   :  { %5055 = vmatprep.subr.bf16.mxu0 %v5054_v61 }
0x1123   :  { %5057 = vmatpush3.bf16.msra.mxu0 %v5054_v61 }
0x1124   :  { %5070 = vmatprep.subr.bf16.mxu0 %v5765_v0 }
0x1125   :  { %v1047_v8 = vld [vmem:[#allocation4 + $0x28] sm:$0xff] }
0x1126   :  { %4641 = vmatmul.mubr.msk.f32.vlgmr.msra.gmra.mrb[10].mxu0 %vm177_vm0, %v1043_v2 }
0x1127   :  { %4643 = vmatprep.mubr.msk.f32.mxu0 %vm177_vm0, %v1044_v3  ;;  %5072 = vmatpush3.bf16.msra.mxu0 %v6145_v32 }
0x1128   :  { %5073 = vmatprep.subr.bf16.mxu0 %v5765_v0 }
0x112a   :  { %4644 = vmatmul.mubr.msk.f32.gmra.mrb[12].mxu0 %vm177_vm0, %v1045_v4 }
0x112b   :  { %4646 = vmatprep.mubr.msk.f32.mxu0 %vm177_vm0, %v1046_v6  ;;  %5075 = vmatpush3.bf16.msra.mxu0 %v6149_v35 }
0x112c   :  { %5082 = vmatprep.subr.bf16.mxu0 %v5765_v0 }
0x112e   :  { %4647 = vmatmul.mubr.msk.f32.gmra.mrb[14].mxu0 %vm177_vm0, %v1047_v8 }
0x11f1   :  { %v896_v10 = vpop.f32.mrb[8].mxu0 }
0x11f2   :  { %v900_v11 = vadd.f32 %v896_v10, %v827_v9  ;;  %v4620_v12 = vpop.f32.mrb[9].mxu0 }
0x11f4   :  { %5314 = vtanh.f32 %v900_v11  ;;  %v4245_v20 = vmul.f32 -1.442695, %v900_v11 }
0x11f6   :  { %5316 = vpow2.f32 %v4245_v20 }
0x11f9   :  { %v6129_v13 = vpop.f32.mrb[10].mxu0 }
0x11fa   :  { %v1151_v14 = vpop.f32.mrb[11].mxu0 }
0x11fb   :  { %v1152_v45 = vadd.f32 %v6174_v44, %v1151_v14 }
0x11fd   :  { %v6131_v15 = vpop.f32.mrb[12].mxu0 }
0x11fe   :  { %v5315_v16 = vpop.eup %5314  ;;  %v6133_v17 = vpop.f32.mrb[13].mxu0 }
0x11ff   :  { %910 = vrot.lane.b32.xlu1 %v5315_v16, %s5768_s13 }
0x1200   :  { %v5317_v21 = vpop.eup %5316 }
0x1201   :  { %v6136_v18 = vpop.f32.mrb[14].mxu0  ;;  %v904_v22 = vadd.f32 1.0, %v5317_v21 }
0x1202   :  { %v6138_v19 = vpop.f32.mrb[15].mxu0 }
0x1203   :  { %5318 = vrcp.f32 %v904_v22  ;;  %v1157_v22 = vadd.f32 %v6129_v13, %v6174_v44 }
0x120d   :  { %v5319_v23 = vpop.eup %5318 }
0x120e   :  { %v908_v26 = vmul.f32 %v5319_v23, %v813_v52 }
0x1271   :  { %v911_v24 = vpop.permute.xlu1 %910 }
0x1272   :  { %v913_v25 = vmul.f32 %v5319_v23, %v911_v24 }
0x1274   :  { %915 = vrot.lane.b32.xlu0 %v913_v25, %s5769_s30 }
0x12e6   :  { %v916_v27 = vpop.permute.xlu0 %915 }
0x12e7   :  { %v6141_v28 = vadd.f32 %v916_v27, %v908_v26 }
0x12e9   :  { %5320 = vtanh.f32 %v6141_v28 }
0x12f3   :  { %v5321_v29 = vpop.eup %5320 }
0x12f4   :  { %921 = vrot.lane.b32.xlu1 %v5321_v29, %s5768_s13 }
0x1366   :  { %v922_v36 = vpop.permute.xlu1 %921 }
0x1367   :  { %v924_v37 = vmul.f32 %v5319_v23, %v922_v36 }
0x1369   :  { %926 = vrot.lane.b32.xlu0 %v924_v37, %s5769_s30 }
0x136d   :  { %1289 = vrot.lane.b32.xlu0 %v1205_v38, %s5769_s30 }
0x13db   :  { %v927_v39 = vpop.permute.xlu0 %926 }
0x13dc   :  { %930 = vst.msk [vmem:[#allocation4 + $0x30] sm:$0xff] %vm177_vm0, %v927_v39  ;;  %4630 = vmatmul.mubr.msk.f32.vlgmr.msra.gmra.mrb[4].mxu1 %vm177_vm0, %v927_v39 }
0x13dd   :  { %5060 = vmatpush3.bf16.msra.mxu1 %v6145_v32  ;;  %4660 = vmatprep.mubr.msk.f32.mxu1 %vm5766_vm1, %v5767_v1 }
0x13de   :  { %5061 = vmatprep.subr.bf16.mxu1 %v5765_v0 }
0x13df   :  { %v1290_v54 = vpop.permute.xlu0 %1289 }
0x13e1   :  { %5063 = vmatpush3.bf16.msra.mxu1 %v6149_v35 }
0x13e2   :  { %5064 = vmatprep.subr.bf16.mxu1 %v5765_v0 }
0x13e3   :  { %v1048_v41 = vld [vmem:[#allocation4 + $0x30] sm:$0xff] }
0x13e4   :  { %4661 = vmatmul.mubr.msk.f32.vlgmr.msra.gmra.mrb[6].mxu1 %vm177_vm0, %v1203_v40  ;;  %4649 = vmatprep.mubr.msk.f32.mxu0 %vm177_vm0, %v1048_v41 }
0x13e5   :  { %5066 = vmatpush3.bf16.msra.mxu1 %v6145_v32  ;;  %4671 = vmatprep.mubr.msk.f32.mxu1 %vm5766_vm1, %v5767_v1 }
0x13e6   :  { %5067 = vmatprep.subr.bf16.mxu1 %v5765_v0 }
0x13e9   :  { %5069 = vmatpush3.bf16.msra.mxu1 %v6149_v35 }
0x13ea   :  { %5076 = vmatprep.subr.bf16.mxu1 %v5765_v0 }
0x14af   :  { %v1001_v42 = vpop.f32.mrb[4].mxu1 }
0x14b0   :  { %v4631_v43 = vpop.f32.mrb[5].mxu1  ;;  %v1005_v59 = vadd.f32 %v1001_v42, %v932_v56 }
0x14b2   :  { %v4247_v62 = vmul.f32 -1.442695, %v1005_v59 }
0x14b7   :  { %v1276_v46 = vpop.f32.mrb[6].mxu1 }
0x14b8   :  { %v1280_v5 = vadd.f32 %v1276_v46, %v1152_v45  ;;  %v4662_v47 = vpop.f32.mrb[7].mxu1  ;;  %v1162_v46 = vadd.f32 %v6174_v44, %v6133_v17 }
0x14ba   :  { %5322 = vtanh.f32 %v1280_v5  ;;  %v4258_v49 = vmul.f32 -1.442695, %v1280_v5 }
0x14bc   :  { %5324 = vpow2.f32 %v4258_v49 }
0x14c4   :  { %v5323_v48 = vpop.eup %5322 }
0x14c5   :  { %1294 = vrot.lane.b32.xlu1 %v5323_v48, %s5768_s13 }
0x14c6   :  { %v5325_v50 = vpop.eup %5324 }
0x14c7   :  { %v1284_v7 = vadd.f32 1.0, %v5325_v50 }
0x14c9   :  { %5326 = vrcp.f32 %v1284_v7 }
0x14d3   :  { %v5327_v51 = vpop.eup %5326 }
0x14d4   :  { %v1292_v55 = vmul.f32 %v5327_v51, %v1290_v54 }
0x1537   :  { %v1295_v52 = vpop.permute.xlu1 %1294 }
0x1538   :  { %v1297_v53 = vmul.f32 %v5327_v51, %v1295_v52 }
0x153a   :  { %1299 = vrot.lane.b32.xlu1 %v1297_v53, %s5769_s30 }
0x15ac   :  { %v1300_v57 = vpop.permute.xlu1 %1299 }
0x15ad   :  { %v1302_v58 = vadd.f32 %v1300_v57, %v1292_v55 }
0x15af   :  { %5328 = vtanh.f32 %v1302_v58 }
0x15b0   :  { %5330 = vtanh.f32 %v1005_v59 }
0x15b1   :  { %5332 = vpow2.f32 %v4247_v62 }
0x15b9   :  { %v5329_v60 = vpop.eup %5328 }
0x15ba   :  { %1305 = vrot.lane.b32.xlu0 %v5329_v60, %s5768_s13  ;;  %v5331_v61 = vpop.eup %5330 }
0x15bb   :  { %v5333_v63 = vpop.eup %5332 }
0x15bc   :  { %v1009_v2 = vadd.f32 1.0, %v5333_v63 }
0x15be   :  { %1015 = vrot.lane.b32.xlu0 %v5331_v61, %s5768_s13  ;;  %5334 = vrcp.f32 %v1009_v2  ;;  %v1167_v61 = vadd.f32 %v6131_v15, %v6174_v44 }
0x15c8   :  { %v5335_v6 = vpop.eup %5334 }
0x15c9   :  { %v1013_v11 = vmul.f32 %v5335_v6, %v6141_v28 }
0x162c   :  { %v1306_v3 = vpop.permute.xlu0 %1305 }
0x162d   :  { %v1308_v4 = vmul.f32 %v5327_v51, %v1306_v3 }
0x162f   :  { %1310 = vrot.lane.b32.xlu1 %v1308_v4, %s5769_s30 }
0x1630   :  { %v1016_v8 = vpop.permute.xlu0 %1015 }
0x1631   :  { %v1018_v9 = vmul.f32 %v5335_v6, %v1016_v8 }
0x1633   :  { %1020 = vrot.lane.b32.xlu0 %v1018_v9, %s5769_s30 }
0x16a1   :  { %v1311_v10 = vpop.permute.xlu1 %1310 }
0x16a2   :  { %1313 = vst.msk [vmem:[#allocation4] sm:$0xff] %vm177_vm0, %v1311_v10  ;;  %4672 = vmatmul.mubr.msk.f32.vlgmr.msra.gmra.mrb[8].mxu1 %vm177_vm0, %v1311_v10 }
0x16a3   :  { %5078 = vmatpush3.bf16.msra.mxu1 %v6145_v32  ;;  %4693 = vmatprep.mubr.msk.f32.mxu1 %vm5766_vm1, %v5767_v1 }
0x16a4   :  { %5079 = vmatprep.subr.bf16.mxu1 %v5765_v0 }
0x16a5   :  { %v1021_v12 = vpop.permute.xlu0 %1020 }
0x16a6   :  { %v6190_v14 = vadd.f32 %v1021_v12, %v1013_v11 }
0x16a7   :  { %5081 = vmatpush3.bf16.msra.mxu1 %v6149_v35 }
0x16a8   :  { %5336 = vtanh.f32 %v6190_v14  ;;  %5088 = vmatprep.subr.bf16.mxu1 %v5765_v0 }
0x16b2   :  { %v5337_v16 = vpop.eup %5336 }
0x16b3   :  { %1026 = vrot.lane.b32.xlu0 %v5337_v16, %s5768_s13 }
0x1725   :  { %v1027_v20 = vpop.permute.xlu0 %1026 }
0x1726   :  { %v1029_v21 = vmul.f32 %v5335_v6, %v1027_v20 }
0x1728   :  { %1031 = vrot.lane.b32.xlu0 %v1029_v21, %s5769_s30 }
0x1775   :  { %v1384_v23 = vpop.f32.mrb[8].mxu1 }
0x1776   :  { %v1388_v24 = vadd.f32 %v1384_v23, %v1157_v22  ;;  %v4673_v25 = vpop.f32.mrb[9].mxu1 }
0x1778   :  { %5338 = vtanh.f32 %v1388_v24  ;;  %v4260_v29 = vmul.f32 -1.442695, %v1388_v24  ;;  %v1172_v24 = vadd.f32 %v6174_v44, %v6138_v19 }
0x177a   :  { %5340 = vpow2.f32 %v4260_v29 }
0x1782   :  { %v5339_v26 = vpop.eup %5338 }
0x1783   :  { %1398 = vrot.lane.b32.xlu1 %v5339_v26, %s5768_s13 }
0x1784   :  { %v5341_v13 = vpop.eup %5340 }
0x1785   :  { %v1392_v30 = vadd.f32 1.0, %v5341_v13 }
0x1787   :  { %5342 = vrcp.f32 %v1392_v30 }
0x1791   :  { %v5343_v31 = vpop.eup %5342 }
0x1792   :  { %v1396_v36 = vmul.f32 %v5343_v31, %v1302_v58 }
0x179a   :  { %v1032_v27 = vpop.permute.xlu0 %1031 }
0x179b   :  { %1035 = vst.msk [vmem:[#allocation4 + $0x38] sm:$0xff] %vm177_vm0, %v1032_v27  ;;  %1036 = vst.msk [vmem:[#allocation2] sm:$0xff] %vm177_vm0, %v1032_v27 }
0x17a2   :  { %v1049_v28 = vld [vmem:[#allocation4 + $0x38] sm:$0xff] }
0x17a3   :  { %4650 = vmatmul.mubr.msk.f32.gmra.mrb[16].mxu0 %vm177_vm0, %v1049_v28 }
0x17a4   :  { %4682 = vmatprep.mubr.msk.f32.mxu0 %vm5766_vm1, %v5767_v1 }
0x17f5   :  { %v1399_v33 = vpop.permute.xlu1 %1398 }
0x17f6   :  { %v1401_v34 = vmul.f32 %v5343_v31, %v1399_v33 }
0x17f8   :  { %1403 = vrot.lane.b32.xlu1 %v1401_v34, %s5769_s30 }
0x186a   :  { %v1404_v37 = vpop.permute.xlu1 %1403 }
0x186b   :  { %v1406_v38 = vadd.f32 %v1404_v37, %v1396_v36 }
0x186d   :  { %5344 = vtanh.f32 %v1406_v38 }
0x1876   :  { %v6206_v39 = vpop.f32.mrb[16].mxu0 }
0x1877   :  { %v5345_v40 = vpop.eup %5344  ;;  %v6208_v41 = vpop.f32.mrb[17].mxu0 }
0x1878   :  { %1409 = vrot.lane.b32.xlu1 %v5345_v40, %s5768_s13 }
0x18ea   :  { %v1410_v42 = vpop.permute.xlu1 %1409 }
0x18eb   :  { %v1412_v43 = vmul.f32 %v5343_v31, %v1410_v42 }
0x18ed   :  { %1414 = vrot.lane.b32.xlu1 %v1412_v43, %s5769_s30 }
0x195f   :  { %v1415_v45 = vpop.permute.xlu1 %1414 }
0x1960   :  { %1417 = vst.msk [vmem:[#allocation4 + $0x8] sm:$0xff] %vm177_vm0, %v1415_v45  ;;  %4683 = vmatmul.mubr.msk.f32.vlgmr.msra.gmra.mrb[18].mxu0 %vm177_vm0, %v1415_v45  ;;  %v1177_v45 = vadd.f32 %v6136_v18, %v6174_v44 }
0x1961   :  { %5084 = vmatpush3.bf16.msra.mxu0 %v6145_v32  ;;  %4704 = vmatprep.mubr.msk.f32.mxu0 %vm5766_vm1, %v5767_v1 }
0x1962   :  { %5085 = vmatprep.subr.bf16.mxu0 %v5765_v0 }
0x1965   :  { %5087 = vmatpush3.bf16.msra.mxu0 %v6149_v35 }
0x1966   :  { %5094 = vmatprep.subr.bf16.mxu0 %v5765_v0 }
0x1a33   :  { %v1488_v5 = vpop.f32.mrb[18].mxu0 }
0x1a34   :  { %v1492_v47 = vadd.f32 %v1488_v5, %v1162_v46  ;;  %v4684_v48 = vpop.f32.mrb[19].mxu0 }
0x1a36   :  { %5346 = vtanh.f32 %v1492_v47  ;;  %v4262_v50 = vmul.f32 -1.442695, %v1492_v47 }
0x1a38   :  { %5348 = vpow2.f32 %v4262_v50 }
0x1a40   :  { %v5347_v49 = vpop.eup %5346 }
0x1a41   :  { %1502 = vrot.lane.b32.xlu0 %v5347_v49, %s5768_s13 }
0x1a42   :  { %v5349_v7 = vpop.eup %5348 }
0x1a43   :  { %v1496_v51 = vadd.f32 1.0, %v5349_v7 }
0x1a45   :  { %5350 = vrcp.f32 %v1496_v51 }
0x1a4f   :  { %v5351_v52 = vpop.eup %5350 }
0x1a50   :  { %v1500_v55 = vmul.f32 %v5351_v52, %v1406_v38 }
0x1ab3   :  { %v1503_v53 = vpop.permute.xlu0 %1502 }
0x1ab4   :  { %v1505_v54 = vmul.f32 %v5351_v52, %v1503_v53 }
0x1ab6   :  { %1507 = vrot.lane.b32.xlu1 %v1505_v54, %s5769_s30  ;;  %v2056_v54 = vld [vmem:[#allocation14] sm:$0xff] }
0x1b28   :  { %v1508_v56 = vpop.permute.xlu1 %1507 }
0x1b29   :  { %v1510_v17 = vadd.f32 %v1508_v56, %v1500_v55  ;;  %v2057_v55 = vld [vmem:[#allocation14 + $0x8] sm:$0xff] }
0x1b2a   :  { %v5106_v56 = vpack.c.bf16 %v2057_v55, %v2056_v54 }
0x1b2b   :  { %5352 = vtanh.f32 %v1510_v17 }
0x1b35   :  { %v5353_v57 = vpop.eup %5352 }
0x1b36   :  { %1513 = vrot.lane.b32.xlu0 %v5353_v57, %s5768_s13 }
0x1ba8   :  { %v1514_v58 = vpop.permute.xlu0 %1513 }
0x1ba9   :  { %v1516_v59 = vmul.f32 %v5351_v52, %v1514_v58 }
0x1bab   :  { %1518 = vrot.lane.b32.xlu1 %v1516_v59, %s5769_s30  ;;  %v2058_v59 = vld [vmem:[#allocation14 + $0x10] sm:$0xff] }
0x1c1d   :  { %v1519_v60 = vpop.permute.xlu1 %1518 }
0x1c1e   :  { %1521 = vst.msk [vmem:[#allocation4 + $0x10] sm:$0xff] %vm177_vm0, %v1519_v60  ;;  %4694 = vmatmul.mubr.msk.f32.vlgmr.msra.gmra.mrb[10].mxu1 %vm177_vm0, %v1519_v60  ;;  %v2059_v60 = vld [vmem:[#allocation14 + $0x18] sm:$0xff] }
0x1c1f   :  { %5090 = vmatpush3.bf16.msra.mxu1 %v6145_v32  ;;  %4715 = vmatprep.mubr.msk.f32.mxu1 %vm5766_vm1, %v5767_v1 }
0x1c20   :  { %5091 = vmatprep.subr.bf16.mxu1 %v5765_v0 }
0x1c23   :  { %5093 = vmatpush3.bf16.msra.mxu1 %v6149_v35 }
0x1c24   :  { %5100 = vmatprep.subr.bf16.mxu1 %v5765_v0 }
0x1cf1   :  { %v1592_v62 = vpop.f32.mrb[10].mxu1 }
0x1cf2   :  { %v1596_v63 = vadd.f32 %v1592_v62, %v1167_v61  ;;  %v4695_v2 = vpop.f32.mrb[11].mxu1  ;;  %v5110_v61 = vpack.c.bf16 %v2059_v60, %v2058_v59 }
0x1cf3   :  { %v2049_v2 = vld [vmem:[#allocation4 + $0x8] sm:$0xff] }
0x1cf4   :  { %5354 = vtanh.f32 %v1596_v63  ;;  %v4264_v4 = vmul.f32 -1.442695, %v1596_v63  ;;  %v2048_v63 = vld [vmem:[#allocation4] sm:$0xff] }
0x1cf6   :  { %5356 = vpow2.f32 %v4264_v4 }
0x1cfe   :  { %v5355_v3 = vpop.eup %5354 }
0x1cff   :  { %1606 = vrot.lane.b32.xlu0 %v5355_v3, %s5768_s13  ;;  %v2050_v3 = vld [vmem:[#allocation4 + $0x10] sm:$0xff] }
0x1d00   :  { %v5357_v6 = vpop.eup %5356 }
0x1d01   :  { %v1600_v8 = vadd.f32 1.0, %v5357_v6 }
0x1d03   :  { %5358 = vrcp.f32 %v1600_v8 }
0x1d0d   :  { %v5359_v9 = vpop.eup %5358 }
0x1d0e   :  { %v1604_v12 = vmul.f32 %v5359_v9, %v1510_v17 }
0x1d71   :  { %v1607_v10 = vpop.permute.xlu0 %1606 }
0x1d72   :  { %v1609_v11 = vmul.f32 %v5359_v9, %v1607_v10 }
0x1d74   :  { %1611 = vrot.lane.b32.xlu1 %v1609_v11, %s5769_s30 }
0x1de6   :  { %v1612_v16 = vpop.permute.xlu1 %1611 }
0x1de7   :  { %v1614_v15 = vadd.f32 %v1612_v16, %v1604_v12 }
0x1de9   :  { %5360 = vtanh.f32 %v1614_v15 }
0x1df3   :  { %v5361_v20 = vpop.eup %5360 }
0x1df4   :  { %1617 = vrot.lane.b32.xlu0 %v5361_v20, %s5768_s13 }
0x1e66   :  { %v1618_v21 = vpop.permute.xlu0 %1617 }
0x1e67   :  { %v1620_v22 = vmul.f32 %v5359_v9, %v1618_v21  ;;  %v1182_v9 = vadd.f32 %v6174_v44, %v6208_v41 }
0x1e69   :  { %1622 = vrot.lane.b32.xlu1 %v1620_v22, %s5769_s30 }
0x1edb   :  { %v1623_v23 = vpop.permute.xlu1 %1622 }
0x1edc   :  { %1625 = vst.msk [vmem:[#allocation4 + $0x18] sm:$0xff] %vm177_vm0, %v1623_v23  ;;  %4705 = vmatmul.mubr.msk.f32.vlgmr.msra.gmra.mrb[20].mxu0 %vm177_vm0, %v1623_v23 }
0x1edd   :  { %5096 = vmatpush3.bf16.msra.mxu0 %v6145_v32  ;;  %4726 = vmatprep.mubr.msk.f32.mxu0 %vm5766_vm1, %v5767_v1 }
0x1ede   :  { %5097 = vmatprep.subr.bf16.mxu0 %v5765_v0 }
0x1ee1   :  { %5099 = vmatpush3.bf16.msra.mxu0 %v6149_v35 }
0x1ee2   :  { %5107 = vmatprep.subr.bf16.mxu0 %v5106_v56 }
0x1ee3   :  { %v2051_v4 = vld [vmem:[#allocation4 + $0x18] sm:$0xff] }
0x1faf   :  { %v1696_v25 = vpop.f32.mrb[20].mxu0 }
0x1fb0   :  { %v1700_v26 = vadd.f32 %v1696_v25, %v1172_v24  ;;  %v4706_v27 = vpop.f32.mrb[21].mxu0 }
0x1fb2   :  { %5362 = vtanh.f32 %v1700_v26  ;;  %v4266_v29 = vmul.f32 -1.442695, %v1700_v26 }
0x1fb4   :  { %5364 = vpow2.f32 %v4266_v29 }
0x1fbc   :  { %v5363_v28 = vpop.eup %5362 }
0x1fbd   :  { %1710 = vrot.lane.b32.xlu0 %v5363_v28, %s5768_s13 }
0x1fbe   :  { %v5365_v13 = vpop.eup %5364 }
0x1fbf   :  { %v1704_v30 = vadd.f32 1.0, %v5365_v13 }
0x1fc1   :  { %5366 = vrcp.f32 %v1704_v30 }
0x1fcb   :  { %v5367_v31 = vpop.eup %5366 }
0x1fcc   :  { %v1708_v36 = vmul.f32 %v5367_v31, %v1614_v15 }
0x202f   :  { %v1711_v33 = vpop.permute.xlu0 %1710 }
0x2030   :  { %v1713_v34 = vmul.f32 %v5367_v31, %v1711_v33 }
0x2032   :  { %1715 = vrot.lane.b32.xlu1 %v1713_v34, %s5769_s30  ;;  %v2204_v34 = vld [vmem:[#allocation15] sm:$0xff] }
0x20a4   :  { %v1716_v37 = vpop.permute.xlu1 %1715 }
0x20a5   :  { %v1718_v19 = vadd.f32 %v1716_v37, %v1708_v36  ;;  %v2205_v36 = vld [vmem:[#allocation15 + $0x8] sm:$0xff] }
0x20a6   :  { %v6294_v37 = vpack.c.bf16 %v2205_v36, %v2204_v34 }
0x20a7   :  { %5368 = vtanh.f32 %v1718_v19 }
0x20b1   :  { %v5369_v38 = vpop.eup %5368 }
0x20b2   :  { %1721 = vrot.lane.b32.xlu0 %v5369_v38, %s5768_s13  ;;  %v2207_v38 = vld [vmem:[#allocation15 + $0x18] sm:$0xff] }
0x2124   :  { %v1722_v40 = vpop.permute.xlu0 %1721 }
0x2125   :  { %v1724_v42 = vmul.f32 %v5367_v31, %v1722_v40 }
0x2127   :  { %1726 = vrot.lane.b32.xlu1 %v1724_v42, %s5769_s30 }
0x2199   :  { %v1727_v43 = vpop.permute.xlu1 %1726 }
0x219a   :  { %1729 = vst.msk [vmem:[#allocation4 + $0x20] sm:$0xff] %vm177_vm0, %v1727_v43  ;;  %4716 = vmatmul.mubr.msk.f32.vlgmr.msra.gmra.mrb[12].mxu1 %vm177_vm0, %v1727_v43 }
0x219b   :  { %5102 = vmatpush3.bf16.msra.mxu1 %v6145_v32  ;;  %4737 = vmatprep.mubr.msk.f32.mxu1 %vm5766_vm1, %v5767_v1 }
0x219c   :  { %5103 = vmatprep.subr.bf16.mxu1 %v5765_v0 }
0x219f   :  { %5105 = vmatpush3.bf16.msra.mxu1 %v6149_v35 }
0x21a0   :  { %5114 = vmatprep.subr.bf16.mxu1 %v5765_v0 }
0x21a1   :  { %v2052_v6 = vld [vmem:[#allocation4 + $0x20] sm:$0xff] }
0x226d   :  { %v1800_v46 = vpop.f32.mrb[12].mxu1 }
0x226e   :  { %v1804_v5 = vadd.f32 %v1800_v46, %v1177_v45  ;;  %v4717_v47 = vpop.f32.mrb[13].mxu1  ;;  %v2211_v45 = vld [vmem:[#allocation3 + $0x10] sm:$0xff] }
0x2270   :  { %5370 = vtanh.f32 %v1804_v5  ;;  %v4268_v32 = vmul.f32 -1.442695, %v1804_v5  ;;  %v2209_v5 = vld [vmem:[#allocation2 + $0x10] sm:$0xff] }
0x2272   :  { %5372 = vpow2.f32 %v4268_v32 }
0x227a   :  { %v5371_v48 = vpop.eup %5370 }
0x227b   :  { %1814 = vrot.lane.b32.xlu0 %v5371_v48, %s5768_s13  ;;  %v1187_v48 = vadd.f32 %v6206_v39, %v6174_v44 }
0x227c   :  { %v5373_v49 = vpop.eup %5372 }
0x227d   :  { %v1808_v50 = vadd.f32 1.0, %v5373_v49 }
0x227f   :  { %5374 = vrcp.f32 %v1808_v50 }
0x2289   :  { %v5375_v7 = vpop.eup %5374 }
0x228a   :  { %v1812_v52 = vmul.f32 %v5375_v7, %v1718_v19  ;;  %v2206_v19 = vld [vmem:[#allocation15 + $0x10] sm:$0xff] }
0x228b   :  { %v6298_v40 = vpack.c.bf16 %v2207_v38, %v2206_v19 }
0x22ed   :  { %v1815_v51 = vpop.permute.xlu0 %1814 }
0x22ee   :  { %v1817_v35 = vmul.f32 %v5375_v7, %v1815_v51 }
0x22f0   :  { %1819 = vrot.lane.b32.xlu1 %v1817_v35, %s5769_s30 }
0x2362   :  { %v1820_v53 = vpop.permute.xlu1 %1819 }
0x2363   :  { %v1822_v18 = vadd.f32 %v1820_v53, %v1812_v52 }
0x2365   :  { %5376 = vtanh.f32 %v1822_v18 }
0x236f   :  { %v5377_v17 = vpop.eup %5376 }
0x2370   :  { %1825 = vrot.lane.b32.xlu0 %v5377_v17, %s5768_s13 }
0x23e2   :  { %v1826_v57 = vpop.permute.xlu0 %1825 }
0x23e3   :  { %v1828_v58 = vmul.f32 %v5375_v7, %v1826_v57  ;;  %v6325_v7 = vld [vmem:[%s6640_s6] ss:$0 sm:$0xff] }
0x23e5   :  { %1830 = vrot.lane.b32.xlu1 %v1828_v58, %s5769_s30 }
0x2457   :  { %v1831_v62 = vpop.permute.xlu1 %1830 }
0x2458   :  { %1833 = vst.msk [vmem:[#allocation4 + $0x28] sm:$0xff] %vm177_vm0, %v1831_v62  ;;  %4727 = vmatmul.mubr.msk.f32.vlgmr.msra.gmra.mrb[22].mxu0 %vm177_vm0, %v1831_v62 }
0x2459   :  { %5109 = vmatpush3.bf16.msra.mxu0 %v5106_v56  ;;  %4748 = vmatprep.mubr.msk.f32.mxu0 %vm177_vm0, %v2048_v63 }
0x245a   :  { %5111 = vmatprep.subr.bf16.mxu0 %v5110_v61 }
0x245d   :  { %5113 = vmatpush3.bf16.msra.mxu0 %v5110_v61 }
0x245e   :  { %5126 = vmatprep.subr.bf16.mxu0 %v5765_v0 }
0x245f   :  { %v2053_v8 = vld [vmem:[#allocation4 + $0x28] sm:$0xff] }
0x2460   :  { %4749 = vmatmul.mubr.msk.f32.vlgmr.msra.gmra.mrb[24].mxu0 %vm177_vm0, %v2049_v2 }
0x2461   :  { %4751 = vmatprep.mubr.msk.f32.mxu0 %vm177_vm0, %v2050_v3  ;;  %5128 = vmatpush3.bf16.msra.mxu0 %v6294_v37 }
0x2462   :  { %5129 = vmatprep.subr.bf16.mxu0 %v5765_v0 }
0x2464   :  { %4752 = vmatmul.mubr.msk.f32.gmra.mrb[26].mxu0 %vm177_vm0, %v2051_v4 }
0x2465   :  { %4754 = vmatprep.mubr.msk.f32.mxu0 %vm177_vm0, %v2052_v6  ;;  %5131 = vmatpush3.bf16.msra.mxu0 %v6298_v40 }
0x2466   :  { %5138 = vmatprep.subr.bf16.mxu0 %v5765_v0 }
0x2468   :  { %4755 = vmatmul.mubr.msk.f32.gmra.mrb[28].mxu0 %vm177_vm0, %v2053_v8 }
0x252b   :  { %v1904_v10 = vpop.f32.mrb[22].mxu0 }
0x252c   :  { %v1908_v11 = vadd.f32 %v1904_v10, %v1182_v9  ;;  %v4728_v12 = vpop.f32.mrb[23].mxu0 }
0x252e   :  { %5378 = vtanh.f32 %v1908_v11  ;;  %v4270_v25 = vmul.f32 -1.442695, %v1908_v11 }
0x2530   :  { %5380 = vpow2.f32 %v4270_v25 }
0x2533   :  { %v6278_v16 = vpop.f32.mrb[24].mxu0 }
0x2534   :  { %v2157_v15 = vpop.f32.mrb[25].mxu0 }
0x2535   :  { %v2158_v51 = vadd.f32 %v6325_v7, %v2157_v15 }
0x2537   :  { %v6280_v20 = vpop.f32.mrb[26].mxu0 }
0x2538   :  { %v5379_v21 = vpop.eup %5378  ;;  %v6282_v22 = vpop.f32.mrb[27].mxu0 }
0x2539   :  { %1918 = vrot.lane.b32.xlu0 %v5379_v21, %s5768_s13 }
0x253a   :  { %v5381_v41 = vpop.eup %5380 }
0x253b   :  { %v6285_v23 = vpop.f32.mrb[28].mxu0  ;;  %v1912_v26 = vadd.f32 1.0, %v5381_v41 }
0x253c   :  { %v6287_v24 = vpop.f32.mrb[29].mxu0 }
0x253d   :  { %5382 = vrcp.f32 %v1912_v26 }
0x2547   :  { %v5383_v27 = vpop.eup %5382 }
0x2548   :  { %v1916_v13 = vmul.f32 %v5383_v27, %v1822_v18 }
0x25ab   :  { %v1919_v28 = vpop.permute.xlu0 %1918 }
0x25ac   :  { %v1921_v29 = vmul.f32 %v5383_v27, %v1919_v28 }
0x25ae   :  { %1923 = vrot.lane.b32.xlu1 %v1921_v29, %s5769_s30 }
0x2620   :  { %v1924_v30 = vpop.permute.xlu1 %1923 }
0x2621   :  { %v6290_v31 = vadd.f32 %v1924_v30, %v1916_v13 }
0x2623   :  { %5384 = vtanh.f32 %v6290_v31 }
0x262d   :  { %v5385_v33 = vpop.eup %5384 }
0x262e   :  { %1929 = vrot.lane.b32.xlu0 %v5385_v33, %s5768_s13 }
0x26a0   :  { %v1930_v42 = vpop.permute.xlu0 %1929 }
0x26a1   :  { %v1932_v43 = vmul.f32 %v5383_v27, %v1930_v42  ;;  %v2163_v27 = vadd.f32 %v6278_v16, %v6325_v7 }
0x26a3   :  { %1934 = vrot.lane.b32.xlu1 %v1932_v43, %s5769_s30 }
0x26a7   :  { %2295 = vrot.lane.b32.xlu1 %v2211_v45, %s5769_s30 }
0x2715   :  { %v1935_v46 = vpop.permute.xlu1 %1934 }
0x2716   :  { %1937 = vst.msk [vmem:[#allocation4 + $0x30] sm:$0xff] %vm177_vm0, %v1935_v46  ;;  %4738 = vmatmul.mubr.msk.f32.vlgmr.msra.gmra.mrb[14].mxu1 %vm177_vm0, %v1935_v46 }
0x2717   :  { %5116 = vmatpush3.bf16.msra.mxu1 %v6294_v37  ;;  %4768 = vmatprep.mubr.msk.f32.mxu1 %vm5766_vm1, %v5767_v1 }
0x2718   :  { %5117 = vmatprep.subr.bf16.mxu1 %v5765_v0 }
0x2719   :  { %v2296_v57 = vpop.permute.xlu1 %2295 }
0x271b   :  { %5119 = vmatpush3.bf16.msra.mxu1 %v6298_v40 }
0x271c   :  { %5120 = vmatprep.subr.bf16.mxu1 %v5765_v0 }
0x271d   :  { %v2054_v47 = vld [vmem:[#allocation4 + $0x30] sm:$0xff] }
0x271e   :  { %4769 = vmatmul.mubr.msk.f32.vlgmr.msra.gmra.mrb[16].mxu1 %vm177_vm0, %v2209_v5  ;;  %4757 = vmatprep.mubr.msk.f32.mxu0 %vm177_vm0, %v2054_v47 }
0x271f   :  { %5122 = vmatpush3.bf16.msra.mxu1 %v6294_v37  ;;  %4779 = vmatprep.mubr.msk.f32.mxu1 %vm5766_vm1, %v5767_v1 }
0x2720   :  { %5123 = vmatprep.subr.bf16.mxu1 %v5765_v0 }
0x2723   :  { %5125 = vmatpush3.bf16.msra.mxu1 %v6298_v40 }
0x2724   :  { %5132 = vmatprep.subr.bf16.mxu1 %v5765_v0 }
0x27e9   :  { %v2008_v32 = vpop.f32.mrb[14].mxu1 }
0x27ea   :  { %v2012_v49 = vadd.f32 %v2008_v32, %v1187_v48  ;;  %v4739_v50 = vpop.f32.mrb[15].mxu1 }
0x27ec   :  { %v4272_v63 = vmul.f32 -1.442695, %v2012_v49 }
0x27f1   :  { %v2282_v35 = vpop.f32.mrb[16].mxu1 }
0x27f2   :  { %v2286_v52 = vadd.f32 %v2282_v35, %v2158_v51  ;;  %v4770_v53 = vpop.f32.mrb[17].mxu1  ;;  %v2168_v51 = vadd.f32 %v6325_v7, %v6282_v22 }
0x27f4   :  { %5386 = vtanh.f32 %v2286_v52  ;;  %v4283_v54 = vmul.f32 -1.442695, %v2286_v52 }
0x27f6   :  { %5388 = vpow2.f32 %v4283_v54 }
0x27fe   :  { %v5387_v18 = vpop.eup %5386 }
0x27ff   :  { %2300 = vrot.lane.b32.xlu0 %v5387_v18, %s5768_s13 }
0x2800   :  { %v5389_v44 = vpop.eup %5388 }
0x2801   :  { %v2290_v39 = vadd.f32 1.0, %v5389_v44 }
0x2803   :  { %5390 = vrcp.f32 %v2290_v39 }
0x280d   :  { %v5391_v55 = vpop.eup %5390 }
0x280e   :  { %v2298_v58 = vmul.f32 %v5391_v55, %v2296_v57 }
0x2871   :  { %v2301_v56 = vpop.permute.xlu0 %2300 }
0x2872   :  { %v2303_v17 = vmul.f32 %v5391_v55, %v2301_v56 }
0x2874   :  { %2305 = vrot.lane.b32.xlu0 %v2303_v17, %s5769_s30 }
0x28e6   :  { %v2306_v59 = vpop.permute.xlu0 %2305 }
0x28e7   :  { %v2308_v60 = vadd.f32 %v2306_v59, %v2298_v58 }
0x28e9   :  { %5392 = vtanh.f32 %v2308_v60 }
0x28ea   :  { %5394 = vtanh.f32 %v2012_v49 }
0x28eb   :  { %5396 = vpow2.f32 %v4272_v63  ;;  %v2173_v63 = vadd.f32 %v6280_v20, %v6325_v7 }
0x28f3   :  { %v5393_v61 = vpop.eup %5392 }
0x28f4   :  { %2311 = vrot.lane.b32.xlu1 %v5393_v61, %s5768_s13  ;;  %v5395_v62 = vpop.eup %5394 }
0x28f5   :  { %v5397_v2 = vpop.eup %5396 }
0x28f6   :  { %v2016_v3 = vadd.f32 1.0, %v5397_v2 }
0x28f8   :  { %2022 = vrot.lane.b32.xlu1 %v5395_v62, %s5768_s13  ;;  %5398 = vrcp.f32 %v2016_v3 }
0x2902   :  { %v5399_v8 = vpop.eup %5398 }
0x2903   :  { %v2020_v12 = vmul.f32 %v5399_v8, %v6290_v31 }
0x2966   :  { %v2312_v4 = vpop.permute.xlu1 %2311 }
0x2967   :  { %v2314_v6 = vmul.f32 %v5391_v55, %v2312_v4 }
0x2969   :  { %2316 = vrot.lane.b32.xlu0 %v2314_v6, %s5769_s30 }
0x296a   :  { %v2023_v9 = vpop.permute.xlu1 %2022 }
0x296b   :  { %v2025_v10 = vmul.f32 %v5399_v8, %v2023_v9 }
0x296d   :  { %2027 = vrot.lane.b32.xlu1 %v2025_v10, %s5769_s30 }
0x29db   :  { %v2317_v11 = vpop.permute.xlu0 %2316 }
0x29dc   :  { %2319 = vst.msk [vmem:[#allocation4] sm:$0xff] %vm177_vm0, %v2317_v11  ;;  %4780 = vmatmul.mubr.msk.f32.vlgmr.msra.gmra.mrb[18].mxu1 %vm177_vm0, %v2317_v11 }
0x29dd   :  { %5134 = vmatpush3.bf16.msra.mxu1 %v6294_v37  ;;  %4801 = vmatprep.mubr.msk.f32.mxu1 %vm5766_vm1, %v5767_v1 }
0x29de   :  { %5135 = vmatprep.subr.bf16.mxu1 %v5765_v0 }
0x29df   :  { %v2028_v15 = vpop.permute.xlu1 %2027 }
0x29e0   :  { %v6341_v21 = vadd.f32 %v2028_v15, %v2020_v12 }
0x29e1   :  { %5137 = vmatpush3.bf16.msra.mxu1 %v6298_v40 }
0x29e2   :  { %5400 = vtanh.f32 %v6341_v21  ;;  %5144 = vmatprep.subr.bf16.mxu1 %v5765_v0 }
0x29ec   :  { %v5401_v25 = vpop.eup %5400 }
0x29ed   :  { %2033 = vrot.lane.b32.xlu1 %v5401_v25, %s5768_s13 }
0x2a5f   :  { %v2034_v41 = vpop.permute.xlu1 %2033 }
0x2a60   :  { %v2036_v26 = vmul.f32 %v5399_v8, %v2034_v41 }
0x2a62   :  { %2038 = vrot.lane.b32.xlu1 %v2036_v26, %s5769_s30 }
0x2aaf   :  { %v2389_v28 = vpop.f32.mrb[18].mxu1 }
0x2ab0   :  { %v2393_v29 = vadd.f32 %v2389_v28, %v2163_v27  ;;  %v4781_v13 = vpop.f32.mrb[19].mxu1 }
0x2ab1   :  { %v2178_v13 = vadd.f32 %v6325_v7, %v6287_v24 }
0x2ab2   :  { %5402 = vtanh.f32 %v2393_v29  ;;  %v4285_v34 = vmul.f32 -1.442695, %v2393_v29 }
0x2ab4   :  { %5404 = vpow2.f32 %v4285_v34 }
0x2abc   :  { %v5403_v30 = vpop.eup %5402 }
0x2abd   :  { %2403 = vrot.lane.b32.xlu0 %v5403_v30, %s5768_s13 }
0x2abe   :  { %v5405_v16 = vpop.eup %5404 }
0x2abf   :  { %v2397_v36 = vadd.f32 1.0, %v5405_v16 }
0x2ac1   :  { %5406 = vrcp.f32 %v2397_v36 }
0x2acb   :  { %v5407_v19 = vpop.eup %5406 }
0x2acc   :  { %v2401_v43 = vmul.f32 %v5407_v19, %v2308_v60 }
0x2ad4   :  { %v2039_v31 = vpop.permute.xlu1 %2038 }
0x2ad5   :  { %2041 = vst.msk [vmem:[#allocation4 + $0x38] sm:$0xff] %vm177_vm0, %v2039_v31  ;;  %2042 = vst.msk [vmem:[#allocation2 + $0x8] sm:$0xff] %vm177_vm0, %v2039_v31 }
0x2adc   :  { %v2055_v33 = vld [vmem:[#allocation4 + $0x38] sm:$0xff] }
0x2add   :  { %4758 = vmatmul.mubr.msk.f32.gmra.mrb[30].mxu0 %vm177_vm0, %v2055_v33 }
0x2ade   :  { %4790 = vmatprep.mubr.msk.f32.mxu0 %vm5766_vm1, %v5767_v1 }
0x2b2f   :  { %v2404_v38 = vpop.permute.xlu0 %2403 }
0x2b30   :  { %v2406_v42 = vmul.f32 %v5407_v19, %v2404_v38 }
0x2b32   :  { %2408 = vrot.lane.b32.xlu0 %v2406_v42, %s5769_s30 }
0x2ba4   :  { %v2409_v45 = vpop.permute.xlu0 %2408 }
0x2ba5   :  { %v2411_v46 = vadd.f32 %v2409_v45, %v2401_v43 }
0x2ba7   :  { %5408 = vtanh.f32 %v2411_v46 }
0x2bb0   :  { %v6357_v5 = vpop.f32.mrb[30].mxu0 }
0x2bb1   :  { %v5409_v47 = vpop.eup %5408  ;;  %v6359_v48 = vpop.f32.mrb[31].mxu0 }
0x2bb2   :  { %2414 = vrot.lane.b32.xlu0 %v5409_v47, %s5768_s13 }
0x2c24   :  { %v2415_v32 = vpop.permute.xlu0 %2414 }
0x2c25   :  { %v2417_v49 = vmul.f32 %v5407_v19, %v2415_v32 }
0x2c27   :  { %2419 = vrot.lane.b32.xlu0 %v2417_v49, %s5769_s30 }
0x2c99   :  { %v2420_v50 = vpop.permute.xlu0 %2419 }
0x2c9a   :  { %2422 = vst.msk [vmem:[#allocation4 + $0x8] sm:$0xff] %vm177_vm0, %v2420_v50  ;;  %4791 = vmatmul.mubr.msk.f32.vlgmr.msra.gmra.mrb[32].mxu0 %vm177_vm0, %v2420_v50 }
0x2c9b   :  { %5140 = vmatpush3.bf16.msra.mxu0 %v6294_v37  ;;  %4812 = vmatprep.mubr.msk.f32.mxu0 %vm5766_vm1, %v5767_v1 }
0x2c9c   :  { %5141 = vmatprep.subr.bf16.mxu0 %v5765_v0 }
0x2c9f   :  { %5143 = vmatpush3.bf16.msra.mxu0 %v6298_v40 }
0x2ca0   :  { %5150 = vmatprep.subr.bf16.mxu0 %v5765_v0 }
0x2d6d   :  { %v2492_v35 = vpop.f32.mrb[32].mxu0 }
0x2d6e   :  { %v2496_v52 = vadd.f32 %v2492_v35, %v2168_v51  ;;  %v4792_v53 = vpop.f32.mrb[33].mxu0  ;;  %v2183_v51 = vadd.f32 %v6285_v23, %v6325_v7 }
0x2d70   :  { %5410 = vtanh.f32 %v2496_v52  ;;  %v4287_v54 = vmul.f32 -1.442695, %v2496_v52 }
0x2d72   :  { %5412 = vpow2.f32 %v4287_v54 }
0x2d7a   :  { %v5411_v18 = vpop.eup %5410 }
0x2d7b   :  { %2506 = vrot.lane.b32.xlu1 %v5411_v18, %s5768_s13 }
0x2d7c   :  { %v5413_v44 = vpop.eup %5412 }
0x2d7d   :  { %v2500_v39 = vadd.f32 1.0, %v5413_v44 }
0x2d7f   :  { %5414 = vrcp.f32 %v2500_v39 }
0x2d89   :  { %v5415_v55 = vpop.eup %5414 }
0x2d8a   :  { %v2504_v57 = vmul.f32 %v5415_v55, %v2411_v46 }
0x2ded   :  { %v2507_v56 = vpop.permute.xlu1 %2506 }
0x2dee   :  { %v2509_v17 = vmul.f32 %v5415_v55, %v2507_v56 }
0x2df0   :  { %2511 = vrot.lane.b32.xlu0 %v2509_v17, %s5769_s30 }
0x2e62   :  { %v2512_v58 = vpop.permute.xlu0 %2511 }
0x2e63   :  { %v2514_v22 = vadd.f32 %v2512_v58, %v2504_v57  ;;  %v3055_v57 = vld [vmem:[#allocation17] sm:$0xff]  ;;  %v3056_v58 = vld [vmem:[#allocation17 + $0x8] sm:$0xff] }
0x2e65   :  { %5416 = vtanh.f32 %v2514_v22 }
0x2e6f   :  { %v5417_v59 = vpop.eup %5416 }
0x2e70   :  { %2517 = vrot.lane.b32.xlu1 %v5417_v59, %s5768_s13 }
0x2ee2   :  { %v2518_v60 = vpop.permute.xlu1 %2517 }
0x2ee3   :  { %v2520_v61 = vmul.f32 %v5415_v55, %v2518_v60 }
0x2ee5   :  { %2522 = vrot.lane.b32.xlu0 %v2520_v61, %s5769_s30 }
0x2f57   :  { %v2523_v62 = vpop.permute.xlu0 %2522 }
0x2f58   :  { %2525 = vst.msk [vmem:[#allocation4 + $0x10] sm:$0xff] %vm177_vm0, %v2523_v62  ;;  %4802 = vmatmul.mubr.msk.f32.vlgmr.msra.gmra.mrb[20].mxu1 %vm177_vm0, %v2523_v62  ;;  %v3057_v62 = vld [vmem:[#allocation17 + $0x10] sm:$0xff] }
0x2f59   :  { %5146 = vmatpush3.bf16.msra.mxu1 %v6294_v37  ;;  %4823 = vmatprep.mubr.msk.f32.mxu1 %vm5766_vm1, %v5767_v1 }
0x2f5a   :  { %5147 = vmatprep.subr.bf16.mxu1 %v5765_v0 }
0x2f5d   :  { %5149 = vmatpush3.bf16.msra.mxu1 %v6298_v40 }
0x2f5e   :  { %5156 = vmatprep.subr.bf16.mxu1 %v5765_v0 }
0x302b   :  { %v2595_v2 = vpop.f32.mrb[20].mxu1 }
0x302c   :  { %v2599_v3 = vadd.f32 %v2595_v2, %v2173_v63  ;;  %v4803_v4 = vpop.f32.mrb[21].mxu1  ;;  %v3058_v63 = vld [vmem:[#allocation17 + $0x18] sm:$0xff] }
0x302d   :  { %v5166_v2 = vpack.c.bf16 %v3058_v63, %v3057_v62  ;;  %v3047_v4 = vld [vmem:[#allocation4] sm:$0xff] }
0x302e   :  { %5418 = vtanh.f32 %v2599_v3  ;;  %v4289_v8 = vmul.f32 -1.442695, %v2599_v3 }
0x3030   :  { %5420 = vpow2.f32 %v4289_v8  ;;  %v3049_v8 = vld [vmem:[#allocation4 + $0x10] sm:$0xff] }
0x3038   :  { %v5419_v6 = vpop.eup %5418 }
0x3039   :  { %2609 = vrot.lane.b32.xlu1 %v5419_v6, %s5768_s13  ;;  %v3048_v6 = vld [vmem:[#allocation4 + $0x8] sm:$0xff] }
0x303a   :  { %v5421_v9 = vpop.eup %5420 }
0x303b   :  { %v2603_v10 = vadd.f32 1.0, %v5421_v9 }
0x303d   :  { %5422 = vrcp.f32 %v2603_v10 }
0x3047   :  { %v5423_v11 = vpop.eup %5422 }
0x3048   :  { %v2607_v25 = vmul.f32 %v5423_v11, %v2514_v22  ;;  %v5162_v22 = vpack.c.bf16 %v3056_v58, %v3055_v57 }
0x30ab   :  { %v2610_v12 = vpop.permute.xlu1 %2609 }
0x30ac   :  { %v2612_v15 = vmul.f32 %v5423_v11, %v2610_v12  ;;  %v2188_v12 = vadd.f32 %v6325_v7, %v6359_v48 }
0x30ae   :  { %2614 = vrot.lane.b32.xlu0 %v2612_v15, %s5769_s30 }
0x3120   :  { %v2615_v41 = vpop.permute.xlu0 %2614 }
0x3121   :  { %v2617_v20 = vadd.f32 %v2615_v41, %v2607_v25 }
0x3123   :  { %5424 = vtanh.f32 %v2617_v20 }
0x312d   :  { %v5425_v26 = vpop.eup %5424 }
0x312e   :  { %2620 = vrot.lane.b32.xlu1 %v5425_v26, %s5768_s13 }
0x31a0   :  { %v2621_v27 = vpop.permute.xlu1 %2620 }
0x31a1   :  { %v2623_v28 = vmul.f32 %v5423_v11, %v2621_v27 }
0x31a3   :  { %2625 = vrot.lane.b32.xlu0 %v2623_v28, %s5769_s30 }
0x3215   :  { %v2626_v29 = vpop.permute.xlu0 %2625 }
0x3216   :  { %2628 = vst.msk [vmem:[#allocation4 + $0x18] sm:$0xff] %vm177_vm0, %v2626_v29  ;;  %4813 = vmatmul.mubr.msk.f32.vlgmr.msra.gmra.mrb[34].mxu0 %vm177_vm0, %v2626_v29 }
0x3217   :  { %5152 = vmatpush3.bf16.msra.mxu0 %v6294_v37  ;;  %4834 = vmatprep.mubr.msk.f32.mxu0 %vm5766_vm1, %v5767_v1 }
0x3218   :  { %5153 = vmatprep.subr.bf16.mxu0 %v5765_v0 }
0x321b   :  { %5155 = vmatpush3.bf16.msra.mxu0 %v6298_v40 }
0x321c   :  { %5163 = vmatprep.subr.bf16.mxu0 %v5162_v22 }
0x321d   :  { %v3050_v9 = vld [vmem:[#allocation4 + $0x18] sm:$0xff] }
0x32e9   :  { %v2698_v30 = vpop.f32.mrb[34].mxu0 }
0x32ea   :  { %v2702_v31 = vadd.f32 %v2698_v30, %v2178_v13  ;;  %v4814_v33 = vpop.f32.mrb[35].mxu0 }
0x32ec   :  { %5426 = vtanh.f32 %v2702_v31  ;;  %v4291_v16 = vmul.f32 -1.442695, %v2702_v31 }
0x32ee   :  { %5428 = vpow2.f32 %v4291_v16 }
0x32f6   :  { %v5427_v34 = vpop.eup %5426 }
0x32f7   :  { %2712 = vrot.lane.b32.xlu1 %v5427_v34, %s5768_s13 }
0x32f8   :  { %v5429_v36 = vpop.eup %5428 }
0x32f9   :  { %v2706_v19 = vadd.f32 1.0, %v5429_v36 }
0x32fb   :  { %5430 = vrcp.f32 %v2706_v19 }
0x3305   :  { %v5431_v38 = vpop.eup %5430 }
0x3306   :  { %v2710_v45 = vmul.f32 %v5431_v38, %v2617_v20 }
0x3369   :  { %v2713_v42 = vpop.permute.xlu1 %2712 }
0x336a   :  { %v2715_v43 = vmul.f32 %v5431_v38, %v2713_v42 }
0x336c   :  { %2717 = vrot.lane.b32.xlu0 %v2715_v43, %s5769_s30 }
0x33de   :  { %v2718_v46 = vpop.permute.xlu0 %2717 }
0x33df   :  { %v2720_v24 = vadd.f32 %v2718_v46, %v2710_v45  ;;  %v3203_v45 = vld [vmem:[%s6644_s10] sm:$0xff]  ;;  %v3204_v46 = vld [vmem:[%s6644_s10 + $0x8] sm:$0xff] }
0x33e1   :  { %5432 = vtanh.f32 %v2720_v24 }
0x33eb   :  { %v5433_v47 = vpop.eup %5432 }
0x33ec   :  { %2723 = vrot.lane.b32.xlu1 %v5433_v47, %s5768_s13  ;;  %v3205_v47 = vld [vmem:[%s6644_s10 + $0x10] sm:$0xff] }
0x345e   :  { %v2724_v32 = vpop.permute.xlu1 %2723 }
0x345f   :  { %v2726_v49 = vmul.f32 %v5431_v38, %v2724_v32  ;;  %v3206_v32 = vld [vmem:[%s6644_s10 + $0x18] sm:$0xff] }
0x3461   :  { %2728 = vrot.lane.b32.xlu0 %v2726_v49, %s5769_s30  ;;  %v6461_v49 = vpack.c.bf16 %v3206_v32, %v3205_v47 }
0x34d3   :  { %v2729_v50 = vpop.permute.xlu0 %2728 }
0x34d4   :  { %2731 = vst.msk [vmem:[#allocation4 + $0x20] sm:$0xff] %vm177_vm0, %v2729_v50  ;;  %4824 = vmatmul.mubr.msk.f32.vlgmr.msra.gmra.mrb[22].mxu1 %vm177_vm0, %v2729_v50 }
0x34d5   :  { %5158 = vmatpush3.bf16.msra.mxu1 %v6294_v37  ;;  %4845 = vmatprep.mubr.msk.f32.mxu1 %vm5766_vm1, %v5767_v1 }
0x34d6   :  { %5159 = vmatprep.subr.bf16.mxu1 %v5765_v0 }
0x34d9   :  { %5161 = vmatpush3.bf16.msra.mxu1 %v6298_v40 }
0x34da   :  { %5170 = vmatprep.subr.bf16.mxu1 %v5765_v0 }
0x34db   :  { %v3051_v10 = vld [vmem:[#allocation4 + $0x20] sm:$0xff] }
0x35a7   :  { %v2801_v35 = vpop.f32.mrb[22].mxu1 }
0x35a8   :  { %v2805_v52 = vadd.f32 %v2801_v35, %v2183_v51  ;;  %v4825_v53 = vpop.f32.mrb[23].mxu1  ;;  %v3210_v35 = vld [vmem:[#allocation3 + $0x18] sm:$0xff] }
0x35a9   :  { %v3208_v53 = vld [vmem:[#allocation2 + $0x18] sm:$0xff] }
0x35aa   :  { %5434 = vtanh.f32 %v2805_v52  ;;  %v4293_v37 = vmul.f32 -1.442695, %v2805_v52 }
0x35ac   :  { %5436 = vpow2.f32 %v4293_v37  ;;  %v2193_v37 = vadd.f32 %v6357_v5, %v6325_v7 }
0x35b4   :  { %v5435_v18 = vpop.eup %5434 }
0x35b5   :  { %2815 = vrot.lane.b32.xlu1 %v5435_v18, %s5768_s13 }
0x35b6   :  { %v5437_v54 = vpop.eup %5436 }
0x35b7   :  { %v2809_v44 = vadd.f32 1.0, %v5437_v54 }
0x35b9   :  { %5438 = vrcp.f32 %v2809_v44 }
0x35c3   :  { %v5439_v39 = vpop.eup %5438 }
0x35c4   :  { %v2813_v56 = vmul.f32 %v5439_v39, %v2720_v24  ;;  %v6451_v24 = vpack.c.bf16 %v3204_v46, %v3203_v45 }
0x3627   :  { %v2816_v55 = vpop.permute.xlu1 %2815 }
0x3628   :  { %v2818_v40 = vmul.f32 %v5439_v39, %v2816_v55  ;;  %v6488_v55 = vld [vmem:[%s6643_s9] ss:$0 sm:$0xff]  ;;  %s5770_s9 = smov 96  }
0x362a   :  { %2820 = vrot.lane.b32.xlu0 %v2818_v40, %s5769_s30 }
0x369c   :  { %v2821_v17 = vpop.permute.xlu0 %2820 }
0x369d   :  { %v2823_v23 = vadd.f32 %v2821_v17, %v2813_v56 }
0x369f   :  { %5440 = vtanh.f32 %v2823_v23 }
0x36a9   :  { %v5441_v59 = vpop.eup %5440 }
0x36aa   :  { %2826 = vrot.lane.b32.xlu1 %v5441_v59, %s5768_s13 }
0x371c   :  { %v2827_v60 = vpop.permute.xlu1 %2826 }
0x371d   :  { %v2829_v61 = vmul.f32 %v5439_v39, %v2827_v60 }
0x371f   :  { %2831 = vrot.lane.b32.xlu0 %v2829_v61, %s5769_s30 }
0x3791   :  { %v2832_v3 = vpop.permute.xlu0 %2831 }
0x3792   :  { %2834 = vst.msk [vmem:[#allocation4 + $0x28] sm:$0xff] %vm177_vm0, %v2832_v3  ;;  %4835 = vmatmul.mubr.msk.f32.vlgmr.msra.gmra.mrb[36].mxu0 %vm177_vm0, %v2832_v3 }
0x3793   :  { %5165 = vmatpush3.bf16.msra.mxu0 %v5162_v22  ;;  %4856 = vmatprep.mubr.msk.f32.mxu0 %vm177_vm0, %v3047_v4 }
0x3794   :  { %5167 = vmatprep.subr.bf16.mxu0 %v5166_v2 }
0x3797   :  { %5169 = vmatpush3.bf16.msra.mxu0 %v5166_v2 }
0x3798   :  { %5182 = vmatprep.subr.bf16.mxu0 %v5765_v0 }
0x3799   :  { %v3052_v11 = vld [vmem:[#allocation4 + $0x28] sm:$0xff] }
0x379a   :  { %4857 = vmatmul.mubr.msk.f32.vlgmr.msra.gmra.mrb[38].mxu0 %vm177_vm0, %v3048_v6 }
0x379b   :  { %4859 = vmatprep.mubr.msk.f32.mxu0 %vm177_vm0, %v3049_v8  ;;  %5184 = vmatpush3.bf16.msra.mxu0 %v6451_v24 }
0x379c   :  { %5185 = vmatprep.subr.bf16.mxu0 %v5765_v0 }
0x379e   :  { %4860 = vmatmul.mubr.msk.f32.gmra.mrb[40].mxu0 %vm177_vm0, %v3050_v9 }
0x379f   :  { %4862 = vmatprep.mubr.msk.f32.mxu0 %vm177_vm0, %v3051_v10  ;;  %5187 = vmatpush3.bf16.msra.mxu0 %v6461_v49 }
0x37a0   :  { %5194 = vmatprep.subr.bf16.mxu0 %v5765_v0 }
0x37a2   :  { %4863 = vmatmul.mubr.msk.f32.gmra.mrb[42].mxu0 %vm177_vm0, %v3052_v11 }
0x3865   :  { %v2904_v15 = vpop.f32.mrb[36].mxu0 }
0x3866   :  { %v2908_v25 = vadd.f32 %v2904_v15, %v2188_v12  ;;  %v4836_v41 = vpop.f32.mrb[37].mxu0 }
0x3868   :  { %5442 = vtanh.f32 %v2908_v25  ;;  %v4295_v31 = vmul.f32 -1.442695, %v2908_v25 }
0x386a   :  { %5444 = vpow2.f32 %v4295_v31 }
0x386d   :  { %v6429_v20 = vpop.f32.mrb[38].mxu0 }
0x386e   :  { %v3156_v26 = vpop.f32.mrb[39].mxu0 }
0x386f   :  { %v3157_v40 = vadd.f32 %v6488_v55, %v3156_v26 }
0x3871   :  { %v6431_v27 = vpop.f32.mrb[40].mxu0 }
0x3872   :  { %v5443_v28 = vpop.eup %5442  ;;  %v6433_v29 = vpop.f32.mrb[41].mxu0 }
0x3873   :  { %2918 = vrot.lane.b32.xlu1 %v5443_v28, %s5768_s13 }
0x3874   :  { %v5445_v48 = vpop.eup %5444 }
0x3875   :  { %v6436_v13 = vpop.f32.mrb[42].mxu0  ;;  %v2912_v33 = vadd.f32 1.0, %v5445_v48 }
0x3876   :  { %v6438_v30 = vpop.f32.mrb[43].mxu0 }
0x3877   :  { %5446 = vrcp.f32 %v2912_v33 }
0x3881   :  { %v5447_v34 = vpop.eup %5446 }
0x3882   :  { %v2916_v19 = vmul.f32 %v5447_v34, %v2823_v23 }
0x38e5   :  { %v2919_v16 = vpop.permute.xlu1 %2918 }
0x38e6   :  { %v2921_v36 = vmul.f32 %v5447_v34, %v2919_v16  ;;  %v3162_v16 = vadd.f32 %v6429_v20, %v6488_v55 }
0x38e8   :  { %2923 = vrot.lane.b32.xlu0 %v2921_v36, %s5769_s30 }
0x395a   :  { %v2924_v38 = vpop.permute.xlu0 %2923 }
0x395b   :  { %v6441_v42 = vadd.f32 %v2924_v38, %v2916_v19 }
0x395d   :  { %5448 = vtanh.f32 %v6441_v42 }
0x3967   :  { %v5449_v43 = vpop.eup %5448 }
0x3968   :  { %2929 = vrot.lane.b32.xlu1 %v5449_v43, %s5768_s13 }
0x39da   :  { %v2930_v50 = vpop.permute.xlu1 %2929 }
0x39db   :  { %v2932_v51 = vmul.f32 %v5447_v34, %v2930_v50 }
0x39dd   :  { %2934 = vrot.lane.b32.xlu0 %v2932_v51, %s5769_s30 }
0x39e1   :  { %3294 = vrot.lane.b32.xlu0 %v3210_v35, %s5769_s30 }
0x3a4f   :  { %v2935_v52 = vpop.permute.xlu0 %2934 }
0x3a50   :  { %2937 = vst.msk [vmem:[#allocation4 + $0x30] sm:$0xff] %vm177_vm0, %v2935_v52  ;;  %4846 = vmatmul.mubr.msk.f32.vlgmr.msra.gmra.mrb[24].mxu1 %vm177_vm0, %v2935_v52 }
0x3a51   :  { %5172 = vmatpush3.bf16.msra.mxu1 %v6451_v24  ;;  %4876 = vmatprep.mubr.msk.f32.mxu1 %vm5766_vm1, %v5767_v1 }
0x3a52   :  { %5173 = vmatprep.subr.bf16.mxu1 %v5765_v0 }
0x3a53   :  { %v3295_v61 = vpop.permute.xlu0 %3294 }
0x3a55   :  { %5175 = vmatpush3.bf16.msra.mxu1 %v6461_v49 }
0x3a56   :  { %5176 = vmatprep.subr.bf16.mxu1 %v5765_v0 }
0x3a57   :  { %v3053_v18 = vld [vmem:[#allocation4 + $0x30] sm:$0xff] }
0x3a58   :  { %4877 = vmatmul.mubr.msk.f32.vlgmr.msra.gmra.mrb[26].mxu1 %vm177_vm0, %v3208_v53  ;;  %4865 = vmatprep.mubr.msk.f32.mxu0 %vm177_vm0, %v3053_v18 }
0x3a59   :  { %5178 = vmatpush3.bf16.msra.mxu1 %v6451_v24  ;;  %4887 = vmatprep.mubr.msk.f32.mxu1 %vm5766_vm1, %v5767_v1 }
0x3a5a   :  { %5179 = vmatprep.subr.bf16.mxu1 %v5765_v0 }
0x3a5d   :  { %5181 = vmatpush3.bf16.msra.mxu1 %v6461_v49 }
0x3a5e   :  { %5188 = vmatprep.subr.bf16.mxu1 %v5765_v0 }
0x3b23   :  { %v3007_v54 = vpop.f32.mrb[24].mxu1 }
0x3b24   :  { %v3011_v44 = vadd.f32 %v3007_v54, %v2193_v37  ;;  %v4847_v39 = vpop.f32.mrb[25].mxu1 }
0x3b26   :  { %v4297_v6 = vmul.f32 -1.442695, %v3011_v44 }
0x3b2b   :  { %v3281_v56 = vpop.f32.mrb[26].mxu1 }
0x3b2c   :  { %v3285_v17 = vadd.f32 %v3281_v56, %v3157_v40  ;;  %v4878_v23 = vpop.f32.mrb[27].mxu1  ;;  %v3167_v56 = vadd.f32 %v6488_v55, %v6433_v29 }
0x3b2e   :  { %5450 = vtanh.f32 %v3285_v17  ;;  %v4308_v58 = vmul.f32 -1.442695, %v3285_v17 }
0x3b30   :  { %5452 = vpow2.f32 %v4308_v58 }
0x3b38   :  { %v5451_v57 = vpop.eup %5450 }
0x3b39   :  { %3299 = vrot.lane.b32.xlu1 %v5451_v57, %s5768_s13 }
0x3b3a   :  { %v5453_v7 = vpop.eup %5452 }
0x3b3b   :  { %v3289_v5 = vadd.f32 1.0, %v5453_v7 }
0x3b3d   :  { %5454 = vrcp.f32 %v3289_v5 }
0x3b47   :  { %v5455_v22 = vpop.eup %5454 }
0x3b48   :  { %v3297_v62 = vmul.f32 %v5455_v22, %v3295_v61 }
0x3bab   :  { %v3300_v59 = vpop.permute.xlu1 %3299 }
0x3bac   :  { %v3302_v60 = vmul.f32 %v5455_v22, %v3300_v59 }
0x3bae   :  { %3304 = vrot.lane.b32.xlu1 %v3302_v60, %s5769_s30 }
0x3c20   :  { %v3305_v63 = vpop.permute.xlu1 %3304 }
0x3c21   :  { %v3307_v2 = vadd.f32 %v3305_v63, %v3297_v62 }
0x3c23   :  { %5456 = vtanh.f32 %v3307_v2 }
0x3c24   :  { %5458 = vtanh.f32 %v3011_v44 }
0x3c25   :  { %5460 = vpow2.f32 %v4297_v6 }
0x3c2d   :  { %v5457_v3 = vpop.eup %5456 }
0x3c2e   :  { %3310 = vrot.lane.b32.xlu0 %v5457_v3, %s5768_s13  ;;  %v5459_v4 = vpop.eup %5458 }
0x3c2f   :  { %v5461_v8 = vpop.eup %5460 }
0x3c30   :  { %v3015_v9 = vadd.f32 1.0, %v5461_v8  ;;  %v3172_v8 = vadd.f32 %v6431_v27, %v6488_v55 }
0x3c32   :  { %3021 = vrot.lane.b32.xlu0 %v5459_v4, %s5768_s13  ;;  %5462 = vrcp.f32 %v3015_v9 }
0x3c3c   :  { %v5463_v12 = vpop.eup %5462 }
0x3c3d   :  { %v3019_v26 = vmul.f32 %v5463_v12, %v6441_v42 }
0x3ca0   :  { %v3311_v10 = vpop.permute.xlu0 %3310 }
0x3ca1   :  { %v3313_v11 = vmul.f32 %v5455_v22, %v3311_v10 }
0x3ca3   :  { %3316 = vrot.lane.b32.xlu1 %v3313_v11, %s5769_s30 }
0x3ca4   :  { %v3022_v15 = vpop.permute.xlu0 %3021 }
0x3ca5   :  { %v3024_v25 = vmul.f32 %v5463_v12, %v3022_v15 }
0x3ca7   :  { %3026 = vrot.lane.b32.xlu0 %v3024_v25, %s5769_s30 }
0x3d15   :  { %v3317_v41 = vpop.permute.xlu1 %3316 }
0x3d16   :  { %4888 = vmatmul.mubr.msk.f32.vlgmr.msra.gmra.mrb[28].mxu1 %vm177_vm0, %v3317_v41 }
0x3d17   :  { %5190 = vmatpush3.bf16.msra.mxu1 %v6451_v24  ;;  %4909 = vmatprep.mubr.msk.f32.mxu1 %vm5766_vm1, %v5767_v1 }
0x3d18   :  { %5191 = vmatprep.subr.bf16.mxu1 %v5765_v0 }
0x3d19   :  { %v3027_v28 = vpop.permute.xlu0 %3026 }
0x3d1a   :  { %v6503_v31 = vadd.f32 %v3027_v28, %v3019_v26 }
0x3d1b   :  { %5193 = vmatpush3.bf16.msra.mxu1 %v6461_v49 }
0x3d1c   :  { %5464 = vtanh.f32 %v6503_v31  ;;  %5200 = vmatprep.subr.bf16.mxu1 %v5765_v0 }
0x3d26   :  { %v5465_v48 = vpop.eup %5464 }
0x3d27   :  { %3032 = vrot.lane.b32.xlu0 %v5465_v48, %s5768_s13 }
0x3d99   :  { %v3033_v33 = vpop.permute.xlu0 %3032 }
0x3d9a   :  { %v3035_v34 = vmul.f32 %v5463_v12, %v3033_v33 }
0x3d9c   :  { %3037 = vrot.lane.b32.xlu0 %v3035_v34, %s5769_s30 }
0x3de9   :  { %v3386_v36 = vpop.f32.mrb[28].mxu1 }
0x3dea   :  { %v3390_v19 = vadd.f32 %v3386_v36, %v3162_v16  ;;  %v4889_v38 = vpop.f32.mrb[29].mxu1 }
0x3dec   :  { %5466 = vtanh.f32 %v3390_v19  ;;  %v4310_v46 = vmul.f32 -1.442695, %v3390_v19 }
0x3dee   :  { %5468 = vpow2.f32 %v4310_v46 }
0x3df6   :  { %v5467_v42 = vpop.eup %5466 }
0x3df7   :  { %3400 = vrot.lane.b32.xlu1 %v5467_v42, %s5768_s13  ;;  %v3177_v42 = vadd.f32 %v6488_v55, %v6438_v30 }
0x3df8   :  { %v5469_v20 = vpop.eup %5468 }
0x3df9   :  { %v3394_v47 = vadd.f32 1.0, %v5469_v20 }
0x3dfb   :  { %5470 = vrcp.f32 %v3394_v47 }
0x3e05   :  { %v5471_v32 = vpop.eup %5470 }
0x3e06   :  { %v3398_v35 = vmul.f32 %v5471_v32, %v3307_v2 }
0x3e0e   :  { %v3038_v43 = vpop.permute.xlu0 %3037 }
0x3e0f   :  { %3040 = vst.msk [vmem:[#allocation4 + $0x38] sm:$0xff] %vm177_vm0, %v3038_v43  ;;  %3041 = vst.msk [vmem:[#allocation2 + $0x10] sm:$0xff] %vm177_vm0, %v3038_v43 }
0x3e16   :  { %v3054_v45 = vld [vmem:[#allocation4 + $0x38] sm:$0xff] }
0x3e17   :  { %4866 = vmatmul.mubr.msk.f32.gmra.mrb[44].mxu0 %vm177_vm0, %v3054_v45 }
0x3e18   :  { %4898 = vmatprep.mubr.msk.f32.mxu0 %vm5766_vm1, %v5767_v1 }
0x3e69   :  { %v3401_v50 = vpop.permute.xlu1 %3400 }
0x3e6a   :  { %v3403_v51 = vmul.f32 %v5471_v32, %v3401_v50 }
0x3e6c   :  { %3405 = vrot.lane.b32.xlu1 %v3403_v51, %s5769_s30 }
0x3ede   :  { %v3406_v52 = vpop.permute.xlu1 %3405 }
0x3edf   :  { %v3408_v53 = vadd.f32 %v3406_v52, %v3398_v35 }
0x3ee1   :  { %5472 = vtanh.f32 %v3408_v53 }
0x3eea   :  { %v6519_v18 = vpop.f32.mrb[44].mxu0 }
0x3eeb   :  { %v5473_v37 = vpop.eup %5472  ;;  %v6521_v54 = vpop.f32.mrb[45].mxu0 }
0x3eec   :  { %3411 = vrot.lane.b32.xlu1 %v5473_v37, %s5768_s13 }
0x3f5e   :  { %v3412_v44 = vpop.permute.xlu1 %3411 }
0x3f5f   :  { %v3414_v39 = vmul.f32 %v5471_v32, %v3412_v44 }
0x3f61   :  { %3417 = vrot.lane.b32.xlu1 %v3414_v39, %s5769_s30 }
0x3fd3   :  { %v3418_v40 = vpop.permute.xlu1 %3417 }
0x3fd4   :  { %4899 = vmatmul.mubr.msk.f32.vlgmr.msra.gmra.mrb[46].mxu0 %vm177_vm0, %v3418_v40 }
0x3fd5   :  { %5196 = vmatpush3.bf16.msra.mxu0 %v6451_v24  ;;  %4920 = vmatprep.mubr.msk.f32.mxu0 %vm5766_vm1, %v5767_v1 }
0x3fd6   :  { %5197 = vmatprep.subr.bf16.mxu0 %v5765_v0 }
0x3fd9   :  { %5199 = vmatpush3.bf16.msra.mxu0 %v6461_v49 }
0x3fda   :  { %5206 = vmatprep.subr.bf16.mxu0 %v5765_v0 }
0x40a7   :  { %v3487_v17 = vpop.f32.mrb[46].mxu0 }
0x40a8   :  { %v3491_v23 = vadd.f32 %v3487_v17, %v3167_v56  ;;  %v4900_v57 = vpop.f32.mrb[47].mxu0  ;;  %v3182_v17 = vadd.f32 %v6436_v13, %v6488_v55 }
0x40aa   :  { %5474 = vtanh.f32 %v3491_v23  ;;  %v4312_v7 = vmul.f32 -1.442695, %v3491_v23 }
0x40ac   :  { %5476 = vpow2.f32 %v4312_v7 }
0x40b4   :  { %v5475_v58 = vpop.eup %5474 }
0x40b5   :  { %3501 = vrot.lane.b32.xlu0 %v5475_v58, %s5768_s13 }
0x40b6   :  { %v5477_v5 = vpop.eup %5476 }
0x40b7   :  { %v3495_v22 = vadd.f32 1.0, %v5477_v5 }
0x40b9   :  { %5478 = vrcp.f32 %v3495_v22 }
0x40c3   :  { %v5479_v59 = vpop.eup %5478 }
0x40c4   :  { %v3499_v62 = vmul.f32 %v5479_v59, %v3408_v53 }
0x4127   :  { %v3502_v60 = vpop.permute.xlu0 %3501 }
0x4128   :  { %v3504_v61 = vmul.f32 %v5479_v59, %v3502_v60 }
0x412a   :  { %3506 = vrot.lane.b32.xlu1 %v3504_v61, %s5769_s30 }
0x419c   :  { %v3507_v63 = vpop.permute.xlu1 %3506 }
0x419d   :  { %v3509_v29 = vadd.f32 %v3507_v63, %v3499_v62 }
0x419f   :  { %5480 = vtanh.f32 %v3509_v29 }
0x41a9   :  { %v5481_v2 = vpop.eup %5480 }
0x41aa   :  { %3512 = vrot.lane.b32.xlu0 %v5481_v2, %s5768_s13 }
0x421c   :  { %v3513_v3 = vpop.permute.xlu0 %3512 }
0x421d   :  { %v3515_v4 = vmul.f32 %v5479_v59, %v3513_v3 }
0x421f   :  { %3518 = vrot.lane.b32.xlu1 %v3515_v4, %s5769_s30  ;;  %v3187_v4 = vadd.f32 %v6488_v55, %v6521_v54 }
0x4291   :  { %v3519_v6 = vpop.permute.xlu1 %3518 }
0x4292   :  { %4910 = vmatmul.mubr.msk.f32.vlgmr.msra.gmra.mrb[30].mxu1 %vm177_vm0, %v3519_v6 }
0x4293   :  { %5202 = vmatpush3.bf16.msra.mxu1 %v6451_v24  ;;  %4931 = vmatprep.mubr.msk.f32.mxu1 %vm5766_vm1, %v5767_v1 }
0x4294   :  { %5203 = vmatprep.subr.bf16.mxu1 %v5765_v0 }
0x4297   :  { %5205 = vmatpush3.bf16.msra.mxu1 %v6461_v49 }
0x4298   :  { %5212 = vmatprep.subr.bf16.mxu1 %v5765_v0 }
0x4365   :  { %v3588_v9 = vpop.f32.mrb[30].mxu1 }
0x4366   :  { %v3592_v10 = vadd.f32 %v3588_v9, %v3172_v8  ;;  %v4911_v11 = vpop.f32.mrb[31].mxu1 }
0x4368   :  { %5482 = vtanh.f32 %v3592_v10  ;;  %v4314_v15 = vmul.f32 -1.442695, %v3592_v10 }
0x436a   :  { %5484 = vpow2.f32 %v4314_v15 }
0x4372   :  { %v5483_v12 = vpop.eup %5482 }
0x4373   :  { %3602 = vrot.lane.b32.xlu0 %v5483_v12, %s5768_s13 }
0x4374   :  { %v5485_v25 = vpop.eup %5484 }
0x4375   :  { %v3596_v41 = vadd.f32 1.0, %v5485_v25 }
0x4377   :  { %5486 = vrcp.f32 %v3596_v41 }
0x4381   :  { %v5487_v26 = vpop.eup %5486 }
0x4382   :  { %v3600_v33 = vmul.f32 %v5487_v26, %v3509_v29 }
0x43e5   :  { %v3603_v28 = vpop.permute.xlu0 %3602 }
0x43e6   :  { %v3605_v48 = vmul.f32 %v5487_v26, %v3603_v28 }
0x43e8   :  { %3607 = vrot.lane.b32.xlu1 %v3605_v48, %s5769_s30 }
0x445a   :  { %v3608_v34 = vpop.permute.xlu1 %3607 }
0x445b   :  { %v3610_v27 = vadd.f32 %v3608_v34, %v3600_v33 }
0x445d   :  { %5488 = vtanh.f32 %v3610_v27 }
0x4467   :  { %v5489_v16 = vpop.eup %5488 }
0x4468   :  { %3613 = vrot.lane.b32.xlu0 %v5489_v16, %s5768_s13 }
0x44da   :  { %v3614_v36 = vpop.permute.xlu0 %3613 }
0x44db   :  { %v3616_v19 = vmul.f32 %v5487_v26, %v3614_v36  ;;  %v3192_v36 = vadd.f32 %v6519_v18, %v6488_v55 }
0x44dd   :  { %3619 = vrot.lane.b32.xlu1 %v3616_v19, %s5769_s30 }
0x454f   :  { %v3620_v38 = vpop.permute.xlu1 %3619 }
0x4550   :  { %4921 = vmatmul.mubr.msk.f32.vlgmr.msra.gmra.mrb[48].mxu0 %vm177_vm0, %v3620_v38 }
0x4551   :  { %5208 = vmatpush3.bf16.msra.mxu0 %v6451_v24  ;;  %4942 = vmatprep.mubr.msk.f32.mxu0 %vm5766_vm1, %v5767_v1 }
0x4552   :  { %5209 = vmatprep.subr.bf16.mxu0 %v5765_v0 }
0x4555   :  { %5211 = vmatpush3.bf16.msra.mxu0 %v6461_v49 }
0x4556   :  { %5218 = vmatprep.subr.bf16.mxu0 %v5765_v0 }
0x4623   :  { %v3689_v43 = vpop.f32.mrb[48].mxu0 }
0x4624   :  { %v3693_v45 = vadd.f32 %v3689_v43, %v3177_v42  ;;  %v4922_v46 = vpop.f32.mrb[49].mxu0 }
0x4626   :  { %5490 = vtanh.f32 %v3693_v45  ;;  %v4316_v47 = vmul.f32 -1.442695, %v3693_v45 }
0x4628   :  { %5492 = vpow2.f32 %v4316_v47 }
0x4630   :  { %v5491_v20 = vpop.eup %5490 }
0x4631   :  { %3703 = vrot.lane.b32.xlu0 %v5491_v20, %s5768_s13 }
0x4632   :  { %v5493_v32 = vpop.eup %5492 }
0x4633   :  { %v3697_v50 = vadd.f32 1.0, %v5493_v32 }
0x4635   :  { %5494 = vrcp.f32 %v3697_v50 }
0x463f   :  { %v5495_v51 = vpop.eup %5494 }
0x4640   :  { %v3701_v53 = vmul.f32 %v5495_v51, %v3610_v27 }
0x46a3   :  { %v3704_v35 = vpop.permute.xlu0 %3703 }
0x46a4   :  { %v3706_v52 = vmul.f32 %v5495_v51, %v3704_v35  ;;  %v4035_v35 = vld [vmem:[#allocation18] sm:$0xff] }
0x46a6   :  { %3708 = vrot.lane.b32.xlu1 %v3706_v52, %s5769_s30  ;;  %v4036_v52 = vld [vmem:[#allocation18 + $0x8] sm:$0xff] }
0x4718   :  { %v3709_v37 = vpop.permute.xlu1 %3708 }
0x4719   :  { %v3711_v30 = vadd.f32 %v3709_v37, %v3701_v53  ;;  %v5219_v53 = vpack.c.bf16 %v4036_v52, %v4035_v35  ;;  %v4037_v37 = vld [vmem:[#allocation18 + $0x10] sm:$0xff] }
0x471b   :  { %5496 = vtanh.f32 %v3711_v30 }
0x4725   :  { %v5497_v44 = vpop.eup %5496 }
0x4726   :  { %3714 = vrot.lane.b32.xlu0 %v5497_v44, %s5768_s13 }
0x4798   :  { %v3715_v39 = vpop.permute.xlu0 %3714 }
0x4799   :  { %v3717_v40 = vmul.f32 %v5495_v51, %v3715_v39  ;;  %v4119_v39 = vld [vmem:[#allocation20] sm:$0xff] }
0x479b   :  { %3720 = vrot.lane.b32.xlu1 %v3717_v40, %s5769_s30  ;;  %v4120_v40 = vld [vmem:[#allocation20 + $0x8] sm:$0xff] }
0x480d   :  { %v3721_v56 = vpop.permute.xlu1 %3720 }
0x480e   :  { %4932 = vmatmul.mubr.msk.f32.vlgmr.msra.gmra.mrb[32].mxu1 %vm177_vm0, %v3721_v56  ;;  %v4121_v56 = vld [vmem:[#allocation20 + $0x10] sm:$0xff] }
0x480f   :  { %5214 = vmatpush3.bf16.msra.mxu1 %v6451_v24  ;;  %4953 = vmatprep.mubr.msk.f32.mxu1 %vm5766_vm1, %v5767_v1 }
0x4810   :  { %5215 = vmatprep.subr.bf16.mxu1 %v5765_v0 }
0x4813   :  { %5217 = vmatpush3.bf16.msra.mxu1 %v6461_v49 }
0x4814   :  { %5224 = vmatprep.subr.bf16.mxu1 %v5765_v0 }
0x48e1   :  { %v3790_v23 = vpop.f32.mrb[32].mxu1 }
0x48e2   :  { %v3794_v57 = vadd.f32 %v3790_v23, %v3182_v17  ;;  %v4933_v58 = vpop.f32.mrb[33].mxu1  ;;  %v5225_v17 = vpack.c.bf16 %v4120_v40, %v4119_v39  ;;  %v4122_v23 = vld [vmem:[#allocation20 + $0x18] sm:$0xff] }
0x48e3   :  { %v5228_v58 = vpack.c.bf16 %v4122_v23, %v4121_v56 }
0x48e4   :  { %5498 = vtanh.f32 %v3794_v57  ;;  %v4318_v24 = vmul.f32 -1.442695, %v3794_v57 }
0x48e6   :  { %5500 = vpow2.f32 %v4318_v24 }
0x48ee   :  { %v5499_v7 = vpop.eup %5498 }
0x48ef   :  { %3804 = vrot.lane.b32.xlu0 %v5499_v7, %s5768_s13  ;;  %v4124_v7 = vld [vmem:[#allocation20 + $0x28] sm:$0xff] }
0x48f0   :  { %v5501_v5 = vpop.eup %5500 }
0x48f1   :  { %v3798_v22 = vadd.f32 1.0, %v5501_v5 }
0x48f3   :  { %5502 = vrcp.f32 %v3798_v22  ;;  %v4125_v22 = vld [vmem:[#allocation20 + $0x30] sm:$0xff] }
0x48fd   :  { %v5503_v59 = vpop.eup %5502 }
0x48fe   :  { %v3802_v61 = vmul.f32 %v5503_v59, %v3711_v30  ;;  %v4038_v30 = vld [vmem:[#allocation18 + $0x18] sm:$0xff] }
0x48ff   :  { %v5222_v44 = vpack.c.bf16 %v4038_v30, %v4037_v37 }
0x4961   :  { %v3805_v60 = vpop.permute.xlu0 %3804 }
0x4962   :  { %v3807_v49 = vmul.f32 %v5503_v59, %v3805_v60 }
0x4964   :  { %3809 = vrot.lane.b32.xlu1 %v3807_v49, %s5769_s30 }
0x49d6   :  { %v3810_v62 = vpop.permute.xlu1 %3809 }
0x49d7   :  { %v3812_v13 = vadd.f32 %v3810_v62, %v3802_v61  ;;  %v4127_v61 = vld [vmem:[#allocation20 + $0x40] sm:$0xff]  ;;  %v4128_v62 = vld [vmem:[#allocation20 + $0x48] sm:$0xff] }
0x49d9   :  { %5504 = vtanh.f32 %v3812_v13 }
0x49e3   :  { %v5505_v63 = vpop.eup %5504 }
0x49e4   :  { %3815 = vrot.lane.b32.xlu0 %v5505_v63, %s5768_s13  ;;  %v4129_v63 = vld [vmem:[#allocation20 + $0x50] sm:$0xff] }
0x4a56   :  { %v3816_v29 = vpop.permute.xlu0 %3815 }
0x4a57   :  { %v3818_v2 = vmul.f32 %v5503_v59, %v3816_v29  ;;  %v4126_v59 = vld [vmem:[#allocation20 + $0x38] sm:$0xff] }
0x4a58   :  { %v5234_v49 = vpack.c.bf16 %v4126_v59, %v4125_v22  ;;  %v4130_v29 = vld [vmem:[#allocation20 + $0x58] sm:$0xff] }
0x4a59   :  { %3821 = vrot.lane.b32.xlu1 %v3818_v2, %s5769_s30  ;;  %v5240_v2 = vpack.c.bf16 %v4130_v29, %v4129_v63 }
0x4acb   :  { %v3822_v3 = vpop.permute.xlu1 %3821 }
0x4acc   :  { %4943 = vmatmul.mubr.msk.f32.vlgmr.msra.gmra.mrb[50].mxu0 %vm177_vm0, %v3822_v3  ;;  %v4132_v3 = vld [vmem:[#allocation20 + $0x68] sm:$0xff] }
0x4acd   :  { %4964 = vmatprep.mubr.msk.f32.mxu0 %vm5766_vm1, %v5767_v1  ;;  %5220 = vmatpush3.bf16.msra.mxu0 %v5219_v53 }
0x4ace   :  { %5221 = vmatprep.subr.bf16.mxu0 %v5765_v0 }
0x4ad1   :  { %5223 = vmatpush3.bf16.msra.mxu0 %v5222_v44 }
0x4b9f   :  { %v3891_v6 = vpop.f32.mrb[50].mxu0 }
0x4ba0   :  { %v3895_v8 = vadd.f32 %v3891_v6, %v3187_v4  ;;  %v4944_v9 = vpop.f32.mrb[51].mxu0 }
0x4ba2   :  { %5506 = vtanh.f32 %v3895_v8  ;;  %v4320_v11 = vmul.f32 -1.442695, %v3895_v8 }
0x4ba4   :  { %5508 = vpow2.f32 %v4320_v11  ;;  %v4133_v11 = vld [vmem:[#allocation20 + $0x70] sm:$0xff] }
0x4bac   :  { %v5507_v10 = vpop.eup %5506 }
0x4bad   :  { %3905 = vrot.lane.b32.xlu0 %v5507_v10, %s5768_s13 }
0x4bae   :  { %v5509_v12 = vpop.eup %5508 }
0x4baf   :  { %v3899_v15 = vadd.f32 1.0, %v5509_v12  ;;  %v4134_v12 = vld [vmem:[#allocation20 + $0x78] sm:$0xff] }
0x4bb1   :  { %5510 = vrcp.f32 %v3899_v15  ;;  %v5246_v15 = vpack.c.bf16 %v4134_v12, %v4133_v11 }
0x4bbb   :  { %v5511_v25 = vpop.eup %5510 }
0x4bbc   :  { %v3903_v28 = vmul.f32 %v5511_v25, %v3812_v13  ;;  %v5237_v13 = vpack.c.bf16 %v4128_v62, %v4127_v61 }
0x4c1f   :  { %v3906_v41 = vpop.permute.xlu0 %3905 }
0x4c20   :  { %v3908_v26 = vmul.f32 %v5511_v25, %v3906_v41 }
0x4c22   :  { %3910 = vrot.lane.b32.xlu1 %v3908_v26, %s5769_s30 }
0x4c94   :  { %v3911_v48 = vpop.permute.xlu1 %3910 }
0x4c95   :  { %v3913_v54 = vadd.f32 %v3911_v48, %v3903_v28  ;;  %v4325_v28 = vld [vmem:[%s6648_s14] ss:$0 sm:$0xff] }
0x4c97   :  { %5512 = vtanh.f32 %v3913_v54 }
0x4ca1   :  { %v5513_v33 = vpop.eup %5512 }
0x4ca2   :  { %3916 = vrot.lane.b32.xlu0 %v5513_v33, %s5768_s13 }
0x4d14   :  { %v3917_v34 = vpop.permute.xlu0 %3916 }
0x4d15   :  { %v3919_v27 = vmul.f32 %v5511_v25, %v3917_v34 }
0x4d17   :  { %3922 = vrot.lane.b32.xlu1 %v3919_v27, %s5769_s30 }
0x4d89   :  { %v3923_v16 = vpop.permute.xlu1 %3922 }
0x4d8a   :  { %4954 = vmatmul.mubr.msk.f32.vlgmr.msra.gmra.mrb[34].mxu1 %vm177_vm0, %v3923_v16 }
0x4d8b   :  { %4999 = vmatprep.mubr.msk.f32.mxu1 %vm5766_vm1, %v5767_v1  ;;  %5226 = vmatpush3.bf16.msra.mxu1 %v5225_v17 }
0x4d8c   :  { %5227 = vmatprep.subr.bf16.mxu1 %v5765_v0 }
0x4d8f   :  { %5229 = vmatpush3.bf16.msra.mxu1 %v5228_v58 }
0x4d90   :  { %5230 = vmatprep.subr.bf16.mxu1 %v5765_v0 }
0x4e5d   :  { %v3992_v19 = vpop.f32.mrb[34].mxu1 }
0x4e5e   :  { %v3996_v38 = vadd.f32 %v3992_v19, %v3192_v36  ;;  %v4955_v42 = vpop.f32.mrb[35].mxu1 }
0x4e60   :  { %5514 = vtanh.f32 %v3996_v38  ;;  %v4322_v45 = vmul.f32 -1.442695, %v3996_v38 }
0x4e62   :  { %5516 = vpow2.f32 %v4322_v45 }
0x4e6a   :  { %v5515_v43 = vpop.eup %5514 }
0x4e6b   :  { %4006 = vrot.lane.b32.xlu0 %v5515_v43, %s5768_s13 }
0x4e6c   :  { %v5517_v46 = vpop.eup %5516 }
0x4e6d   :  { %v4000_v20 = vadd.f32 1.0, %v5517_v46 }
0x4e6f   :  { %5518 = vrcp.f32 %v4000_v20 }
0x4e79   :  { %v5519_v47 = vpop.eup %5518 }
0x4e7a   :  { %v4004_v1 = vmul.f32 %v5519_v47, %v3913_v54 }
0x4edd   :  { %v4007_v32 = vpop.permute.xlu0 %4006 }
0x4ede   :  { %v4009_v50 = vmul.f32 %v5519_v47, %v4007_v32 }
0x4ee0   :  { %4011 = vrot.lane.b32.xlu1 %v4009_v50, %s5769_s30 }
0x4f52   :  { %v4012_v51 = vpop.permute.xlu1 %4011 }
0x4f53   :  { %v4014_v55 = vadd.f32 %v4012_v51, %v4004_v1 }
0x4f55   :  { %5520 = vtanh.f32 %v4014_v55 }
0x4f5f   :  { %v5521_v18 = vpop.eup %5520 }
0x4f60   :  { %4017 = vrot.lane.b32.xlu0 %v5521_v18, %s5768_s13 }
0x4f64   :  { %1038 = vrot.lane.b32.xlu0 %v6190_v14, %s5770_s9 }
0x4f68   :  { %3043 = vrot.lane.b32.xlu0 %v6503_v31, %s5770_s9  ;;  %v4123_v31 = vld [vmem:[#allocation20 + $0x20] sm:$0xff] }
0x4f69   :  { %v5231_v5 = vpack.c.bf16 %v4124_v7, %v4123_v31 }
0x4f6b   :  { %5232 = vmatpush3.bf16.msra.mxu1 %v5231_v5 }
0x4f6c   :  { %5233 = vmatprep.subr.bf16.mxu1 %v5765_v0 }
0x4f6f   :  { %5235 = vmatpush3.bf16.msra.mxu1 %v5234_v49 }
0x4f70   :  { %5236 = vmatprep.subr.bf16.mxu1 %v5765_v0 }
0x4f73   :  { %5238 = vmatpush3.bf16.msra.mxu1 %v5237_v13 }
0x4f74   :  { %5239 = vmatprep.subr.bf16.mxu1 %v5765_v0 }
0x4f77   :  { %5241 = vmatpush3.bf16.msra.mxu1 %v5240_v2 }
0x4f78   :  { %5242 = vmatprep.subr.bf16.mxu1 %v5765_v0 }
0x4fd2   :  { %v4018_v57 = vpop.permute.xlu0 %4017 }
0x4fd3   :  { %v4020_v14 = vmul.f32 %v5519_v47, %v4018_v57 }
0x4fd5   :  { %4022 = vrot.lane.b32.xlu1 %v4020_v14, %s5769_s30 }
0x4fd6   :  { %v1039_v24 = vpop.permute.xlu0 %1038 }
0x4fd7   :  { %1041 = vst.msk [vmem:[#allocation3] sm:$0xff] %vm177_vm0, %v1039_v24 }
0x4fd9   :  { %2044 = vrot.lane.b32.xlu1 %v6341_v21, %s5770_s9  ;;  %v4131_v21 = vld [vmem:[#allocation20 + $0x60] sm:$0xff] }
0x4fda   :  { %v3044_v60 = vpop.permute.xlu0 %3043  ;;  %v5243_v4 = vpack.c.bf16 %v4132_v3, %v4131_v21 }
0x4fdb   :  { %3046 = vst.msk [vmem:[#allocation3 + $0x10] sm:$0xff] %vm177_vm0, %v3044_v60 }
0x4fdc   :  { %5244 = vmatpush3.bf16.msra.mxu1 %v5243_v4 }
0x4fdd   :  { %4027 = vrot.lane.b32.xlu1 %v4014_v55, %s5770_s9  ;;  %5245 = vmatprep.subr.bf16.mxu1 %v5765_v0  ;;  %v4323_v0 = vld [vmem:[%s6646_s12] ss:$0 sm:$0xff] }
0x4fe0   :  { %5247 = vmatpush3.bf16.msra.mxu1 %v5246_v15 }
0x5047   :  { %v4023_v6 = vpop.permute.xlu1 %4022 }
0x5048   :  { %4025 = vst.msk [vmem:[#allocation2 + $0x18] sm:$0xff] %vm177_vm0, %v4023_v6 }
0x504b   :  { %v2045_v8 = vpop.permute.xlu1 %2044 }
0x504c   :  { %2047 = vst.msk [vmem:[#allocation3 + $0x8] sm:$0xff] %vm177_vm0, %v2045_v8 }
0x504f   :  { %v4028_v9 = vpop.permute.xlu1 %4027  ;;  %v4034_v10 = vld [vmem:[#allocation2 + $0x18] sm:$0xff] }
0x5050   :  { %4030 = vst.msk [vmem:[#allocation3 + $0x18] sm:$0xff] %vm177_vm0, %v4028_v9  ;;  %4965 = vmatmul.mubr.msk.f32.vlgmr.msra.gmra.mrb[52].mxu0 %vm177_vm0, %v4034_v10 }
0x5123   :  { %v4115_v25 = vpop.f32.mrb[52].mxu0 }
0x5124   :  { %v4116_v41 = vadd.f32 %v4323_v0, %v4115_v25  ;;  %v4966_v26 = vpop.f32.mrb[53].mxu0 }
0x5126   :  { %5000 = vmatmul.mubr.f32.vlgmr.msra.gmra.mrb[36].mxu1 %v4116_v41 }
0x51f9   :  { %v4208_v48 = vpop.f32.mrb[36].mxu1 }
0x51fa   :  { %v4209_v54 = vadd.f32 %v4325_v28, %v4208_v48  ;;  %v5001_v33 = vpop.f32.mrb[37].mxu1 }
0x51fc   :  { %4212 = vst [vmem:[#allocation21] sm:$0xff] %v4209_v54 }
0x51fd   :  { %5731 = shalt.err (!%p5728_p6)
}
0x51fe   :  { %s5732_s1 = scalar_lea.hbm %s6649_s15, 128 }
0x51ff   :  { %p5733_p7 = scmp.ne.s32.totalorder %s6649_s15, %s5732_s1  ;;  %p5736_p8 = scmp.lt.u32.totalorder %s5732_s1, %s6649_s15 }
0x5201   :  { %p5738_p9 = pnand %p5736_p8, %p5733_p7 }
0x5203   :  { %5741 = shalt.err (!%p5738_p9)
}
0x5204   :  { %4222 = dma.vmem_to_hbm [thread:$0]  %s4220_s2, 128, %s6649_s15, [#allocation8]  }
0x5205   :  { %5752 = dma.done.wait [#allocation8], 128  }
0x5206   :  { %5753 = vsyncadd [#allocation8], 4294967168 }
0x5207   :  { %4226 = vsyncpa [#allocation7], 1 }
0x5208   :  { %4227 = vsyncpa [#allocation10], 1 }
0x5209   :  { %4228 = vsyncpa [#allocation13], 1 }
0x520a   :  { %4229 = vsyncpa [#allocation16], 1 }
0x520b   :  { %4230 = vsyncpa [#allocation19], 1 }
0x520c   :  { %4231 = vsyncpa [#allocation8], 1 }

</bundles_post_ra>
